<compile_context>
chip_gen: v7x
topology: tpu7x:2x2x1
jax: 0.10.0
libtpu: 0.0.40
codegen_flags: <defaults>
</compile_context>

<pallas_src>
import functools
import math

import jax
import jax.numpy as jnp
import numpy as np
from jax.experimental import pallas as pl
from jax.experimental.pallas import tpu as pltpu


def _same_pad(kernel_size, dilation=1):
    return (dilation * (kernel_size - 1)) // 2


_OFF = 32     # fixed, 8-aligned sublane offset of the data rows inside pad_ref
_HALO = 32    # >= max "same" pad in the network (28 for the k=29, dilation=2 conv)


# ---------------------------------------------------------------------------
# Fused Pallas kernel: one batch row per grid step, activations (T1, C) in VMEM.
# Pointwise convs are bf16 MXU matmuls; depthwise convs use a shared padded scratch.
# ---------------------------------------------------------------------------
def _matchboxnet_kernel(x_ref, *args, T1):
    (c1_w, c1_b,
     b1_dw1, b1_w1, b1_b1, b1_dw2, b1_wt, b1_bt,
     b2_dw1, b2_w1, b2_b1, b2_dw2, b2_wt, b2_bt,
     b3_dw1, b3_w1, b3_b1, b3_dw2, b3_wt, b3_bt,
     c2_dw, c2_w, c2_b,
     c3_w, c3_b,
     c4_w, c4_b,
     o_ref, pad_ref) = args

    f32 = jnp.float32

    # Zero ONLY the halo bands, once per grid step (data rows are always overwritten
    # before they are read).  Safe under megacore sharding of the batch grid.
    pad_ref[pl.ds(0, _OFF), :] = jnp.zeros((_OFF, 128), f32)
    pad_ref[pl.ds(_OFF + T1, _HALO), :] = jnp.zeros((_HALO, 128), f32)

    def pw(x2d, w_ref, b_ref, relu):
        """Pointwise conv (+ folded BN) as a bf16 MXU matmul with f32 accumulation."""
        y = jnp.dot(x2d.astype(jnp.bfloat16), w_ref[...],
                    preferred_element_type=f32) + b_ref[...]
        return jnp.maximum(y, 0.0) if relu else y

    def dw_same(x2d, w_ref, *, k, dilation=1):
        """'same'-padded depthwise temporal conv (stride 1) via the shared pad scratch."""
        cin = x2d.shape[-1]
        pad = _same_pad(k, dilation)
        pad_ref[pl.ds(_OFF, T1), pl.ds(0, cin)] = x2d          # 8-aligned sublane offset
        # 4 partial accumulators break the length-k serial VALU dependency chain.
        accs = [jnp.zeros((T1, cin), f32) for _ in range(4)]
        for kk in range(k):                                    # statically unrolled taps
            tap = pad_ref[pl.ds(_OFF - pad + kk * dilation, T1), pl.ds(0, cin)]
            accs[kk % 4] = accs[kk % 4] + tap * w_ref[pl.ds(kk, 1), :]
        return (accs[0] + accs[1]) + (accs[2] + accs[3])

    # ---- C1: stride-2 depthwise folded (host-side im2col) into ONE matmul ----------
    h = pw(x_ref[...], c1_w, c1_b, relu=True)                  # (T1, 128)

    # ---- B1/B2/B3: dw -> pw -> ReLU, then dw -> fused [pw ; 1x1 residual], ReLU ----
    for (k, dw1, w1, b1, dw2, wt, bt) in (
            (13, b1_dw1, b1_w1, b1_b1, b1_dw2, b1_wt, b1_bt),
            (15, b2_dw1, b2_w1, b2_b1, b2_dw2, b2_wt, b2_bt),
            (17, b3_dw1, b3_w1, b3_b1, b3_dw2, b3_wt, b3_bt)):
        y = pw(dw_same(h, dw1, k=k), w1, b1, relu=True)        # (T1, 64)
        z = jnp.concatenate([dw_same(y, dw2, k=k), h], axis=-1)   # (T1, 64 + Cin_blk)
        h = pw(z, wt, bt, relu=True)                           # ReLU(y2 + residual)

    # ---- C2 (k=29, dilation=2) and C3 (k=1, folded into the matmul) ----------------
    h = pw(dw_same(h, c2_dw, k=29, dilation=2), c2_w, c2_b, relu=True)   # (T1, 128)
    h = pw(h, c3_w, c3_b, relu=True)                                      # (T1, 128)

    # ---- AdaptiveAvgPool1d(1) + C4 (1x1 conv with bias) ----------------------------
    pooled = jnp.mean(h, axis=0, keepdims=True)                # (1, 128)
    o_ref[...] = pw(pooled, c4_w, c4_b, relu=False)            # (1, num_labels)


# ---------------------------------------------------------------------------
# Host-side parameter folding (one-time)
# ---------------------------------------------------------------------------
def fold_matchboxnet_params(params):
    """One-time host-side folding -> flat kernel-ready weight tuple.

    BN folded into pointwise weights/biases; C1 depthwise folded with its pointwise
    (im2col weight); each block's second pointwise stacked with its 1x1 residual;
    C3 (k=1) collapsed; all matmul weights cast to bf16 (depthwise / biases stay f32).
    """
    bf16 = jnp.bfloat16
    f32 = jnp.float32
    out = []

    c1 = params['C1']
    c1_pw = c1['w_pw'] * c1['scale'][None, :]                               # (Cin, 128)
    c1_W = (c1['w_dw'][:, :, None] * c1_pw[None, :, :]).reshape(-1, c1_pw.shape[-1])
    out += [c1_W.astype(bf16), c1['bias'].reshape(1, -1).astype(f32)]

    for name in ('B1', 'B2', 'B3'):
        bp = params[name]
        s1, s2 = bp['subs']
        out += [s1['w_dw'].astype(f32),
                (s1['w_pw'] * s1['scale'][None, :]).astype(bf16),
                s1['bias'].reshape(1, -1).astype(f32)]
        w2 = s2['w_pw'] * s2['scale'][None, :]                               # (64, 64)
        wr = bp['w_res'] * bp['scale_res'][None, :]                          # (Cin_blk, 64)
        out += [s2['w_dw'].astype(f32),
                jnp.concatenate([w2, wr], axis=0).astype(bf16),              # stacked K
                (s2['bias'] + bp['bias_res']).reshape(1, -1).astype(f32)]

    c2 = params['C2']
    out += [c2['w_dw'].astype(f32),
            (c2['w_pw'] * c2['scale'][None, :]).astype(bf16),
            c2['bias'].reshape(1, -1).astype(f32)]

    c3 = params['C3']
    c3_W = c3['w_dw'][0][:, None] * c3['w_pw'] * c3['scale'][None, :]
    out += [c3_W.astype(bf16), c3['bias'].reshape(1, -1).astype(f32)]

    out += [params['C4_w'].astype(bf16), params['C4_b'].reshape(1, -1).astype(f32)]
    return tuple(out)


# ---------------------------------------------------------------------------
# Pallas forward wrapper
# ---------------------------------------------------------------------------
def matchboxnet_forward(folded_weights, features, seqlen=None):
    """features: (B, in_channels, T) (PyTorch NCW). Returns (B, num_labels, 1)."""
    del seqlen                                       # unused, as in the reference module
    x = jnp.transpose(features, (0, 2, 1)).astype(jnp.float32)       # (B, T, Cin)
    B, T, _ = x.shape
    L = folded_weights[-1].shape[-1]

    # C1 geometry: k=11, stride=2, "same" pad=5 -> T1 frames everywhere after C1.
    pad0 = _same_pad(11)
    T1 = (T + 2 * pad0 - 11) // 2 + 1

    # Host-side im2col for the strided C1 conv (one XLA slice/concat): in-kernel, C1
    # becomes a single MXU matmul against the host-folded (11*Cin, 128) weight.
    xp = jnp.pad(x, ((0, 0), (pad0, pad0), (0, 0)))
    cols = [xp[:, kk: kk + 2 * T1 - 1: 2, :] for kk in range(11)]    # each (B, T1, Cin)
    x_cols = jnp.concatenate(cols, axis=-1)                          # (B, T1, 11*Cin)

    w_specs = [pl.BlockSpec(w.shape, lambda b: (0, 0)) for w in folded_weights]
    out = pl.pallas_call(
        functools.partial(_matchboxnet_kernel, T1=T1),
        out_shape=jax.ShapeDtypeStruct((B, 1, L), jnp.float32),
        grid=(B,),
        in_specs=[pl.BlockSpec((None, T1, x_cols.shape[-1]), lambda b: (b, 0, 0))]
                 + w_specs,
        out_specs=pl.BlockSpec((None, 1, L), lambda b: (b, 0, 0)),
        scratch_shapes=[pltpu.VMEM((_OFF + T1 + _HALO, 128), jnp.float32)],
        compiler_params=pltpu.CompilerParams(
            dimension_semantics=("parallel",),        # megacore shards batch rows (v7x)
            vmem_limit_bytes=48 * 1024 * 1024),
        # TODO(synk): for very long audio add a time-tiling grid axis with a +/-28 frame halo.
    )(x_cols, *folded_weights)
    return jnp.transpose(out, (0, 2, 1))                             # (B, num_labels, 1)


# ---------------------------------------------------------------------------
# Pure-JAX f32 reference (original, unfolded parameters) for correctness checking
# ---------------------------------------------------------------------------
def matchboxnet_reference(params, features):
    x = jnp.transpose(features, (0, 2, 1)).astype(jnp.float32)

    def tcs(x, p, k, stride=1, dilation=1, relu=True):
        B, T, Cin = x.shape
        pad = _same_pad(k, dilation)
        t_out = (T + 2 * pad - dilation * (k - 1) - 1) // stride + 1
        xp = jnp.pad(x, ((0, 0), (pad, pad), (0, 0)))
        acc = jnp.zeros((B, t_out, Cin), jnp.float32)
        for kk in range(k):
            s = kk * dilation
            tap = xp[:, s: s + stride * (t_out - 1) + 1: stride, :]
            acc = acc + tap * p['w_dw'][kk][None, None, :]
        out = jnp.einsum('btc,cd->btd', acc, p['w_pw'], precision='highest')
        out = out * p['scale'][None, None, :] + p['bias'][None, None, :]
        return jnp.maximum(out, 0.0) if relu else out

    x = tcs(x, params['C1'], 11, stride=2)
    for name, k in (('B1', 13), ('B2', 15), ('B3', 17)):
        bp = params[name]
        res = jnp.einsum('btc,cd->btd', x, bp['w_res'], precision='highest')
        res = res * bp['scale_res'][None, None, :] + bp['bias_res'][None, None, :]
        y = tcs(x, bp['subs'][0], k, relu=True)
        y = tcs(y, bp['subs'][1], k, relu=False)
        x = jnp.maximum(y + res, 0.0)
    x = tcs(x, params['C2'], 29, dilation=2)
    x = tcs(x, params['C3'], 1)
    pooled = jnp.mean(x, axis=1)
    out = jnp.einsum('bc,cl->bl', pooled, params['C4_w'], precision='highest')
    out = out + params['C4_b'][None, :]
    return out[..., None]


# ---------------------------------------------------------------------------
# Parameter construction (deterministic, PyTorch-default-like ranges)
# ---------------------------------------------------------------------------
def _init_bn(key, c):
    k1, k2, k3, k4 = jax.random.split(key, 4)
    gamma = jax.random.uniform(k1, (c,), minval=0.5, maxval=1.5)
    beta = jax.random.uniform(k2, (c,), minval=-0.1, maxval=0.1)
    mean = jax.random.uniform(k3, (c,), minval=-0.1, maxval=0.1)
    var = jax.random.uniform(k4, (c,), minval=0.5, maxval=1.5)
    scale = gamma / jnp.sqrt(var + 1e-5)            # BatchNorm1d eps default
    bias = beta - mean * scale
    return scale.astype(jnp.float32), bias.astype(jnp.float32)


def _make_subblock(key, cin, cout, k):
    k1, k2, k3 = jax.random.split(key, 3)
    b_dw = 1.0 / math.sqrt(k)
    b_pw = 1.0 / math.sqrt(cin)
    w_dw = jax.random.uniform(k1, (k, cin), minval=-b_dw, maxval=b_dw, dtype=jnp.float32)
    w_pw = jax.random.uniform(k2, (cin, cout), minval=-b_pw, maxval=b_pw, dtype=jnp.float32)
    scale, bias = _init_bn(k3, cout)
    return dict(w_dw=w_dw, w_pw=w_pw, scale=scale, bias=bias)


def _make_mainblock(key, cin, cout, k, repeat=2):
    keys = jax.random.split(key, repeat + 2)
    subs, c = [], cin
    for r in range(repeat):
        subs.append(_make_subblock(keys[r], c, cout, k))
        c = cout
    b = 1.0 / math.sqrt(cin)
    w_res = jax.random.uniform(keys[-2], (cin, cout), minval=-b, maxval=b, dtype=jnp.float32)
    scale_r, bias_r = _init_bn(keys[-1], cout)
    return dict(subs=subs, w_res=w_res, scale_res=scale_r, bias_res=bias_r)


def make_matchboxnet_params(key, in_channels, num_labels):
    ks = jax.random.split(key, 8)
    b4 = 1.0 / math.sqrt(128)
    return dict(
        C1=_make_subblock(ks[0], in_channels, 128, 11),
        B1=_make_mainblock(ks[1], 128, 64, 13),
        B2=_make_mainblock(ks[2], 64, 64, 15),
        B3=_make_mainblock(ks[3], 64, 64, 17),
        C2=_make_subblock(ks[4], 64, 128, 29),
        C3=_make_subblock(ks[5], 128, 128, 1),
        C4_w=jax.random.uniform(ks[6], (128, num_labels), minval=-b4, maxval=b4,
                                dtype=jnp.float32),
        C4_b=jax.random.uniform(ks[7], (num_labels,), minval=-b4, maxval=b4,
                                dtype=jnp.float32),
    )


if __name__ == "__main__":
    B, IN_CH, T, NUM_LABELS = 2, 16, 32, 10   # T=32 -> T1=16 (multiple of 8) after stride-2 C1

    root = jax.random.PRNGKey(0)
    k_feat, k_params = jax.random.split(root)
    features = jax.random.normal(k_feat, (B, IN_CH, T), dtype=jnp.float32)
    seqlen = jnp.full((B,), T, dtype=jnp.int32)

    params = make_matchboxnet_params(k_params, IN_CH, NUM_LABELS)
    folded = fold_matchboxnet_params(params)        # one-time host-side folding

    fwd = jax.jit(matchboxnet_forward)
    out = jax.block_until_ready(fwd(folded, features, seqlen))
    assert out.shape == (B, NUM_LABELS, 1)

    # Pure-JAX f32 reference with the ORIGINAL (unfolded) parameters; the kernel uses
    # bf16 MXU matmuls (f32 accumulation), hence the slightly relaxed tolerance.
    ref = matchboxnet_reference(params, features)
    np.testing.assert_allclose(np.asarray(out), np.asarray(ref), rtol=3e-2, atol=3e-2)

    print("KERNEL_OK")
</pallas_src>

<mosaic_0001>
module attributes {stable_mosaic.version = 11 : i64} {
  func.func @_matchboxnet_kernel(%arg0: i32, %arg1: memref<1x16x176xf32, #tpu.memory_space<vmem>>, %arg2: memref<176x128xbf16, #tpu.memory_space<vmem>>, %arg3: memref<1x128xf32, #tpu.memory_space<vmem>>, %arg4: memref<13x128xf32, #tpu.memory_space<vmem>>, %arg5: memref<128x64xbf16, #tpu.memory_space<vmem>>, %arg6: memref<1x64xf32, #tpu.memory_space<vmem>>, %arg7: memref<13x64xf32, #tpu.memory_space<vmem>>, %arg8: memref<192x64xbf16, #tpu.memory_space<vmem>>, %arg9: memref<1x64xf32, #tpu.memory_space<vmem>>, %arg10: memref<15x64xf32, #tpu.memory_space<vmem>>, %arg11: memref<64x64xbf16, #tpu.memory_space<vmem>>, %arg12: memref<1x64xf32, #tpu.memory_space<vmem>>, %arg13: memref<15x64xf32, #tpu.memory_space<vmem>>, %arg14: memref<128x64xbf16, #tpu.memory_space<vmem>>, %arg15: memref<1x64xf32, #tpu.memory_space<vmem>>, %arg16: memref<17x64xf32, #tpu.memory_space<vmem>>, %arg17: memref<64x64xbf16, #tpu.memory_space<vmem>>, %arg18: memref<1x64xf32, #tpu.memory_space<vmem>>, %arg19: memref<17x64xf32, #tpu.memory_space<vmem>>, %arg20: memref<128x64xbf16, #tpu.memory_space<vmem>>, %arg21: memref<1x64xf32, #tpu.memory_space<vmem>>, %arg22: memref<29x64xf32, #tpu.memory_space<vmem>>, %arg23: memref<64x128xbf16, #tpu.memory_space<vmem>>, %arg24: memref<1x128xf32, #tpu.memory_space<vmem>>, %arg25: memref<128x128xbf16, #tpu.memory_space<vmem>>, %arg26: memref<1x128xf32, #tpu.memory_space<vmem>>, %arg27: memref<128x10xbf16, #tpu.memory_space<vmem>>, %arg28: memref<1x10xf32, #tpu.memory_space<vmem>>, %arg29: memref<1x1x10xf32, #tpu.memory_space<vmem>>, %arg30: memref<80x128xf32, #tpu.memory_space<vmem>>) attributes {dimension_semantics = [#tpu.dimension_semantics<parallel>], iteration_bounds = array<i64: 2>, scalar_prefetch = 0 : i64, scratch_operands = 1 : i64, tpu.core_type = #tpu.core_type<tc>, window_params = [{transform_indices = @transform_0, window_bounds = array<i64: 1, 16, 176>}, {pipeline_mode = #tpu.pipeline_mode<synchronous>, transform_indices = @transform_1, window_bounds = array<i64: 176, 128>}, {pipeline_mode = #tpu.pipeline_mode<synchronous>, transform_indices = @transform_2, window_bounds = array<i64: 1, 128>}, {pipeline_mode = #tpu.pipeline_mode<synchronous>, transform_indices = @transform_3, window_bounds = array<i64: 13, 128>}, {pipeline_mode = #tpu.pipeline_mode<synchronous>, transform_indices = @transform_4, window_bounds = array<i64: 128, 64>}, {pipeline_mode = #tpu.pipeline_mode<synchronous>, transform_indices = @transform_5, window_bounds = array<i64: 1, 64>}, {pipeline_mode = #tpu.pipeline_mode<synchronous>, transform_indices = @transform_6, window_bounds = array<i64: 13, 64>}, {pipeline_mode = #tpu.pipeline_mode<synchronous>, transform_indices = @transform_7, window_bounds = array<i64: 192, 64>}, {pipeline_mode = #tpu.pipeline_mode<synchronous>, transform_indices = @transform_8, window_bounds = array<i64: 1, 64>}, {pipeline_mode = #tpu.pipeline_mode<synchronous>, transform_indices = @transform_9, window_bounds = array<i64: 15, 64>}, {pipeline_mode = #tpu.pipeline_mode<synchronous>, transform_indices = @transform_10, window_bounds = array<i64: 64, 64>}, {pipeline_mode = #tpu.pipeline_mode<synchronous>, transform_indices = @transform_11, window_bounds = array<i64: 1, 64>}, {pipeline_mode = #tpu.pipeline_mode<synchronous>, transform_indices = @transform_12, window_bounds = array<i64: 15, 64>}, {pipeline_mode = #tpu.pipeline_mode<synchronous>, transform_indices = @transform_13, window_bounds = array<i64: 128, 64>}, {pipeline_mode = #tpu.pipeline_mode<synchronous>, transform_indices = @transform_14, window_bounds = array<i64: 1, 64>}, {pipeline_mode = #tpu.pipeline_mode<synchronous>, transform_indices = @transform_15, window_bounds = array<i64: 17, 64>}, {pipeline_mode = #tpu.pipeline_mode<synchronous>, transform_indices = @transform_16, window_bounds = array<i64: 64, 64>}, {pipeline_mode = #tpu.pipeline_mode<synchronous>, transform_indices = @transform_17, window_bounds = array<i64: 1, 64>}, {pipeline_mode = #tpu.pipeline_mode<synchronous>, transform_indices = @transform_18, window_bounds = array<i64: 17, 64>}, {pipeline_mode = #tpu.pipeline_mode<synchronous>, transform_indices = @transform_19, window_bounds = array<i64: 128, 64>}, {pipeline_mode = #tpu.pipeline_mode<synchronous>, transform_indices = @transform_20, window_bounds = array<i64: 1, 64>}, {pipeline_mode = #tpu.pipeline_mode<synchronous>, transform_indices = @transform_21, window_bounds = array<i64: 29, 64>}, {pipeline_mode = #tpu.pipeline_mode<synchronous>, transform_indices = @transform_22, window_bounds = array<i64: 64, 128>}, {pipeline_mode = #tpu.pipeline_mode<synchronous>, transform_indices = @transform_23, window_bounds = array<i64: 1, 128>}, {pipeline_mode = #tpu.pipeline_mode<synchronous>, transform_indices = @transform_24, window_bounds = array<i64: 128, 128>}, {pipeline_mode = #tpu.pipeline_mode<synchronous>, transform_indices = @transform_25, window_bounds = array<i64: 1, 128>}, {pipeline_mode = #tpu.pipeline_mode<synchronous>, transform_indices = @transform_26, window_bounds = array<i64: 128, 10>}, {pipeline_mode = #tpu.pipeline_mode<synchronous>, transform_indices = @transform_27, window_bounds = array<i64: 1, 10>}, {transform_indices = @transform_28, window_bounds = array<i64: 1, 1, 10>}]} {
    %cst = arith.constant 0.000000e+00 : f32
    %0 = vector.broadcast %cst : f32 to vector<32x128xf32>
    %c0 = arith.constant 0 : index
    %c0_0 = arith.constant 0 : index
    %1 = vector.load %arg30[%c0, %c0_0] : memref<80x128xf32, #tpu.memory_space<vmem>>, vector<32x128xf32>
    tpu.vector_store %arg30[%c0, %c0_0], %0 {strides = array<i32>} : memref<80x128xf32, #tpu.memory_space<vmem>>, vector<32x128xf32>,
    %cst_1 = arith.constant 0.000000e+00 : f32
    %2 = vector.broadcast %cst_1 : f32 to vector<32x128xf32>
    %c48 = arith.constant 48 : index
    %c0_2 = arith.constant 0 : index
    %3 = vector.load %arg30[%c48, %c0_2] : memref<80x128xf32, #tpu.memory_space<vmem>>, vector<32x128xf32>
    tpu.vector_store %arg30[%c48, %c0_2], %2 {strides = array<i32>} : memref<80x128xf32, #tpu.memory_space<vmem>>, vector<32x128xf32>,
    %c0_3 = arith.constant 0 : index
    %c0_4 = arith.constant 0 : index
    %c0_5 = arith.constant 0 : index
    %4 = vector.load %arg1[%c0_3, %c0_4, %c0_5] : memref<1x16x176xf32, #tpu.memory_space<vmem>>, vector<1x16x176xf32>
    %5 = vector.shape_cast %4 : vector<1x16x176xf32> to vector<16x176xf32>
    %6 = arith.truncf %5 : vector<16x176xf32> to vector<16x176xbf16>
    %c0_6 = arith.constant 0 : index
    %c0_7 = arith.constant 0 : index
    %7 = vector.load %arg2[%c0_6, %c0_7] : memref<176x128xbf16, #tpu.memory_space<vmem>>, vector<176x128xbf16>
    %cst_8 = arith.constant dense<0.000000e+00> : vector<16x128xf32>
    %8 = tpu.matmul %6, %7, %cst_8 {dimension_numbers = #tpu.dot_dimension_numbers<[1], [0], [0], [1], [0, 0, 1, 1], [], []>} : vector<16x176xbf16>, vector<176x128xbf16>, vector<16x128xf32> -> vector<16x128xf32>
    %c0_9 = arith.constant 0 : index
    %c0_10 = arith.constant 0 : index
    %9 = vector.load %arg3[%c0_9, %c0_10] : memref<1x128xf32, #tpu.memory_space<vmem>>, vector<1x128xf32>
    %10 = vector.broadcast %9 : vector<1x128xf32> to vector<16x128xf32>
    %11 = arith.addf %8, %10 : vector<16x128xf32>
    %cst_11 = arith.constant 0.000000e+00 : f32
    %12 = vector.broadcast %cst_11 : f32 to vector<16x128xf32>
    %13 = arith.maximumf %11, %12 : vector<16x128xf32>
    %c32 = arith.constant 32 : index
    %c0_12 = arith.constant 0 : index
    %14 = vector.load %arg30[%c32, %c0_12] : memref<80x128xf32, #tpu.memory_space<vmem>>, vector<16x128xf32>
    tpu.vector_store %arg30[%c32, %c0_12], %13 {strides = array<i32>} : memref<80x128xf32, #tpu.memory_space<vmem>>, vector<16x128xf32>,
    %cst_13 = arith.constant 0.000000e+00 : f32
    %15 = vector.broadcast %cst_13 : f32 to vector<16x128xf32>
    %cst_14 = arith.constant 0.000000e+00 : f32
    %16 = vector.broadcast %cst_14 : f32 to vector<16x128xf32>
    %cst_15 = arith.constant 0.000000e+00 : f32
    %17 = vector.broadcast %cst_15 : f32 to vector<16x128xf32>
    %cst_16 = arith.constant 0.000000e+00 : f32
    %18 = vector.broadcast %cst_16 : f32 to vector<16x128xf32>
    %c26 = arith.constant 26 : index
    %c0_17 = arith.constant 0 : index
    %19 = vector.load %arg30[%c26, %c0_17] : memref<80x128xf32, #tpu.memory_space<vmem>>, vector<16x128xf32>
    %c0_18 = arith.constant 0 : index
    %c0_19 = arith.constant 0 : index
    %20 = vector.load %arg4[%c0_18, %c0_19] : memref<13x128xf32, #tpu.memory_space<vmem>>, vector<1x128xf32>
    %21 = vector.broadcast %20 : vector<1x128xf32> to vector<16x128xf32>
    %22 = arith.mulf %19, %21 : vector<16x128xf32>
    %23 = arith.addf %15, %22 : vector<16x128xf32>
    %c27 = arith.constant 27 : index
    %c0_20 = arith.constant 0 : index
    %24 = vector.load %arg30[%c27, %c0_20] : memref<80x128xf32, #tpu.memory_space<vmem>>, vector<16x128xf32>
    %c1 = arith.constant 1 : index
    %c0_21 = arith.constant 0 : index
    %25 = vector.load %arg4[%c1, %c0_21] : memref<13x128xf32, #tpu.memory_space<vmem>>, vector<1x128xf32>
    %26 = vector.broadcast %25 : vector<1x128xf32> to vector<16x128xf32>
    %27 = arith.mulf %24, %26 : vector<16x128xf32>
    %28 = arith.addf %16, %27 : vector<16x128xf32>
    %c28 = arith.constant 28 : index
    %c0_22 = arith.constant 0 : index
    %29 = vector.load %arg30[%c28, %c0_22] : memref<80x128xf32, #tpu.memory_space<vmem>>, vector<16x128xf32>
    %c2 = arith.constant 2 : index
    %c0_23 = arith.constant 0 : index
    %30 = vector.load %arg4[%c2, %c0_23] : memref<13x128xf32, #tpu.memory_space<vmem>>, vector<1x128xf32>
    %31 = vector.broadcast %30 : vector<1x128xf32> to vector<16x128xf32>
    %32 = arith.mulf %29, %31 : vector<16x128xf32>
    %33 = arith.addf %17, %32 : vector<16x128xf32>
    %c29 = arith.constant 29 : index
    %c0_24 = arith.constant 0 : index
    %34 = vector.load %arg30[%c29, %c0_24] : memref<80x128xf32, #tpu.memory_space<vmem>>, vector<16x128xf32>
    %c3 = arith.constant 3 : index
    %c0_25 = arith.constant 0 : index
    %35 = vector.load %arg4[%c3, %c0_25] : memref<13x128xf32, #tpu.memory_space<vmem>>, vector<1x128xf32>
    %36 = vector.broadcast %35 : vector<1x128xf32> to vector<16x128xf32>
    %37 = arith.mulf %34, %36 : vector<16x128xf32>
    %38 = arith.addf %18, %37 : vector<16x128xf32>
    %c30 = arith.constant 30 : index
    %c0_26 = arith.constant 0 : index
    %39 = vector.load %arg30[%c30, %c0_26] : memref<80x128xf32, #tpu.memory_space<vmem>>, vector<16x128xf32>
    %c4 = arith.constant 4 : index
    %c0_27 = arith.constant 0 : index
    %40 = vector.load %arg4[%c4, %c0_27] : memref<13x128xf32, #tpu.memory_space<vmem>>, vector<1x128xf32>
    %41 = vector.broadcast %40 : vector<1x128xf32> to vector<16x128xf32>
    %42 = arith.mulf %39, %41 : vector<16x128xf32>
    %43 = arith.addf %23, %42 : vector<16x128xf32>
    %c31 = arith.constant 31 : index
    %c0_28 = arith.constant 0 : index
    %44 = vector.load %arg30[%c31, %c0_28] : memref<80x128xf32, #tpu.memory_space<vmem>>, vector<16x128xf32>
    %c5 = arith.constant 5 : index
    %c0_29 = arith.constant 0 : index
    %45 = vector.load %arg4[%c5, %c0_29] : memref<13x128xf32, #tpu.memory_space<vmem>>, vector<1x128xf32>
    %46 = vector.broadcast %45 : vector<1x128xf32> to vector<16x128xf32>
    %47 = arith.mulf %44, %46 : vector<16x128xf32>
    %48 = arith.addf %28, %47 : vector<16x128xf32>
    %c32_30 = arith.constant 32 : index
    %c0_31 = arith.constant 0 : index
    %49 = vector.load %arg30[%c32_30, %c0_31] : memref<80x128xf32, #tpu.memory_space<vmem>>, vector<16x128xf32>
    %c6 = arith.constant 6 : index
    %c0_32 = arith.constant 0 : index
    %50 = vector.load %arg4[%c6, %c0_32] : memref<13x128xf32, #tpu.memory_space<vmem>>, vector<1x128xf32>
    %51 = vector.broadcast %50 : vector<1x128xf32> to vector<16x128xf32>
    %52 = arith.mulf %49, %51 : vector<16x128xf32>
    %53 = arith.addf %33, %52 : vector<16x128xf32>
    %c33 = arith.constant 33 : index
    %c0_33 = arith.constant 0 : index
    %54 = vector.load %arg30[%c33, %c0_33] : memref<80x128xf32, #tpu.memory_space<vmem>>, vector<16x128xf32>
    %c7 = arith.constant 7 : index
    %c0_34 = arith.constant 0 : index
    %55 = vector.load %arg4[%c7, %c0_34] : memref<13x128xf32, #tpu.memory_space<vmem>>, vector<1x128xf32>
    %56 = vector.broadcast %55 : vector<1x128xf32> to vector<16x128xf32>
    %57 = arith.mulf %54, %56 : vector<16x128xf32>
    %58 = arith.addf %38, %57 : vector<16x128xf32>
    %c34 = arith.constant 34 : index
    %c0_35 = arith.constant 0 : index
    %59 = vector.load %arg30[%c34, %c0_35] : memref<80x128xf32, #tpu.memory_space<vmem>>, vector<16x128xf32>
    %c8 = arith.constant 8 : index
    %c0_36 = arith.constant 0 : index
    %60 = vector.load %arg4[%c8, %c0_36] : memref<13x128xf32, #tpu.memory_space<vmem>>, vector<1x128xf32>
    %61 = vector.broadcast %60 : vector<1x128xf32> to vector<16x128xf32>
    %62 = arith.mulf %59, %61 : vector<16x128xf32>
    %63 = arith.addf %43, %62 : vector<16x128xf32>
    %c35 = arith.constant 35 : index
    %c0_37 = arith.constant 0 : index
    %64 = vector.load %arg30[%c35, %c0_37] : memref<80x128xf32, #tpu.memory_space<vmem>>, vector<16x128xf32>
    %c9 = arith.constant 9 : index
    %c0_38 = arith.constant 0 : index
    %65 = vector.load %arg4[%c9, %c0_38] : memref<13x128xf32, #tpu.memory_space<vmem>>, vector<1x128xf32>
    %66 = vector.broadcast %65 : vector<1x128xf32> to vector<16x128xf32>
    %67 = arith.mulf %64, %66 : vector<16x128xf32>
    %68 = arith.addf %48, %67 : vector<16x128xf32>
    %c36 = arith.constant 36 : index
    %c0_39 = arith.constant 0 : index
    %69 = vector.load %arg30[%c36, %c0_39] : memref<80x128xf32, #tpu.memory_space<vmem>>, vector<16x128xf32>
    %c10 = arith.constant 10 : index
    %c0_40 = arith.constant 0 : index
    %70 = vector.load %arg4[%c10, %c0_40] : memref<13x128xf32, #tpu.memory_space<vmem>>, vector<1x128xf32>
    %71 = vector.broadcast %70 : vector<1x128xf32> to vector<16x128xf32>
    %72 = arith.mulf %69, %71 : vector<16x128xf32>
    %73 = arith.addf %53, %72 : vector<16x128xf32>
    %c37 = arith.constant 37 : index
    %c0_41 = arith.constant 0 : index
    %74 = vector.load %arg30[%c37, %c0_41] : memref<80x128xf32, #tpu.memory_space<vmem>>, vector<16x128xf32>
    %c11 = arith.constant 11 : index
    %c0_42 = arith.constant 0 : index
    %75 = vector.load %arg4[%c11, %c0_42] : memref<13x128xf32, #tpu.memory_space<vmem>>, vector<1x128xf32>
    %76 = vector.broadcast %75 : vector<1x128xf32> to vector<16x128xf32>
    %77 = arith.mulf %74, %76 : vector<16x128xf32>
    %78 = arith.addf %58, %77 : vector<16x128xf32>
    %c38 = arith.constant 38 : index
    %c0_43 = arith.constant 0 : index
    %79 = vector.load %arg30[%c38, %c0_43] : memref<80x128xf32, #tpu.memory_space<vmem>>, vector<16x128xf32>
    %c12 = arith.constant 12 : index
    %c0_44 = arith.constant 0 : index
    %80 = vector.load %arg4[%c12, %c0_44] : memref<13x128xf32, #tpu.memory_space<vmem>>, vector<1x128xf32>
    %81 = vector.broadcast %80 : vector<1x128xf32> to vector<16x128xf32>
    %82 = arith.mulf %79, %81 : vector<16x128xf32>
    %83 = arith.addf %63, %82 : vector<16x128xf32>
    %84 = arith.addf %83, %68 : vector<16x128xf32>
    %85 = arith.addf %73, %78 : vector<16x128xf32>
    %86 = arith.addf %84, %85 : vector<16x128xf32>
    %87 = arith.truncf %86 : vector<16x128xf32> to vector<16x128xbf16>
    %c0_45 = arith.constant 0 : index
    %c0_46 = arith.constant 0 : index
    %88 = vector.load %arg5[%c0_45, %c0_46] : memref<128x64xbf16, #tpu.memory_space<vmem>>, vector<128x64xbf16>
    %cst_47 = arith.constant dense<0.000000e+00> : vector<16x64xf32>
    %89 = tpu.matmul %87, %88, %cst_47 {dimension_numbers = #tpu.dot_dimension_numbers<[1], [0], [0], [1], [0, 0, 1, 1], [], []>} : vector<16x128xbf16>, vector<128x64xbf16>, vector<16x64xf32> -> vector<16x64xf32>
    %c0_48 = arith.constant 0 : index
    %c0_49 = arith.constant 0 : index
    %90 = vector.load %arg6[%c0_48, %c0_49] : memref<1x64xf32, #tpu.memory_space<vmem>>, vector<1x64xf32>
    %91 = vector.broadcast %90 : vector<1x64xf32> to vector<16x64xf32>
    %92 = arith.addf %89, %91 : vector<16x64xf32>
    %cst_50 = arith.constant 0.000000e+00 : f32
    %93 = vector.broadcast %cst_50 : f32 to vector<16x64xf32>
    %94 = arith.maximumf %92, %93 : vector<16x64xf32>
    %c32_51 = arith.constant 32 : index
    %c0_52 = arith.constant 0 : index
    %95 = vector.load %arg30[%c32_51, %c0_52] : memref<80x128xf32, #tpu.memory_space<vmem>>, vector<16x64xf32>
    tpu.vector_store %arg30[%c32_51, %c0_52], %94 {strides = array<i32>} : memref<80x128xf32, #tpu.memory_space<vmem>>, vector<16x64xf32>,
    %cst_53 = arith.constant 0.000000e+00 : f32
    %96 = vector.broadcast %cst_53 : f32 to vector<16x64xf32>
    %cst_54 = arith.constant 0.000000e+00 : f32
    %97 = vector.broadcast %cst_54 : f32 to vector<16x64xf32>
    %cst_55 = arith.constant 0.000000e+00 : f32
    %98 = vector.broadcast %cst_55 : f32 to vector<16x64xf32>
    %cst_56 = arith.constant 0.000000e+00 : f32
    %99 = vector.broadcast %cst_56 : f32 to vector<16x64xf32>
    %c26_57 = arith.constant 26 : index
    %c0_58 = arith.constant 0 : index
    %100 = vector.load %arg30[%c26_57, %c0_58] : memref<80x128xf32, #tpu.memory_space<vmem>>, vector<16x64xf32>
    %c0_59 = arith.constant 0 : index
    %c0_60 = arith.constant 0 : index
    %101 = vector.load %arg7[%c0_59, %c0_60] : memref<13x64xf32, #tpu.memory_space<vmem>>, vector<1x64xf32>
    %102 = vector.broadcast %101 : vector<1x64xf32> to vector<16x64xf32>
    %103 = arith.mulf %100, %102 : vector<16x64xf32>
    %104 = arith.addf %96, %103 : vector<16x64xf32>
    %c27_61 = arith.constant 27 : index
    %c0_62 = arith.constant 0 : index
    %105 = vector.load %arg30[%c27_61, %c0_62] : memref<80x128xf32, #tpu.memory_space<vmem>>, vector<16x64xf32>
    %c1_63 = arith.constant 1 : index
    %c0_64 = arith.constant 0 : index
    %106 = vector.load %arg7[%c1_63, %c0_64] : memref<13x64xf32, #tpu.memory_space<vmem>>, vector<1x64xf32>
    %107 = vector.broadcast %106 : vector<1x64xf32> to vector<16x64xf32>
    %108 = arith.mulf %105, %107 : vector<16x64xf32>
    %109 = arith.addf %97, %108 : vector<16x64xf32>
    %c28_65 = arith.constant 28 : index
    %c0_66 = arith.constant 0 : index
    %110 = vector.load %arg30[%c28_65, %c0_66] : memref<80x128xf32, #tpu.memory_space<vmem>>, vector<16x64xf32>
    %c2_67 = arith.constant 2 : index
    %c0_68 = arith.constant 0 : index
    %111 = vector.load %arg7[%c2_67, %c0_68] : memref<13x64xf32, #tpu.memory_space<vmem>>, vector<1x64xf32>
    %112 = vector.broadcast %111 : vector<1x64xf32> to vector<16x64xf32>
    %113 = arith.mulf %110, %112 : vector<16x64xf32>
    %114 = arith.addf %98, %113 : vector<16x64xf32>
    %c29_69 = arith.constant 29 : index
    %c0_70 = arith.constant 0 : index
    %115 = vector.load %arg30[%c29_69, %c0_70] : memref<80x128xf32, #tpu.memory_space<vmem>>, vector<16x64xf32>
    %c3_71 = arith.constant 3 : index
    %c0_72 = arith.constant 0 : index
    %116 = vector.load %arg7[%c3_71, %c0_72] : memref<13x64xf32, #tpu.memory_space<vmem>>, vector<1x64xf32>
    %117 = vector.broadcast %116 : vector<1x64xf32> to vector<16x64xf32>
    %118 = arith.mulf %115, %117 : vector<16x64xf32>
    %119 = arith.addf %99, %118 : vector<16x64xf32>
    %c30_73 = arith.constant 30 : index
    %c0_74 = arith.constant 0 : index
    %120 = vector.load %arg30[%c30_73, %c0_74] : memref<80x128xf32, #tpu.memory_space<vmem>>, vector<16x64xf32>
    %c4_75 = arith.constant 4 : index
    %c0_76 = arith.constant 0 : index
    %121 = vector.load %arg7[%c4_75, %c0_76] : memref<13x64xf32, #tpu.memory_space<vmem>>, vector<1x64xf32>
    %122 = vector.broadcast %121 : vector<1x64xf32> to vector<16x64xf32>
    %123 = arith.mulf %120, %122 : vector<16x64xf32>
    %124 = arith.addf %104, %123 : vector<16x64xf32>
    %c31_77 = arith.constant 31 : index
    %c0_78 = arith.constant 0 : index
    %125 = vector.load %arg30[%c31_77, %c0_78] : memref<80x128xf32, #tpu.memory_space<vmem>>, vector<16x64xf32>
    %c5_79 = arith.constant 5 : index
    %c0_80 = arith.constant 0 : index
    %126 = vector.load %arg7[%c5_79, %c0_80] : memref<13x64xf32, #tpu.memory_space<vmem>>, vector<1x64xf32>
    %127 = vector.broadcast %126 : vector<1x64xf32> to vector<16x64xf32>
    %128 = arith.mulf %125, %127 : vector<16x64xf32>
    %129 = arith.addf %109, %128 : vector<16x64xf32>
    %c32_81 = arith.constant 32 : index
    %c0_82 = arith.constant 0 : index
    %130 = vector.load %arg30[%c32_81, %c0_82] : memref<80x128xf32, #tpu.memory_space<vmem>>, vector<16x64xf32>
    %c6_83 = arith.constant 6 : index
    %c0_84 = arith.constant 0 : index
    %131 = vector.load %arg7[%c6_83, %c0_84] : memref<13x64xf32, #tpu.memory_space<vmem>>, vector<1x64xf32>
    %132 = vector.broadcast %131 : vector<1x64xf32> to vector<16x64xf32>
    %133 = arith.mulf %130, %132 : vector<16x64xf32>
    %134 = arith.addf %114, %133 : vector<16x64xf32>
    %c33_85 = arith.constant 33 : index
    %c0_86 = arith.constant 0 : index
    %135 = vector.load %arg30[%c33_85, %c0_86] : memref<80x128xf32, #tpu.memory_space<vmem>>, vector<16x64xf32>
    %c7_87 = arith.constant 7 : index
    %c0_88 = arith.constant 0 : index
    %136 = vector.load %arg7[%c7_87, %c0_88] : memref<13x64xf32, #tpu.memory_space<vmem>>, vector<1x64xf32>
    %137 = vector.broadcast %136 : vector<1x64xf32> to vector<16x64xf32>
    %138 = arith.mulf %135, %137 : vector<16x64xf32>
    %139 = arith.addf %119, %138 : vector<16x64xf32>
    %c34_89 = arith.constant 34 : index
    %c0_90 = arith.constant 0 : index
    %140 = vector.load %arg30[%c34_89, %c0_90] : memref<80x128xf32, #tpu.memory_space<vmem>>, vector<16x64xf32>
    %c8_91 = arith.constant 8 : index
    %c0_92 = arith.constant 0 : index
    %141 = vector.load %arg7[%c8_91, %c0_92] : memref<13x64xf32, #tpu.memory_space<vmem>>, vector<1x64xf32>
    %142 = vector.broadcast %141 : vector<1x64xf32> to vector<16x64xf32>
    %143 = arith.mulf %140, %142 : vector<16x64xf32>
    %144 = arith.addf %124, %143 : vector<16x64xf32>
    %c35_93 = arith.constant 35 : index
    %c0_94 = arith.constant 0 : index
    %145 = vector.load %arg30[%c35_93, %c0_94] : memref<80x128xf32, #tpu.memory_space<vmem>>, vector<16x64xf32>
    %c9_95 = arith.constant 9 : index
    %c0_96 = arith.constant 0 : index
    %146 = vector.load %arg7[%c9_95, %c0_96] : memref<13x64xf32, #tpu.memory_space<vmem>>, vector<1x64xf32>
    %147 = vector.broadcast %146 : vector<1x64xf32> to vector<16x64xf32>
    %148 = arith.mulf %145, %147 : vector<16x64xf32>
    %149 = arith.addf %129, %148 : vector<16x64xf32>
    %c36_97 = arith.constant 36 : index
    %c0_98 = arith.constant 0 : index
    %150 = vector.load %arg30[%c36_97, %c0_98] : memref<80x128xf32, #tpu.memory_space<vmem>>, vector<16x64xf32>
    %c10_99 = arith.constant 10 : index
    %c0_100 = arith.constant 0 : index
    %151 = vector.load %arg7[%c10_99, %c0_100] : memref<13x64xf32, #tpu.memory_space<vmem>>, vector<1x64xf32>
    %152 = vector.broadcast %151 : vector<1x64xf32> to vector<16x64xf32>
    %153 = arith.mulf %150, %152 : vector<16x64xf32>
    %154 = arith.addf %134, %153 : vector<16x64xf32>
    %c37_101 = arith.constant 37 : index
    %c0_102 = arith.constant 0 : index
    %155 = vector.load %arg30[%c37_101, %c0_102] : memref<80x128xf32, #tpu.memory_space<vmem>>, vector<16x64xf32>
    %c11_103 = arith.constant 11 : index
    %c0_104 = arith.constant 0 : index
    %156 = vector.load %arg7[%c11_103, %c0_104] : memref<13x64xf32, #tpu.memory_space<vmem>>, vector<1x64xf32>
    %157 = vector.broadcast %156 : vector<1x64xf32> to vector<16x64xf32>
    %158 = arith.mulf %155, %157 : vector<16x64xf32>
    %159 = arith.addf %139, %158 : vector<16x64xf32>
    %c38_105 = arith.constant 38 : index
    %c0_106 = arith.constant 0 : index
    %160 = vector.load %arg30[%c38_105, %c0_106] : memref<80x128xf32, #tpu.memory_space<vmem>>, vector<16x64xf32>
    %c12_107 = arith.constant 12 : index
    %c0_108 = arith.constant 0 : index
    %161 = vector.load %arg7[%c12_107, %c0_108] : memref<13x64xf32, #tpu.memory_space<vmem>>, vector<1x64xf32>
    %162 = vector.broadcast %161 : vector<1x64xf32> to vector<16x64xf32>
    %163 = arith.mulf %160, %162 : vector<16x64xf32>
    %164 = arith.addf %144, %163 : vector<16x64xf32>
    %165 = arith.addf %164, %149 : vector<16x64xf32>
    %166 = arith.addf %154, %159 : vector<16x64xf32>
    %167 = arith.addf %165, %166 : vector<16x64xf32>
    %168 = tpu.concatenate %167, %13 in 1 : vector<16x64xf32>, vector<16x128xf32> -> vector<16x192xf32>
    %169 = arith.truncf %168 : vector<16x192xf32> to vector<16x192xbf16>
    %c0_109 = arith.constant 0 : index
    %c0_110 = arith.constant 0 : index
    %170 = vector.load %arg8[%c0_109, %c0_110] : memref<192x64xbf16, #tpu.memory_space<vmem>>, vector<192x64xbf16>
    %cst_111 = arith.constant dense<0.000000e+00> : vector<16x64xf32>
    %171 = tpu.matmul %169, %170, %cst_111 {dimension_numbers = #tpu.dot_dimension_numbers<[1], [0], [0], [1], [0, 0, 1, 1], [], []>} : vector<16x192xbf16>, vector<192x64xbf16>, vector<16x64xf32> -> vector<16x64xf32>
    %c0_112 = arith.constant 0 : index
    %c0_113 = arith.constant 0 : index
    %172 = vector.load %arg9[%c0_112, %c0_113] : memref<1x64xf32, #tpu.memory_space<vmem>>, vector<1x64xf32>
    %173 = vector.broadcast %172 : vector<1x64xf32> to vector<16x64xf32>
    %174 = arith.addf %171, %173 : vector<16x64xf32>
    %cst_114 = arith.constant 0.000000e+00 : f32
    %175 = vector.broadcast %cst_114 : f32 to vector<16x64xf32>
    %176 = arith.maximumf %174, %175 : vector<16x64xf32>
    %c32_115 = arith.constant 32 : index
    %c0_116 = arith.constant 0 : index
    %177 = vector.load %arg30[%c32_115, %c0_116] : memref<80x128xf32, #tpu.memory_space<vmem>>, vector<16x64xf32>
    tpu.vector_store %arg30[%c32_115, %c0_116], %176 {strides = array<i32>} : memref<80x128xf32, #tpu.memory_space<vmem>>, vector<16x64xf32>,
    %cst_117 = arith.constant 0.000000e+00 : f32
    %178 = vector.broadcast %cst_117 : f32 to vector<16x64xf32>
    %cst_118 = arith.constant 0.000000e+00 : f32
    %179 = vector.broadcast %cst_118 : f32 to vector<16x64xf32>
    %cst_119 = arith.constant 0.000000e+00 : f32
    %180 = vector.broadcast %cst_119 : f32 to vector<16x64xf32>
    %cst_120 = arith.constant 0.000000e+00 : f32
    %181 = vector.broadcast %cst_120 : f32 to vector<16x64xf32>
    %c25 = arith.constant 25 : index
    %c0_121 = arith.constant 0 : index
    %182 = vector.load %arg30[%c25, %c0_121] : memref<80x128xf32, #tpu.memory_space<vmem>>, vector<16x64xf32>
    %c0_122 = arith.constant 0 : index
    %c0_123 = arith.constant 0 : index
    %183 = vector.load %arg10[%c0_122, %c0_123] : memref<15x64xf32, #tpu.memory_space<vmem>>, vector<1x64xf32>
    %184 = vector.broadcast %183 : vector<1x64xf32> to vector<16x64xf32>
    %185 = arith.mulf %182, %184 : vector<16x64xf32>
    %186 = arith.addf %178, %185 : vector<16x64xf32>
    %c26_124 = arith.constant 26 : index
    %c0_125 = arith.constant 0 : index
    %187 = vector.load %arg30[%c26_124, %c0_125] : memref<80x128xf32, #tpu.memory_space<vmem>>, vector<16x64xf32>
    %c1_126 = arith.constant 1 : index
    %c0_127 = arith.constant 0 : index
    %188 = vector.load %arg10[%c1_126, %c0_127] : memref<15x64xf32, #tpu.memory_space<vmem>>, vector<1x64xf32>
    %189 = vector.broadcast %188 : vector<1x64xf32> to vector<16x64xf32>
    %190 = arith.mulf %187, %189 : vector<16x64xf32>
    %191 = arith.addf %179, %190 : vector<16x64xf32>
    %c27_128 = arith.constant 27 : index
    %c0_129 = arith.constant 0 : index
    %192 = vector.load %arg30[%c27_128, %c0_129] : memref<80x128xf32, #tpu.memory_space<vmem>>, vector<16x64xf32>
    %c2_130 = arith.constant 2 : index
    %c0_131 = arith.constant 0 : index
    %193 = vector.load %arg10[%c2_130, %c0_131] : memref<15x64xf32, #tpu.memory_space<vmem>>, vector<1x64xf32>
    %194 = vector.broadcast %193 : vector<1x64xf32> to vector<16x64xf32>
    %195 = arith.mulf %192, %194 : vector<16x64xf32>
    %196 = arith.addf %180, %195 : vector<16x64xf32>
    %c28_132 = arith.constant 28 : index
    %c0_133 = arith.constant 0 : index
    %197 = vector.load %arg30[%c28_132, %c0_133] : memref<80x128xf32, #tpu.memory_space<vmem>>, vector<16x64xf32>
    %c3_134 = arith.constant 3 : index
    %c0_135 = arith.constant 0 : index
    %198 = vector.load %arg10[%c3_134, %c0_135] : memref<15x64xf32, #tpu.memory_space<vmem>>, vector<1x64xf32>
    %199 = vector.broadcast %198 : vector<1x64xf32> to vector<16x64xf32>
    %200 = arith.mulf %197, %199 : vector<16x64xf32>
    %201 = arith.addf %181, %200 : vector<16x64xf32>
    %c29_136 = arith.constant 29 : index
    %c0_137 = arith.constant 0 : index
    %202 = vector.load %arg30[%c29_136, %c0_137] : memref<80x128xf32, #tpu.memory_space<vmem>>, vector<16x64xf32>
    %c4_138 = arith.constant 4 : index
    %c0_139 = arith.constant 0 : index
    %203 = vector.load %arg10[%c4_138, %c0_139] : memref<15x64xf32, #tpu.memory_space<vmem>>, vector<1x64xf32>
    %204 = vector.broadcast %203 : vector<1x64xf32> to vector<16x64xf32>
    %205 = arith.mulf %202, %204 : vector<16x64xf32>
    %206 = arith.addf %186, %205 : vector<16x64xf32>
    %c30_140 = arith.constant 30 : index
    %c0_141 = arith.constant 0 : index
    %207 = vector.load %arg30[%c30_140, %c0_141] : memref<80x128xf32, #tpu.memory_space<vmem>>, vector<16x64xf32>
    %c5_142 = arith.constant 5 : index
    %c0_143 = arith.constant 0 : index
    %208 = vector.load %arg10[%c5_142, %c0_143] : memref<15x64xf32, #tpu.memory_space<vmem>>, vector<1x64xf32>
    %209 = vector.broadcast %208 : vector<1x64xf32> to vector<16x64xf32>
    %210 = arith.mulf %207, %209 : vector<16x64xf32>
    %211 = arith.addf %191, %210 : vector<16x64xf32>
    %c31_144 = arith.constant 31 : index
    %c0_145 = arith.constant 0 : index
    %212 = vector.load %arg30[%c31_144, %c0_145] : memref<80x128xf32, #tpu.memory_space<vmem>>, vector<16x64xf32>
    %c6_146 = arith.constant 6 : index
    %c0_147 = arith.constant 0 : index
    %213 = vector.load %arg10[%c6_146, %c0_147] : memref<15x64xf32, #tpu.memory_space<vmem>>, vector<1x64xf32>
    %214 = vector.broadcast %213 : vector<1x64xf32> to vector<16x64xf32>
    %215 = arith.mulf %212, %214 : vector<16x64xf32>
    %216 = arith.addf %196, %215 : vector<16x64xf32>
    %c32_148 = arith.constant 32 : index
    %c0_149 = arith.constant 0 : index
    %217 = vector.load %arg30[%c32_148, %c0_149] : memref<80x128xf32, #tpu.memory_space<vmem>>, vector<16x64xf32>
    %c7_150 = arith.constant 7 : index
    %c0_151 = arith.constant 0 : index
    %218 = vector.load %arg10[%c7_150, %c0_151] : memref<15x64xf32, #tpu.memory_space<vmem>>, vector<1x64xf32>
    %219 = vector.broadcast %218 : vector<1x64xf32> to vector<16x64xf32>
    %220 = arith.mulf %217, %219 : vector<16x64xf32>
    %221 = arith.addf %201, %220 : vector<16x64xf32>
    %c33_152 = arith.constant 33 : index
    %c0_153 = arith.constant 0 : index
    %222 = vector.load %arg30[%c33_152, %c0_153] : memref<80x128xf32, #tpu.memory_space<vmem>>, vector<16x64xf32>
    %c8_154 = arith.constant 8 : index
    %c0_155 = arith.constant 0 : index
    %223 = vector.load %arg10[%c8_154, %c0_155] : memref<15x64xf32, #tpu.memory_space<vmem>>, vector<1x64xf32>
    %224 = vector.broadcast %223 : vector<1x64xf32> to vector<16x64xf32>
    %225 = arith.mulf %222, %224 : vector<16x64xf32>
    %226 = arith.addf %206, %225 : vector<16x64xf32>
    %c34_156 = arith.constant 34 : index
    %c0_157 = arith.constant 0 : index
    %227 = vector.load %arg30[%c34_156, %c0_157] : memref<80x128xf32, #tpu.memory_space<vmem>>, vector<16x64xf32>
    %c9_158 = arith.constant 9 : index
    %c0_159 = arith.constant 0 : index
    %228 = vector.load %arg10[%c9_158, %c0_159] : memref<15x64xf32, #tpu.memory_space<vmem>>, vector<1x64xf32>
    %229 = vector.broadcast %228 : vector<1x64xf32> to vector<16x64xf32>
    %230 = arith.mulf %227, %229 : vector<16x64xf32>
    %231 = arith.addf %211, %230 : vector<16x64xf32>
    %c35_160 = arith.constant 35 : index
    %c0_161 = arith.constant 0 : index
    %232 = vector.load %arg30[%c35_160, %c0_161] : memref<80x128xf32, #tpu.memory_space<vmem>>, vector<16x64xf32>
    %c10_162 = arith.constant 10 : index
    %c0_163 = arith.constant 0 : index
    %233 = vector.load %arg10[%c10_162, %c0_163] : memref<15x64xf32, #tpu.memory_space<vmem>>, vector<1x64xf32>
    %234 = vector.broadcast %233 : vector<1x64xf32> to vector<16x64xf32>
    %235 = arith.mulf %232, %234 : vector<16x64xf32>
    %236 = arith.addf %216, %235 : vector<16x64xf32>
    %c36_164 = arith.constant 36 : index
    %c0_165 = arith.constant 0 : index
    %237 = vector.load %arg30[%c36_164, %c0_165] : memref<80x128xf32, #tpu.memory_space<vmem>>, vector<16x64xf32>
    %c11_166 = arith.constant 11 : index
    %c0_167 = arith.constant 0 : index
    %238 = vector.load %arg10[%c11_166, %c0_167] : memref<15x64xf32, #tpu.memory_space<vmem>>, vector<1x64xf32>
    %239 = vector.broadcast %238 : vector<1x64xf32> to vector<16x64xf32>
    %240 = arith.mulf %237, %239 : vector<16x64xf32>
    %241 = arith.addf %221, %240 : vector<16x64xf32>
    %c37_168 = arith.constant 37 : index
    %c0_169 = arith.constant 0 : index
    %242 = vector.load %arg30[%c37_168, %c0_169] : memref<80x128xf32, #tpu.memory_space<vmem>>, vector<16x64xf32>
    %c12_170 = arith.constant 12 : index
    %c0_171 = arith.constant 0 : index
    %243 = vector.load %arg10[%c12_170, %c0_171] : memref<15x64xf32, #tpu.memory_space<vmem>>, vector<1x64xf32>
    %244 = vector.broadcast %243 : vector<1x64xf32> to vector<16x64xf32>
    %245 = arith.mulf %242, %244 : vector<16x64xf32>
    %246 = arith.addf %226, %245 : vector<16x64xf32>
    %c38_172 = arith.constant 38 : index
    %c0_173 = arith.constant 0 : index
    %247 = vector.load %arg30[%c38_172, %c0_173] : memref<80x128xf32, #tpu.memory_space<vmem>>, vector<16x64xf32>
    %c13 = arith.constant 13 : index
    %c0_174 = arith.constant 0 : index
    %248 = vector.load %arg10[%c13, %c0_174] : memref<15x64xf32, #tpu.memory_space<vmem>>, vector<1x64xf32>
    %249 = vector.broadcast %248 : vector<1x64xf32> to vector<16x64xf32>
    %250 = arith.mulf %247, %249 : vector<16x64xf32>
    %251 = arith.addf %231, %250 : vector<16x64xf32>
    %c39 = arith.constant 39 : index
    %c0_175 = arith.constant 0 : index
    %252 = vector.load %arg30[%c39, %c0_175] : memref<80x128xf32, #tpu.memory_space<vmem>>, vector<16x64xf32>
    %c14 = arith.constant 14 : index
    %c0_176 = arith.constant 0 : index
    %253 = vector.load %arg10[%c14, %c0_176] : memref<15x64xf32, #tpu.memory_space<vmem>>, vector<1x64xf32>
    %254 = vector.broadcast %253 : vector<1x64xf32> to vector<16x64xf32>
    %255 = arith.mulf %252, %254 : vector<16x64xf32>
    %256 = arith.addf %236, %255 : vector<16x64xf32>
    %257 = arith.addf %246, %251 : vector<16x64xf32>
    %258 = arith.addf %256, %241 : vector<16x64xf32>
    %259 = arith.addf %257, %258 : vector<16x64xf32>
    %260 = arith.truncf %259 : vector<16x64xf32> to vector<16x64xbf16>
    %c0_177 = arith.constant 0 : index
    %c0_178 = arith.constant 0 : index
    %261 = vector.load %arg11[%c0_177, %c0_178] : memref<64x64xbf16, #tpu.memory_space<vmem>>, vector<64x64xbf16>
    %cst_179 = arith.constant dense<0.000000e+00> : vector<16x64xf32>
    %262 = tpu.matmul %260, %261, %cst_179 {dimension_numbers = #tpu.dot_dimension_numbers<[1], [0], [0], [1], [0, 0, 1, 1], [], []>} : vector<16x64xbf16>, vector<64x64xbf16>, vector<16x64xf32> -> vector<16x64xf32>
    %c0_180 = arith.constant 0 : index
    %c0_181 = arith.constant 0 : index
    %263 = vector.load %arg12[%c0_180, %c0_181] : memref<1x64xf32, #tpu.memory_space<vmem>>, vector<1x64xf32>
    %264 = vector.broadcast %263 : vector<1x64xf32> to vector<16x64xf32>
    %265 = arith.addf %262, %264 : vector<16x64xf32>
    %cst_182 = arith.constant 0.000000e+00 : f32
    %266 = vector.broadcast %cst_182 : f32 to vector<16x64xf32>
    %267 = arith.maximumf %265, %266 : vector<16x64xf32>
    %c32_183 = arith.constant 32 : index
    %c0_184 = arith.constant 0 : index
    %268 = vector.load %arg30[%c32_183, %c0_184] : memref<80x128xf32, #tpu.memory_space<vmem>>, vector<16x64xf32>
    tpu.vector_store %arg30[%c32_183, %c0_184], %267 {strides = array<i32>} : memref<80x128xf32, #tpu.memory_space<vmem>>, vector<16x64xf32>,
    %cst_185 = arith.constant 0.000000e+00 : f32
    %269 = vector.broadcast %cst_185 : f32 to vector<16x64xf32>
    %cst_186 = arith.constant 0.000000e+00 : f32
    %270 = vector.broadcast %cst_186 : f32 to vector<16x64xf32>
    %cst_187 = arith.constant 0.000000e+00 : f32
    %271 = vector.broadcast %cst_187 : f32 to vector<16x64xf32>
    %cst_188 = arith.constant 0.000000e+00 : f32
    %272 = vector.broadcast %cst_188 : f32 to vector<16x64xf32>
    %c25_189 = arith.constant 25 : index
    %c0_190 = arith.constant 0 : index
    %273 = vector.load %arg30[%c25_189, %c0_190] : memref<80x128xf32, #tpu.memory_space<vmem>>, vector<16x64xf32>
    %c0_191 = arith.constant 0 : index
    %c0_192 = arith.constant 0 : index
    %274 = vector.load %arg13[%c0_191, %c0_192] : memref<15x64xf32, #tpu.memory_space<vmem>>, vector<1x64xf32>
    %275 = vector.broadcast %274 : vector<1x64xf32> to vector<16x64xf32>
    %276 = arith.mulf %273, %275 : vector<16x64xf32>
    %277 = arith.addf %269, %276 : vector<16x64xf32>
    %c26_193 = arith.constant 26 : index
    %c0_194 = arith.constant 0 : index
    %278 = vector.load %arg30[%c26_193, %c0_194] : memref<80x128xf32, #tpu.memory_space<vmem>>, vector<16x64xf32>
    %c1_195 = arith.constant 1 : index
    %c0_196 = arith.constant 0 : index
    %279 = vector.load %arg13[%c1_195, %c0_196] : memref<15x64xf32, #tpu.memory_space<vmem>>, vector<1x64xf32>
    %280 = vector.broadcast %279 : vector<1x64xf32> to vector<16x64xf32>
    %281 = arith.mulf %278, %280 : vector<16x64xf32>
    %282 = arith.addf %270, %281 : vector<16x64xf32>
    %c27_197 = arith.constant 27 : index
    %c0_198 = arith.constant 0 : index
    %283 = vector.load %arg30[%c27_197, %c0_198] : memref<80x128xf32, #tpu.memory_space<vmem>>, vector<16x64xf32>
    %c2_199 = arith.constant 2 : index
    %c0_200 = arith.constant 0 : index
    %284 = vector.load %arg13[%c2_199, %c0_200] : memref<15x64xf32, #tpu.memory_space<vmem>>, vector<1x64xf32>
    %285 = vector.broadcast %284 : vector<1x64xf32> to vector<16x64xf32>
    %286 = arith.mulf %283, %285 : vector<16x64xf32>
    %287 = arith.addf %271, %286 : vector<16x64xf32>
    %c28_201 = arith.constant 28 : index
    %c0_202 = arith.constant 0 : index
    %288 = vector.load %arg30[%c28_201, %c0_202] : memref<80x128xf32, #tpu.memory_space<vmem>>, vector<16x64xf32>
    %c3_203 = arith.constant 3 : index
    %c0_204 = arith.constant 0 : index
    %289 = vector.load %arg13[%c3_203, %c0_204] : memref<15x64xf32, #tpu.memory_space<vmem>>, vector<1x64xf32>
    %290 = vector.broadcast %289 : vector<1x64xf32> to vector<16x64xf32>
    %291 = arith.mulf %288, %290 : vector<16x64xf32>
    %292 = arith.addf %272, %291 : vector<16x64xf32>
    %c29_205 = arith.constant 29 : index
    %c0_206 = arith.constant 0 : index
    %293 = vector.load %arg30[%c29_205, %c0_206] : memref<80x128xf32, #tpu.memory_space<vmem>>, vector<16x64xf32>
    %c4_207 = arith.constant 4 : index
    %c0_208 = arith.constant 0 : index
    %294 = vector.load %arg13[%c4_207, %c0_208] : memref<15x64xf32, #tpu.memory_space<vmem>>, vector<1x64xf32>
    %295 = vector.broadcast %294 : vector<1x64xf32> to vector<16x64xf32>
    %296 = arith.mulf %293, %295 : vector<16x64xf32>
    %297 = arith.addf %277, %296 : vector<16x64xf32>
    %c30_209 = arith.constant 30 : index
    %c0_210 = arith.constant 0 : index
    %298 = vector.load %arg30[%c30_209, %c0_210] : memref<80x128xf32, #tpu.memory_space<vmem>>, vector<16x64xf32>
    %c5_211 = arith.constant 5 : index
    %c0_212 = arith.constant 0 : index
    %299 = vector.load %arg13[%c5_211, %c0_212] : memref<15x64xf32, #tpu.memory_space<vmem>>, vector<1x64xf32>
    %300 = vector.broadcast %299 : vector<1x64xf32> to vector<16x64xf32>
    %301 = arith.mulf %298, %300 : vector<16x64xf32>
    %302 = arith.addf %282, %301 : vector<16x64xf32>
    %c31_213 = arith.constant 31 : index
    %c0_214 = arith.constant 0 : index
    %303 = vector.load %arg30[%c31_213, %c0_214] : memref<80x128xf32, #tpu.memory_space<vmem>>, vector<16x64xf32>
    %c6_215 = arith.constant 6 : index
    %c0_216 = arith.constant 0 : index
    %304 = vector.load %arg13[%c6_215, %c0_216] : memref<15x64xf32, #tpu.memory_space<vmem>>, vector<1x64xf32>
    %305 = vector.broadcast %304 : vector<1x64xf32> to vector<16x64xf32>
    %306 = arith.mulf %303, %305 : vector<16x64xf32>
    %307 = arith.addf %287, %306 : vector<16x64xf32>
    %c32_217 = arith.constant 32 : index
    %c0_218 = arith.constant 0 : index
    %308 = vector.load %arg30[%c32_217, %c0_218] : memref<80x128xf32, #tpu.memory_space<vmem>>, vector<16x64xf32>
    %c7_219 = arith.constant 7 : index
    %c0_220 = arith.constant 0 : index
    %309 = vector.load %arg13[%c7_219, %c0_220] : memref<15x64xf32, #tpu.memory_space<vmem>>, vector<1x64xf32>
    %310 = vector.broadcast %309 : vector<1x64xf32> to vector<16x64xf32>
    %311 = arith.mulf %308, %310 : vector<16x64xf32>
    %312 = arith.addf %292, %311 : vector<16x64xf32>
    %c33_221 = arith.constant 33 : index
    %c0_222 = arith.constant 0 : index
    %313 = vector.load %arg30[%c33_221, %c0_222] : memref<80x128xf32, #tpu.memory_space<vmem>>, vector<16x64xf32>
    %c8_223 = arith.constant 8 : index
    %c0_224 = arith.constant 0 : index
    %314 = vector.load %arg13[%c8_223, %c0_224] : memref<15x64xf32, #tpu.memory_space<vmem>>, vector<1x64xf32>
    %315 = vector.broadcast %314 : vector<1x64xf32> to vector<16x64xf32>
    %316 = arith.mulf %313, %315 : vector<16x64xf32>
    %317 = arith.addf %297, %316 : vector<16x64xf32>
    %c34_225 = arith.constant 34 : index
    %c0_226 = arith.constant 0 : index
    %318 = vector.load %arg30[%c34_225, %c0_226] : memref<80x128xf32, #tpu.memory_space<vmem>>, vector<16x64xf32>
    %c9_227 = arith.constant 9 : index
    %c0_228 = arith.constant 0 : index
    %319 = vector.load %arg13[%c9_227, %c0_228] : memref<15x64xf32, #tpu.memory_space<vmem>>, vector<1x64xf32>
    %320 = vector.broadcast %319 : vector<1x64xf32> to vector<16x64xf32>
    %321 = arith.mulf %318, %320 : vector<16x64xf32>
    %322 = arith.addf %302, %321 : vector<16x64xf32>
    %c35_229 = arith.constant 35 : index
    %c0_230 = arith.constant 0 : index
    %323 = vector.load %arg30[%c35_229, %c0_230] : memref<80x128xf32, #tpu.memory_space<vmem>>, vector<16x64xf32>
    %c10_231 = arith.constant 10 : index
    %c0_232 = arith.constant 0 : index
    %324 = vector.load %arg13[%c10_231, %c0_232] : memref<15x64xf32, #tpu.memory_space<vmem>>, vector<1x64xf32>
    %325 = vector.broadcast %324 : vector<1x64xf32> to vector<16x64xf32>
    %326 = arith.mulf %323, %325 : vector<16x64xf32>
    %327 = arith.addf %307, %326 : vector<16x64xf32>
    %c36_233 = arith.constant 36 : index
    %c0_234 = arith.constant 0 : index
    %328 = vector.load %arg30[%c36_233, %c0_234] : memref<80x128xf32, #tpu.memory_space<vmem>>, vector<16x64xf32>
    %c11_235 = arith.constant 11 : index
    %c0_236 = arith.constant 0 : index
    %329 = vector.load %arg13[%c11_235, %c0_236] : memref<15x64xf32, #tpu.memory_space<vmem>>, vector<1x64xf32>
    %330 = vector.broadcast %329 : vector<1x64xf32> to vector<16x64xf32>
    %331 = arith.mulf %328, %330 : vector<16x64xf32>
    %332 = arith.addf %312, %331 : vector<16x64xf32>
    %c37_237 = arith.constant 37 : index
    %c0_238 = arith.constant 0 : index
    %333 = vector.load %arg30[%c37_237, %c0_238] : memref<80x128xf32, #tpu.memory_space<vmem>>, vector<16x64xf32>
    %c12_239 = arith.constant 12 : index
    %c0_240 = arith.constant 0 : index
    %334 = vector.load %arg13[%c12_239, %c0_240] : memref<15x64xf32, #tpu.memory_space<vmem>>, vector<1x64xf32>
    %335 = vector.broadcast %334 : vector<1x64xf32> to vector<16x64xf32>
    %336 = arith.mulf %333, %335 : vector<16x64xf32>
    %337 = arith.addf %317, %336 : vector<16x64xf32>
    %c38_241 = arith.constant 38 : index
    %c0_242 = arith.constant 0 : index
    %338 = vector.load %arg30[%c38_241, %c0_242] : memref<80x128xf32, #tpu.memory_space<vmem>>, vector<16x64xf32>
    %c13_243 = arith.constant 13 : index
    %c0_244 = arith.constant 0 : index
    %339 = vector.load %arg13[%c13_243, %c0_244] : memref<15x64xf32, #tpu.memory_space<vmem>>, vector<1x64xf32>
    %340 = vector.broadcast %339 : vector<1x64xf32> to vector<16x64xf32>
    %341 = arith.mulf %338, %340 : vector<16x64xf32>
    %342 = arith.addf %322, %341 : vector<16x64xf32>
    %c39_245 = arith.constant 39 : index
    %c0_246 = arith.constant 0 : index
    %343 = vector.load %arg30[%c39_245, %c0_246] : memref<80x128xf32, #tpu.memory_space<vmem>>, vector<16x64xf32>
    %c14_247 = arith.constant 14 : index
    %c0_248 = arith.constant 0 : index
    %344 = vector.load %arg13[%c14_247, %c0_248] : memref<15x64xf32, #tpu.memory_space<vmem>>, vector<1x64xf32>
    %345 = vector.broadcast %344 : vector<1x64xf32> to vector<16x64xf32>
    %346 = arith.mulf %343, %345 : vector<16x64xf32>
    %347 = arith.addf %327, %346 : vector<16x64xf32>
    %348 = arith.addf %337, %342 : vector<16x64xf32>
    %349 = arith.addf %347, %332 : vector<16x64xf32>
    %350 = arith.addf %348, %349 : vector<16x64xf32>
    %351 = tpu.concatenate %350, %176 in 1 : vector<16x64xf32>, vector<16x64xf32> -> vector<16x128xf32>
    %352 = arith.truncf %351 : vector<16x128xf32> to vector<16x128xbf16>
    %c0_249 = arith.constant 0 : index
    %c0_250 = arith.constant 0 : index
    %353 = vector.load %arg14[%c0_249, %c0_250] : memref<128x64xbf16, #tpu.memory_space<vmem>>, vector<128x64xbf16>
    %cst_251 = arith.constant dense<0.000000e+00> : vector<16x64xf32>
    %354 = tpu.matmul %352, %353, %cst_251 {dimension_numbers = #tpu.dot_dimension_numbers<[1], [0], [0], [1], [0, 0, 1, 1], [], []>} : vector<16x128xbf16>, vector<128x64xbf16>, vector<16x64xf32> -> vector<16x64xf32>
    %c0_252 = arith.constant 0 : index
    %c0_253 = arith.constant 0 : index
    %355 = vector.load %arg15[%c0_252, %c0_253] : memref<1x64xf32, #tpu.memory_space<vmem>>, vector<1x64xf32>
    %356 = vector.broadcast %355 : vector<1x64xf32> to vector<16x64xf32>
    %357 = arith.addf %354, %356 : vector<16x64xf32>
    %cst_254 = arith.constant 0.000000e+00 : f32
    %358 = vector.broadcast %cst_254 : f32 to vector<16x64xf32>
    %359 = arith.maximumf %357, %358 : vector<16x64xf32>
    %c32_255 = arith.constant 32 : index
    %c0_256 = arith.constant 0 : index
    %360 = vector.load %arg30[%c32_255, %c0_256] : memref<80x128xf32, #tpu.memory_space<vmem>>, vector<16x64xf32>
    tpu.vector_store %arg30[%c32_255, %c0_256], %359 {strides = array<i32>} : memref<80x128xf32, #tpu.memory_space<vmem>>, vector<16x64xf32>,
    %cst_257 = arith.constant 0.000000e+00 : f32
    %361 = vector.broadcast %cst_257 : f32 to vector<16x64xf32>
    %cst_258 = arith.constant 0.000000e+00 : f32
    %362 = vector.broadcast %cst_258 : f32 to vector<16x64xf32>
    %cst_259 = arith.constant 0.000000e+00 : f32
    %363 = vector.broadcast %cst_259 : f32 to vector<16x64xf32>
    %cst_260 = arith.constant 0.000000e+00 : f32
    %364 = vector.broadcast %cst_260 : f32 to vector<16x64xf32>
    %c24 = arith.constant 24 : index
    %c0_261 = arith.constant 0 : index
    %365 = vector.load %arg30[%c24, %c0_261] : memref<80x128xf32, #tpu.memory_space<vmem>>, vector<16x64xf32>
    %c0_262 = arith.constant 0 : index
    %c0_263 = arith.constant 0 : index
    %366 = vector.load %arg16[%c0_262, %c0_263] : memref<17x64xf32, #tpu.memory_space<vmem>>, vector<1x64xf32>
    %367 = vector.broadcast %366 : vector<1x64xf32> to vector<16x64xf32>
    %368 = arith.mulf %365, %367 : vector<16x64xf32>
    %369 = arith.addf %361, %368 : vector<16x64xf32>
    %c25_264 = arith.constant 25 : index
    %c0_265 = arith.constant 0 : index
    %370 = vector.load %arg30[%c25_264, %c0_265] : memref<80x128xf32, #tpu.memory_space<vmem>>, vector<16x64xf32>
    %c1_266 = arith.constant 1 : index
    %c0_267 = arith.constant 0 : index
    %371 = vector.load %arg16[%c1_266, %c0_267] : memref<17x64xf32, #tpu.memory_space<vmem>>, vector<1x64xf32>
    %372 = vector.broadcast %371 : vector<1x64xf32> to vector<16x64xf32>
    %373 = arith.mulf %370, %372 : vector<16x64xf32>
    %374 = arith.addf %362, %373 : vector<16x64xf32>
    %c26_268 = arith.constant 26 : index
    %c0_269 = arith.constant 0 : index
    %375 = vector.load %arg30[%c26_268, %c0_269] : memref<80x128xf32, #tpu.memory_space<vmem>>, vector<16x64xf32>
    %c2_270 = arith.constant 2 : index
    %c0_271 = arith.constant 0 : index
    %376 = vector.load %arg16[%c2_270, %c0_271] : memref<17x64xf32, #tpu.memory_space<vmem>>, vector<1x64xf32>
    %377 = vector.broadcast %376 : vector<1x64xf32> to vector<16x64xf32>
    %378 = arith.mulf %375, %377 : vector<16x64xf32>
    %379 = arith.addf %363, %378 : vector<16x64xf32>
    %c27_272 = arith.constant 27 : index
    %c0_273 = arith.constant 0 : index
    %380 = vector.load %arg30[%c27_272, %c0_273] : memref<80x128xf32, #tpu.memory_space<vmem>>, vector<16x64xf32>
    %c3_274 = arith.constant 3 : index
    %c0_275 = arith.constant 0 : index
    %381 = vector.load %arg16[%c3_274, %c0_275] : memref<17x64xf32, #tpu.memory_space<vmem>>, vector<1x64xf32>
    %382 = vector.broadcast %381 : vector<1x64xf32> to vector<16x64xf32>
    %383 = arith.mulf %380, %382 : vector<16x64xf32>
    %384 = arith.addf %364, %383 : vector<16x64xf32>
    %c28_276 = arith.constant 28 : index
    %c0_277 = arith.constant 0 : index
    %385 = vector.load %arg30[%c28_276, %c0_277] : memref<80x128xf32, #tpu.memory_space<vmem>>, vector<16x64xf32>
    %c4_278 = arith.constant 4 : index
    %c0_279 = arith.constant 0 : index
    %386 = vector.load %arg16[%c4_278, %c0_279] : memref<17x64xf32, #tpu.memory_space<vmem>>, vector<1x64xf32>
    %387 = vector.broadcast %386 : vector<1x64xf32> to vector<16x64xf32>
    %388 = arith.mulf %385, %387 : vector<16x64xf32>
    %389 = arith.addf %369, %388 : vector<16x64xf32>
    %c29_280 = arith.constant 29 : index
    %c0_281 = arith.constant 0 : index
    %390 = vector.load %arg30[%c29_280, %c0_281] : memref<80x128xf32, #tpu.memory_space<vmem>>, vector<16x64xf32>
    %c5_282 = arith.constant 5 : index
    %c0_283 = arith.constant 0 : index
    %391 = vector.load %arg16[%c5_282, %c0_283] : memref<17x64xf32, #tpu.memory_space<vmem>>, vector<1x64xf32>
    %392 = vector.broadcast %391 : vector<1x64xf32> to vector<16x64xf32>
    %393 = arith.mulf %390, %392 : vector<16x64xf32>
    %394 = arith.addf %374, %393 : vector<16x64xf32>
    %c30_284 = arith.constant 30 : index
    %c0_285 = arith.constant 0 : index
    %395 = vector.load %arg30[%c30_284, %c0_285] : memref<80x128xf32, #tpu.memory_space<vmem>>, vector<16x64xf32>
    %c6_286 = arith.constant 6 : index
    %c0_287 = arith.constant 0 : index
    %396 = vector.load %arg16[%c6_286, %c0_287] : memref<17x64xf32, #tpu.memory_space<vmem>>, vector<1x64xf32>
    %397 = vector.broadcast %396 : vector<1x64xf32> to vector<16x64xf32>
    %398 = arith.mulf %395, %397 : vector<16x64xf32>
    %399 = arith.addf %379, %398 : vector<16x64xf32>
    %c31_288 = arith.constant 31 : index
    %c0_289 = arith.constant 0 : index
    %400 = vector.load %arg30[%c31_288, %c0_289] : memref<80x128xf32, #tpu.memory_space<vmem>>, vector<16x64xf32>
    %c7_290 = arith.constant 7 : index
    %c0_291 = arith.constant 0 : index
    %401 = vector.load %arg16[%c7_290, %c0_291] : memref<17x64xf32, #tpu.memory_space<vmem>>, vector<1x64xf32>
    %402 = vector.broadcast %401 : vector<1x64xf32> to vector<16x64xf32>
    %403 = arith.mulf %400, %402 : vector<16x64xf32>
    %404 = arith.addf %384, %403 : vector<16x64xf32>
    %c32_292 = arith.constant 32 : index
    %c0_293 = arith.constant 0 : index
    %405 = vector.load %arg30[%c32_292, %c0_293] : memref<80x128xf32, #tpu.memory_space<vmem>>, vector<16x64xf32>
    %c8_294 = arith.constant 8 : index
    %c0_295 = arith.constant 0 : index
    %406 = vector.load %arg16[%c8_294, %c0_295] : memref<17x64xf32, #tpu.memory_space<vmem>>, vector<1x64xf32>
    %407 = vector.broadcast %406 : vector<1x64xf32> to vector<16x64xf32>
    %408 = arith.mulf %405, %407 : vector<16x64xf32>
    %409 = arith.addf %389, %408 : vector<16x64xf32>
    %c33_296 = arith.constant 33 : index
    %c0_297 = arith.constant 0 : index
    %410 = vector.load %arg30[%c33_296, %c0_297] : memref<80x128xf32, #tpu.memory_space<vmem>>, vector<16x64xf32>
    %c9_298 = arith.constant 9 : index
    %c0_299 = arith.constant 0 : index
    %411 = vector.load %arg16[%c9_298, %c0_299] : memref<17x64xf32, #tpu.memory_space<vmem>>, vector<1x64xf32>
    %412 = vector.broadcast %411 : vector<1x64xf32> to vector<16x64xf32>
    %413 = arith.mulf %410, %412 : vector<16x64xf32>
    %414 = arith.addf %394, %413 : vector<16x64xf32>
    %c34_300 = arith.constant 34 : index
    %c0_301 = arith.constant 0 : index
    %415 = vector.load %arg30[%c34_300, %c0_301] : memref<80x128xf32, #tpu.memory_space<vmem>>, vector<16x64xf32>
    %c10_302 = arith.constant 10 : index
    %c0_303 = arith.constant 0 : index
    %416 = vector.load %arg16[%c10_302, %c0_303] : memref<17x64xf32, #tpu.memory_space<vmem>>, vector<1x64xf32>
    %417 = vector.broadcast %416 : vector<1x64xf32> to vector<16x64xf32>
    %418 = arith.mulf %415, %417 : vector<16x64xf32>
    %419 = arith.addf %399, %418 : vector<16x64xf32>
    %c35_304 = arith.constant 35 : index
    %c0_305 = arith.constant 0 : index
    %420 = vector.load %arg30[%c35_304, %c0_305] : memref<80x128xf32, #tpu.memory_space<vmem>>, vector<16x64xf32>
    %c11_306 = arith.constant 11 : index
    %c0_307 = arith.constant 0 : index
    %421 = vector.load %arg16[%c11_306, %c0_307] : memref<17x64xf32, #tpu.memory_space<vmem>>, vector<1x64xf32>
    %422 = vector.broadcast %421 : vector<1x64xf32> to vector<16x64xf32>
    %423 = arith.mulf %420, %422 : vector<16x64xf32>
    %424 = arith.addf %404, %423 : vector<16x64xf32>
    %c36_308 = arith.constant 36 : index
    %c0_309 = arith.constant 0 : index
    %425 = vector.load %arg30[%c36_308, %c0_309] : memref<80x128xf32, #tpu.memory_space<vmem>>, vector<16x64xf32>
    %c12_310 = arith.constant 12 : index
    %c0_311 = arith.constant 0 : index
    %426 = vector.load %arg16[%c12_310, %c0_311] : memref<17x64xf32, #tpu.memory_space<vmem>>, vector<1x64xf32>
    %427 = vector.broadcast %426 : vector<1x64xf32> to vector<16x64xf32>
    %428 = arith.mulf %425, %427 : vector<16x64xf32>
    %429 = arith.addf %409, %428 : vector<16x64xf32>
    %c37_312 = arith.constant 37 : index
    %c0_313 = arith.constant 0 : index
    %430 = vector.load %arg30[%c37_312, %c0_313] : memref<80x128xf32, #tpu.memory_space<vmem>>, vector<16x64xf32>
    %c13_314 = arith.constant 13 : index
    %c0_315 = arith.constant 0 : index
    %431 = vector.load %arg16[%c13_314, %c0_315] : memref<17x64xf32, #tpu.memory_space<vmem>>, vector<1x64xf32>
    %432 = vector.broadcast %431 : vector<1x64xf32> to vector<16x64xf32>
    %433 = arith.mulf %430, %432 : vector<16x64xf32>
    %434 = arith.addf %414, %433 : vector<16x64xf32>
    %c38_316 = arith.constant 38 : index
    %c0_317 = arith.constant 0 : index
    %435 = vector.load %arg30[%c38_316, %c0_317] : memref<80x128xf32, #tpu.memory_space<vmem>>, vector<16x64xf32>
    %c14_318 = arith.constant 14 : index
    %c0_319 = arith.constant 0 : index
    %436 = vector.load %arg16[%c14_318, %c0_319] : memref<17x64xf32, #tpu.memory_space<vmem>>, vector<1x64xf32>
    %437 = vector.broadcast %436 : vector<1x64xf32> to vector<16x64xf32>
    %438 = arith.mulf %435, %437 : vector<16x64xf32>
    %439 = arith.addf %419, %438 : vector<16x64xf32>
    %c39_320 = arith.constant 39 : index
    %c0_321 = arith.constant 0 : index
    %440 = vector.load %arg30[%c39_320, %c0_321] : memref<80x128xf32, #tpu.memory_space<vmem>>, vector<16x64xf32>
    %c15 = arith.constant 15 : index
    %c0_322 = arith.constant 0 : index
    %441 = vector.load %arg16[%c15, %c0_322] : memref<17x64xf32, #tpu.memory_space<vmem>>, vector<1x64xf32>
    %442 = vector.broadcast %441 : vector<1x64xf32> to vector<16x64xf32>
    %443 = arith.mulf %440, %442 : vector<16x64xf32>
    %444 = arith.addf %424, %443 : vector<16x64xf32>
    %c40 = arith.constant 40 : index
    %c0_323 = arith.constant 0 : index
    %445 = vector.load %arg30[%c40, %c0_323] : memref<80x128xf32, #tpu.memory_space<vmem>>, vector<16x64xf32>
    %c16 = arith.constant 16 : index
    %c0_324 = arith.constant 0 : index
    %446 = vector.load %arg16[%c16, %c0_324] : memref<17x64xf32, #tpu.memory_space<vmem>>, vector<1x64xf32>
    %447 = vector.broadcast %446 : vector<1x64xf32> to vector<16x64xf32>
    %448 = arith.mulf %445, %447 : vector<16x64xf32>
    %449 = arith.addf %429, %448 : vector<16x64xf32>
    %450 = arith.addf %449, %434 : vector<16x64xf32>
    %451 = arith.addf %439, %444 : vector<16x64xf32>
    %452 = arith.addf %450, %451 : vector<16x64xf32>
    %453 = arith.truncf %452 : vector<16x64xf32> to vector<16x64xbf16>
    %c0_325 = arith.constant 0 : index
    %c0_326 = arith.constant 0 : index
    %454 = vector.load %arg17[%c0_325, %c0_326] : memref<64x64xbf16, #tpu.memory_space<vmem>>, vector<64x64xbf16>
    %cst_327 = arith.constant dense<0.000000e+00> : vector<16x64xf32>
    %455 = tpu.matmul %453, %454, %cst_327 {dimension_numbers = #tpu.dot_dimension_numbers<[1], [0], [0], [1], [0, 0, 1, 1], [], []>} : vector<16x64xbf16>, vector<64x64xbf16>, vector<16x64xf32> -> vector<16x64xf32>
    %c0_328 = arith.constant 0 : index
    %c0_329 = arith.constant 0 : index
    %456 = vector.load %arg18[%c0_328, %c0_329] : memref<1x64xf32, #tpu.memory_space<vmem>>, vector<1x64xf32>
    %457 = vector.broadcast %456 : vector<1x64xf32> to vector<16x64xf32>
    %458 = arith.addf %455, %457 : vector<16x64xf32>
    %cst_330 = arith.constant 0.000000e+00 : f32
    %459 = vector.broadcast %cst_330 : f32 to vector<16x64xf32>
    %460 = arith.maximumf %458, %459 : vector<16x64xf32>
    %c32_331 = arith.constant 32 : index
    %c0_332 = arith.constant 0 : index
    %461 = vector.load %arg30[%c32_331, %c0_332] : memref<80x128xf32, #tpu.memory_space<vmem>>, vector<16x64xf32>
    tpu.vector_store %arg30[%c32_331, %c0_332], %460 {strides = array<i32>} : memref<80x128xf32, #tpu.memory_space<vmem>>, vector<16x64xf32>,
    %cst_333 = arith.constant 0.000000e+00 : f32
    %462 = vector.broadcast %cst_333 : f32 to vector<16x64xf32>
    %cst_334 = arith.constant 0.000000e+00 : f32
    %463 = vector.broadcast %cst_334 : f32 to vector<16x64xf32>
    %cst_335 = arith.constant 0.000000e+00 : f32
    %464 = vector.broadcast %cst_335 : f32 to vector<16x64xf32>
    %cst_336 = arith.constant 0.000000e+00 : f32
    %465 = vector.broadcast %cst_336 : f32 to vector<16x64xf32>
    %c24_337 = arith.constant 24 : index
    %c0_338 = arith.constant 0 : index
    %466 = vector.load %arg30[%c24_337, %c0_338] : memref<80x128xf32, #tpu.memory_space<vmem>>, vector<16x64xf32>
    %c0_339 = arith.constant 0 : index
    %c0_340 = arith.constant 0 : index
    %467 = vector.load %arg19[%c0_339, %c0_340] : memref<17x64xf32, #tpu.memory_space<vmem>>, vector<1x64xf32>
    %468 = vector.broadcast %467 : vector<1x64xf32> to vector<16x64xf32>
    %469 = arith.mulf %466, %468 : vector<16x64xf32>
    %470 = arith.addf %462, %469 : vector<16x64xf32>
    %c25_341 = arith.constant 25 : index
    %c0_342 = arith.constant 0 : index
    %471 = vector.load %arg30[%c25_341, %c0_342] : memref<80x128xf32, #tpu.memory_space<vmem>>, vector<16x64xf32>
    %c1_343 = arith.constant 1 : index
    %c0_344 = arith.constant 0 : index
    %472 = vector.load %arg19[%c1_343, %c0_344] : memref<17x64xf32, #tpu.memory_space<vmem>>, vector<1x64xf32>
    %473 = vector.broadcast %472 : vector<1x64xf32> to vector<16x64xf32>
    %474 = arith.mulf %471, %473 : vector<16x64xf32>
    %475 = arith.addf %463, %474 : vector<16x64xf32>
    %c26_345 = arith.constant 26 : index
    %c0_346 = arith.constant 0 : index
    %476 = vector.load %arg30[%c26_345, %c0_346] : memref<80x128xf32, #tpu.memory_space<vmem>>, vector<16x64xf32>
    %c2_347 = arith.constant 2 : index
    %c0_348 = arith.constant 0 : index
    %477 = vector.load %arg19[%c2_347, %c0_348] : memref<17x64xf32, #tpu.memory_space<vmem>>, vector<1x64xf32>
    %478 = vector.broadcast %477 : vector<1x64xf32> to vector<16x64xf32>
    %479 = arith.mulf %476, %478 : vector<16x64xf32>
    %480 = arith.addf %464, %479 : vector<16x64xf32>
    %c27_349 = arith.constant 27 : index
    %c0_350 = arith.constant 0 : index
    %481 = vector.load %arg30[%c27_349, %c0_350] : memref<80x128xf32, #tpu.memory_space<vmem>>, vector<16x64xf32>
    %c3_351 = arith.constant 3 : index
    %c0_352 = arith.constant 0 : index
    %482 = vector.load %arg19[%c3_351, %c0_352] : memref<17x64xf32, #tpu.memory_space<vmem>>, vector<1x64xf32>
    %483 = vector.broadcast %482 : vector<1x64xf32> to vector<16x64xf32>
    %484 = arith.mulf %481, %483 : vector<16x64xf32>
    %485 = arith.addf %465, %484 : vector<16x64xf32>
    %c28_353 = arith.constant 28 : index
    %c0_354 = arith.constant 0 : index
    %486 = vector.load %arg30[%c28_353, %c0_354] : memref<80x128xf32, #tpu.memory_space<vmem>>, vector<16x64xf32>
    %c4_355 = arith.constant 4 : index
    %c0_356 = arith.constant 0 : index
    %487 = vector.load %arg19[%c4_355, %c0_356] : memref<17x64xf32, #tpu.memory_space<vmem>>, vector<1x64xf32>
    %488 = vector.broadcast %487 : vector<1x64xf32> to vector<16x64xf32>
    %489 = arith.mulf %486, %488 : vector<16x64xf32>
    %490 = arith.addf %470, %489 : vector<16x64xf32>
    %c29_357 = arith.constant 29 : index
    %c0_358 = arith.constant 0 : index
    %491 = vector.load %arg30[%c29_357, %c0_358] : memref<80x128xf32, #tpu.memory_space<vmem>>, vector<16x64xf32>
    %c5_359 = arith.constant 5 : index
    %c0_360 = arith.constant 0 : index
    %492 = vector.load %arg19[%c5_359, %c0_360] : memref<17x64xf32, #tpu.memory_space<vmem>>, vector<1x64xf32>
    %493 = vector.broadcast %492 : vector<1x64xf32> to vector<16x64xf32>
    %494 = arith.mulf %491, %493 : vector<16x64xf32>
    %495 = arith.addf %475, %494 : vector<16x64xf32>
    %c30_361 = arith.constant 30 : index
    %c0_362 = arith.constant 0 : index
    %496 = vector.load %arg30[%c30_361, %c0_362] : memref<80x128xf32, #tpu.memory_space<vmem>>, vector<16x64xf32>
    %c6_363 = arith.constant 6 : index
    %c0_364 = arith.constant 0 : index
    %497 = vector.load %arg19[%c6_363, %c0_364] : memref<17x64xf32, #tpu.memory_space<vmem>>, vector<1x64xf32>
    %498 = vector.broadcast %497 : vector<1x64xf32> to vector<16x64xf32>
    %499 = arith.mulf %496, %498 : vector<16x64xf32>
    %500 = arith.addf %480, %499 : vector<16x64xf32>
    %c31_365 = arith.constant 31 : index
    %c0_366 = arith.constant 0 : index
    %501 = vector.load %arg30[%c31_365, %c0_366] : memref<80x128xf32, #tpu.memory_space<vmem>>, vector<16x64xf32>
    %c7_367 = arith.constant 7 : index
    %c0_368 = arith.constant 0 : index
    %502 = vector.load %arg19[%c7_367, %c0_368] : memref<17x64xf32, #tpu.memory_space<vmem>>, vector<1x64xf32>
    %503 = vector.broadcast %502 : vector<1x64xf32> to vector<16x64xf32>
    %504 = arith.mulf %501, %503 : vector<16x64xf32>
    %505 = arith.addf %485, %504 : vector<16x64xf32>
    %c32_369 = arith.constant 32 : index
    %c0_370 = arith.constant 0 : index
    %506 = vector.load %arg30[%c32_369, %c0_370] : memref<80x128xf32, #tpu.memory_space<vmem>>, vector<16x64xf32>
    %c8_371 = arith.constant 8 : index
    %c0_372 = arith.constant 0 : index
    %507 = vector.load %arg19[%c8_371, %c0_372] : memref<17x64xf32, #tpu.memory_space<vmem>>, vector<1x64xf32>
    %508 = vector.broadcast %507 : vector<1x64xf32> to vector<16x64xf32>
    %509 = arith.mulf %506, %508 : vector<16x64xf32>
    %510 = arith.addf %490, %509 : vector<16x64xf32>
    %c33_373 = arith.constant 33 : index
    %c0_374 = arith.constant 0 : index
    %511 = vector.load %arg30[%c33_373, %c0_374] : memref<80x128xf32, #tpu.memory_space<vmem>>, vector<16x64xf32>
    %c9_375 = arith.constant 9 : index
    %c0_376 = arith.constant 0 : index
    %512 = vector.load %arg19[%c9_375, %c0_376] : memref<17x64xf32, #tpu.memory_space<vmem>>, vector<1x64xf32>
    %513 = vector.broadcast %512 : vector<1x64xf32> to vector<16x64xf32>
    %514 = arith.mulf %511, %513 : vector<16x64xf32>
    %515 = arith.addf %495, %514 : vector<16x64xf32>
    %c34_377 = arith.constant 34 : index
    %c0_378 = arith.constant 0 : index
    %516 = vector.load %arg30[%c34_377, %c0_378] : memref<80x128xf32, #tpu.memory_space<vmem>>, vector<16x64xf32>
    %c10_379 = arith.constant 10 : index
    %c0_380 = arith.constant 0 : index
    %517 = vector.load %arg19[%c10_379, %c0_380] : memref<17x64xf32, #tpu.memory_space<vmem>>, vector<1x64xf32>
    %518 = vector.broadcast %517 : vector<1x64xf32> to vector<16x64xf32>
    %519 = arith.mulf %516, %518 : vector<16x64xf32>
    %520 = arith.addf %500, %519 : vector<16x64xf32>
    %c35_381 = arith.constant 35 : index
    %c0_382 = arith.constant 0 : index
    %521 = vector.load %arg30[%c35_381, %c0_382] : memref<80x128xf32, #tpu.memory_space<vmem>>, vector<16x64xf32>
    %c11_383 = arith.constant 11 : index
    %c0_384 = arith.constant 0 : index
    %522 = vector.load %arg19[%c11_383, %c0_384] : memref<17x64xf32, #tpu.memory_space<vmem>>, vector<1x64xf32>
    %523 = vector.broadcast %522 : vector<1x64xf32> to vector<16x64xf32>
    %524 = arith.mulf %521, %523 : vector<16x64xf32>
    %525 = arith.addf %505, %524 : vector<16x64xf32>
    %c36_385 = arith.constant 36 : index
    %c0_386 = arith.constant 0 : index
    %526 = vector.load %arg30[%c36_385, %c0_386] : memref<80x128xf32, #tpu.memory_space<vmem>>, vector<16x64xf32>
    %c12_387 = arith.constant 12 : index
    %c0_388 = arith.constant 0 : index
    %527 = vector.load %arg19[%c12_387, %c0_388] : memref<17x64xf32, #tpu.memory_space<vmem>>, vector<1x64xf32>
    %528 = vector.broadcast %527 : vector<1x64xf32> to vector<16x64xf32>
    %529 = arith.mulf %526, %528 : vector<16x64xf32>
    %530 = arith.addf %510, %529 : vector<16x64xf32>
    %c37_389 = arith.constant 37 : index
    %c0_390 = arith.constant 0 : index
    %531 = vector.load %arg30[%c37_389, %c0_390] : memref<80x128xf32, #tpu.memory_space<vmem>>, vector<16x64xf32>
    %c13_391 = arith.constant 13 : index
    %c0_392 = arith.constant 0 : index
    %532 = vector.load %arg19[%c13_391, %c0_392] : memref<17x64xf32, #tpu.memory_space<vmem>>, vector<1x64xf32>
    %533 = vector.broadcast %532 : vector<1x64xf32> to vector<16x64xf32>
    %534 = arith.mulf %531, %533 : vector<16x64xf32>
    %535 = arith.addf %515, %534 : vector<16x64xf32>
    %c38_393 = arith.constant 38 : index
    %c0_394 = arith.constant 0 : index
    %536 = vector.load %arg30[%c38_393, %c0_394] : memref<80x128xf32, #tpu.memory_space<vmem>>, vector<16x64xf32>
    %c14_395 = arith.constant 14 : index
    %c0_396 = arith.constant 0 : index
    %537 = vector.load %arg19[%c14_395, %c0_396] : memref<17x64xf32, #tpu.memory_space<vmem>>, vector<1x64xf32>
    %538 = vector.broadcast %537 : vector<1x64xf32> to vector<16x64xf32>
    %539 = arith.mulf %536, %538 : vector<16x64xf32>
    %540 = arith.addf %520, %539 : vector<16x64xf32>
    %c39_397 = arith.constant 39 : index
    %c0_398 = arith.constant 0 : index
    %541 = vector.load %arg30[%c39_397, %c0_398] : memref<80x128xf32, #tpu.memory_space<vmem>>, vector<16x64xf32>
    %c15_399 = arith.constant 15 : index
    %c0_400 = arith.constant 0 : index
    %542 = vector.load %arg19[%c15_399, %c0_400] : memref<17x64xf32, #tpu.memory_space<vmem>>, vector<1x64xf32>
    %543 = vector.broadcast %542 : vector<1x64xf32> to vector<16x64xf32>
    %544 = arith.mulf %541, %543 : vector<16x64xf32>
    %545 = arith.addf %525, %544 : vector<16x64xf32>
    %c40_401 = arith.constant 40 : index
    %c0_402 = arith.constant 0 : index
    %546 = vector.load %arg30[%c40_401, %c0_402] : memref<80x128xf32, #tpu.memory_space<vmem>>, vector<16x64xf32>
    %c16_403 = arith.constant 16 : index
    %c0_404 = arith.constant 0 : index
    %547 = vector.load %arg19[%c16_403, %c0_404] : memref<17x64xf32, #tpu.memory_space<vmem>>, vector<1x64xf32>
    %548 = vector.broadcast %547 : vector<1x64xf32> to vector<16x64xf32>
    %549 = arith.mulf %546, %548 : vector<16x64xf32>
    %550 = arith.addf %530, %549 : vector<16x64xf32>
    %551 = arith.addf %550, %535 : vector<16x64xf32>
    %552 = arith.addf %540, %545 : vector<16x64xf32>
    %553 = arith.addf %551, %552 : vector<16x64xf32>
    %554 = tpu.concatenate %553, %359 in 1 : vector<16x64xf32>, vector<16x64xf32> -> vector<16x128xf32>
    %555 = arith.truncf %554 : vector<16x128xf32> to vector<16x128xbf16>
    %c0_405 = arith.constant 0 : index
    %c0_406 = arith.constant 0 : index
    %556 = vector.load %arg20[%c0_405, %c0_406] : memref<128x64xbf16, #tpu.memory_space<vmem>>, vector<128x64xbf16>
    %cst_407 = arith.constant dense<0.000000e+00> : vector<16x64xf32>
    %557 = tpu.matmul %555, %556, %cst_407 {dimension_numbers = #tpu.dot_dimension_numbers<[1], [0], [0], [1], [0, 0, 1, 1], [], []>} : vector<16x128xbf16>, vector<128x64xbf16>, vector<16x64xf32> -> vector<16x64xf32>
    %c0_408 = arith.constant 0 : index
    %c0_409 = arith.constant 0 : index
    %558 = vector.load %arg21[%c0_408, %c0_409] : memref<1x64xf32, #tpu.memory_space<vmem>>, vector<1x64xf32>
    %559 = vector.broadcast %558 : vector<1x64xf32> to vector<16x64xf32>
    %560 = arith.addf %557, %559 : vector<16x64xf32>
    %cst_410 = arith.constant 0.000000e+00 : f32
    %561 = vector.broadcast %cst_410 : f32 to vector<16x64xf32>
    %562 = arith.maximumf %560, %561 : vector<16x64xf32>
    %c32_411 = arith.constant 32 : index
    %c0_412 = arith.constant 0 : index
    %563 = vector.load %arg30[%c32_411, %c0_412] : memref<80x128xf32, #tpu.memory_space<vmem>>, vector<16x64xf32>
    tpu.vector_store %arg30[%c32_411, %c0_412], %562 {strides = array<i32>} : memref<80x128xf32, #tpu.memory_space<vmem>>, vector<16x64xf32>,
    %cst_413 = arith.constant 0.000000e+00 : f32
    %564 = vector.broadcast %cst_413 : f32 to vector<16x64xf32>
    %cst_414 = arith.constant 0.000000e+00 : f32
    %565 = vector.broadcast %cst_414 : f32 to vector<16x64xf32>
    %cst_415 = arith.constant 0.000000e+00 : f32
    %566 = vector.broadcast %cst_415 : f32 to vector<16x64xf32>
    %cst_416 = arith.constant 0.000000e+00 : f32
    %567 = vector.broadcast %cst_416 : f32 to vector<16x64xf32>
    %c4_417 = arith.constant 4 : index
    %c0_418 = arith.constant 0 : index
    %568 = vector.load %arg30[%c4_417, %c0_418] : memref<80x128xf32, #tpu.memory_space<vmem>>, vector<16x64xf32>
    %c0_419 = arith.constant 0 : index
    %c0_420 = arith.constant 0 : index
    %569 = vector.load %arg22[%c0_419, %c0_420] : memref<29x64xf32, #tpu.memory_space<vmem>>, vector<1x64xf32>
    %570 = vector.broadcast %569 : vector<1x64xf32> to vector<16x64xf32>
    %571 = arith.mulf %568, %570 : vector<16x64xf32>
    %572 = arith.addf %564, %571 : vector<16x64xf32>
    %c6_421 = arith.constant 6 : index
    %c0_422 = arith.constant 0 : index
    %573 = vector.load %arg30[%c6_421, %c0_422] : memref<80x128xf32, #tpu.memory_space<vmem>>, vector<16x64xf32>
    %c1_423 = arith.constant 1 : index
    %c0_424 = arith.constant 0 : index
    %574 = vector.load %arg22[%c1_423, %c0_424] : memref<29x64xf32, #tpu.memory_space<vmem>>, vector<1x64xf32>
    %575 = vector.broadcast %574 : vector<1x64xf32> to vector<16x64xf32>
    %576 = arith.mulf %573, %575 : vector<16x64xf32>
    %577 = arith.addf %565, %576 : vector<16x64xf32>
    %c8_425 = arith.constant 8 : index
    %c0_426 = arith.constant 0 : index
    %578 = vector.load %arg30[%c8_425, %c0_426] : memref<80x128xf32, #tpu.memory_space<vmem>>, vector<16x64xf32>
    %c2_427 = arith.constant 2 : index
    %c0_428 = arith.constant 0 : index
    %579 = vector.load %arg22[%c2_427, %c0_428] : memref<29x64xf32, #tpu.memory_space<vmem>>, vector<1x64xf32>
    %580 = vector.broadcast %579 : vector<1x64xf32> to vector<16x64xf32>
    %581 = arith.mulf %578, %580 : vector<16x64xf32>
    %582 = arith.addf %566, %581 : vector<16x64xf32>
    %c10_429 = arith.constant 10 : index
    %c0_430 = arith.constant 0 : index
    %583 = vector.load %arg30[%c10_429, %c0_430] : memref<80x128xf32, #tpu.memory_space<vmem>>, vector<16x64xf32>
    %c3_431 = arith.constant 3 : index
    %c0_432 = arith.constant 0 : index
    %584 = vector.load %arg22[%c3_431, %c0_432] : memref<29x64xf32, #tpu.memory_space<vmem>>, vector<1x64xf32>
    %585 = vector.broadcast %584 : vector<1x64xf32> to vector<16x64xf32>
    %586 = arith.mulf %583, %585 : vector<16x64xf32>
    %587 = arith.addf %567, %586 : vector<16x64xf32>
    %c12_433 = arith.constant 12 : index
    %c0_434 = arith.constant 0 : index
    %588 = vector.load %arg30[%c12_433, %c0_434] : memref<80x128xf32, #tpu.memory_space<vmem>>, vector<16x64xf32>
    %c4_435 = arith.constant 4 : index
    %c0_436 = arith.constant 0 : index
    %589 = vector.load %arg22[%c4_435, %c0_436] : memref<29x64xf32, #tpu.memory_space<vmem>>, vector<1x64xf32>
    %590 = vector.broadcast %589 : vector<1x64xf32> to vector<16x64xf32>
    %591 = arith.mulf %588, %590 : vector<16x64xf32>
    %592 = arith.addf %572, %591 : vector<16x64xf32>
    %c14_437 = arith.constant 14 : index
    %c0_438 = arith.constant 0 : index
    %593 = vector.load %arg30[%c14_437, %c0_438] : memref<80x128xf32, #tpu.memory_space<vmem>>, vector<16x64xf32>
    %c5_439 = arith.constant 5 : index
    %c0_440 = arith.constant 0 : index
    %594 = vector.load %arg22[%c5_439, %c0_440] : memref<29x64xf32, #tpu.memory_space<vmem>>, vector<1x64xf32>
    %595 = vector.broadcast %594 : vector<1x64xf32> to vector<16x64xf32>
    %596 = arith.mulf %593, %595 : vector<16x64xf32>
    %597 = arith.addf %577, %596 : vector<16x64xf32>
    %c16_441 = arith.constant 16 : index
    %c0_442 = arith.constant 0 : index
    %598 = vector.load %arg30[%c16_441, %c0_442] : memref<80x128xf32, #tpu.memory_space<vmem>>, vector<16x64xf32>
    %c6_443 = arith.constant 6 : index
    %c0_444 = arith.constant 0 : index
    %599 = vector.load %arg22[%c6_443, %c0_444] : memref<29x64xf32, #tpu.memory_space<vmem>>, vector<1x64xf32>
    %600 = vector.broadcast %599 : vector<1x64xf32> to vector<16x64xf32>
    %601 = arith.mulf %598, %600 : vector<16x64xf32>
    %602 = arith.addf %582, %601 : vector<16x64xf32>
    %c18 = arith.constant 18 : index
    %c0_445 = arith.constant 0 : index
    %603 = vector.load %arg30[%c18, %c0_445] : memref<80x128xf32, #tpu.memory_space<vmem>>, vector<16x64xf32>
    %c7_446 = arith.constant 7 : index
    %c0_447 = arith.constant 0 : index
    %604 = vector.load %arg22[%c7_446, %c0_447] : memref<29x64xf32, #tpu.memory_space<vmem>>, vector<1x64xf32>
    %605 = vector.broadcast %604 : vector<1x64xf32> to vector<16x64xf32>
    %606 = arith.mulf %603, %605 : vector<16x64xf32>
    %607 = arith.addf %587, %606 : vector<16x64xf32>
    %c20 = arith.constant 20 : index
    %c0_448 = arith.constant 0 : index
    %608 = vector.load %arg30[%c20, %c0_448] : memref<80x128xf32, #tpu.memory_space<vmem>>, vector<16x64xf32>
    %c8_449 = arith.constant 8 : index
    %c0_450 = arith.constant 0 : index
    %609 = vector.load %arg22[%c8_449, %c0_450] : memref<29x64xf32, #tpu.memory_space<vmem>>, vector<1x64xf32>
    %610 = vector.broadcast %609 : vector<1x64xf32> to vector<16x64xf32>
    %611 = arith.mulf %608, %610 : vector<16x64xf32>
    %612 = arith.addf %592, %611 : vector<16x64xf32>
    %c22 = arith.constant 22 : index
    %c0_451 = arith.constant 0 : index
    %613 = vector.load %arg30[%c22, %c0_451] : memref<80x128xf32, #tpu.memory_space<vmem>>, vector<16x64xf32>
    %c9_452 = arith.constant 9 : index
    %c0_453 = arith.constant 0 : index
    %614 = vector.load %arg22[%c9_452, %c0_453] : memref<29x64xf32, #tpu.memory_space<vmem>>, vector<1x64xf32>
    %615 = vector.broadcast %614 : vector<1x64xf32> to vector<16x64xf32>
    %616 = arith.mulf %613, %615 : vector<16x64xf32>
    %617 = arith.addf %597, %616 : vector<16x64xf32>
    %c24_454 = arith.constant 24 : index
    %c0_455 = arith.constant 0 : index
    %618 = vector.load %arg30[%c24_454, %c0_455] : memref<80x128xf32, #tpu.memory_space<vmem>>, vector<16x64xf32>
    %c10_456 = arith.constant 10 : index
    %c0_457 = arith.constant 0 : index
    %619 = vector.load %arg22[%c10_456, %c0_457] : memref<29x64xf32, #tpu.memory_space<vmem>>, vector<1x64xf32>
    %620 = vector.broadcast %619 : vector<1x64xf32> to vector<16x64xf32>
    %621 = arith.mulf %618, %620 : vector<16x64xf32>
    %622 = arith.addf %602, %621 : vector<16x64xf32>
    %c26_458 = arith.constant 26 : index
    %c0_459 = arith.constant 0 : index
    %623 = vector.load %arg30[%c26_458, %c0_459] : memref<80x128xf32, #tpu.memory_space<vmem>>, vector<16x64xf32>
    %c11_460 = arith.constant 11 : index
    %c0_461 = arith.constant 0 : index
    %624 = vector.load %arg22[%c11_460, %c0_461] : memref<29x64xf32, #tpu.memory_space<vmem>>, vector<1x64xf32>
    %625 = vector.broadcast %624 : vector<1x64xf32> to vector<16x64xf32>
    %626 = arith.mulf %623, %625 : vector<16x64xf32>
    %627 = arith.addf %607, %626 : vector<16x64xf32>
    %c28_462 = arith.constant 28 : index
    %c0_463 = arith.constant 0 : index
    %628 = vector.load %arg30[%c28_462, %c0_463] : memref<80x128xf32, #tpu.memory_space<vmem>>, vector<16x64xf32>
    %c12_464 = arith.constant 12 : index
    %c0_465 = arith.constant 0 : index
    %629 = vector.load %arg22[%c12_464, %c0_465] : memref<29x64xf32, #tpu.memory_space<vmem>>, vector<1x64xf32>
    %630 = vector.broadcast %629 : vector<1x64xf32> to vector<16x64xf32>
    %631 = arith.mulf %628, %630 : vector<16x64xf32>
    %632 = arith.addf %612, %631 : vector<16x64xf32>
    %c30_466 = arith.constant 30 : index
    %c0_467 = arith.constant 0 : index
    %633 = vector.load %arg30[%c30_466, %c0_467] : memref<80x128xf32, #tpu.memory_space<vmem>>, vector<16x64xf32>
    %c13_468 = arith.constant 13 : index
    %c0_469 = arith.constant 0 : index
    %634 = vector.load %arg22[%c13_468, %c0_469] : memref<29x64xf32, #tpu.memory_space<vmem>>, vector<1x64xf32>
    %635 = vector.broadcast %634 : vector<1x64xf32> to vector<16x64xf32>
    %636 = arith.mulf %633, %635 : vector<16x64xf32>
    %637 = arith.addf %617, %636 : vector<16x64xf32>
    %c32_470 = arith.constant 32 : index
    %c0_471 = arith.constant 0 : index
    %638 = vector.load %arg30[%c32_470, %c0_471] : memref<80x128xf32, #tpu.memory_space<vmem>>, vector<16x64xf32>
    %c14_472 = arith.constant 14 : index
    %c0_473 = arith.constant 0 : index
    %639 = vector.load %arg22[%c14_472, %c0_473] : memref<29x64xf32, #tpu.memory_space<vmem>>, vector<1x64xf32>
    %640 = vector.broadcast %639 : vector<1x64xf32> to vector<16x64xf32>
    %641 = arith.mulf %638, %640 : vector<16x64xf32>
    %642 = arith.addf %622, %641 : vector<16x64xf32>
    %c34_474 = arith.constant 34 : index
    %c0_475 = arith.constant 0 : index
    %643 = vector.load %arg30[%c34_474, %c0_475] : memref<80x128xf32, #tpu.memory_space<vmem>>, vector<16x64xf32>
    %c15_476 = arith.constant 15 : index
    %c0_477 = arith.constant 0 : index
    %644 = vector.load %arg22[%c15_476, %c0_477] : memref<29x64xf32, #tpu.memory_space<vmem>>, vector<1x64xf32>
    %645 = vector.broadcast %644 : vector<1x64xf32> to vector<16x64xf32>
    %646 = arith.mulf %643, %645 : vector<16x64xf32>
    %647 = arith.addf %627, %646 : vector<16x64xf32>
    %c36_478 = arith.constant 36 : index
    %c0_479 = arith.constant 0 : index
    %648 = vector.load %arg30[%c36_478, %c0_479] : memref<80x128xf32, #tpu.memory_space<vmem>>, vector<16x64xf32>
    %c16_480 = arith.constant 16 : index
    %c0_481 = arith.constant 0 : index
    %649 = vector.load %arg22[%c16_480, %c0_481] : memref<29x64xf32, #tpu.memory_space<vmem>>, vector<1x64xf32>
    %650 = vector.broadcast %649 : vector<1x64xf32> to vector<16x64xf32>
    %651 = arith.mulf %648, %650 : vector<16x64xf32>
    %652 = arith.addf %632, %651 : vector<16x64xf32>
    %c38_482 = arith.constant 38 : index
    %c0_483 = arith.constant 0 : index
    %653 = vector.load %arg30[%c38_482, %c0_483] : memref<80x128xf32, #tpu.memory_space<vmem>>, vector<16x64xf32>
    %c17 = arith.constant 17 : index
    %c0_484 = arith.constant 0 : index
    %654 = vector.load %arg22[%c17, %c0_484] : memref<29x64xf32, #tpu.memory_space<vmem>>, vector<1x64xf32>
    %655 = vector.broadcast %654 : vector<1x64xf32> to vector<16x64xf32>
    %656 = arith.mulf %653, %655 : vector<16x64xf32>
    %657 = arith.addf %637, %656 : vector<16x64xf32>
    %c40_485 = arith.constant 40 : index
    %c0_486 = arith.constant 0 : index
    %658 = vector.load %arg30[%c40_485, %c0_486] : memref<80x128xf32, #tpu.memory_space<vmem>>, vector<16x64xf32>
    %c18_487 = arith.constant 18 : index
    %c0_488 = arith.constant 0 : index
    %659 = vector.load %arg22[%c18_487, %c0_488] : memref<29x64xf32, #tpu.memory_space<vmem>>, vector<1x64xf32>
    %660 = vector.broadcast %659 : vector<1x64xf32> to vector<16x64xf32>
    %661 = arith.mulf %658, %660 : vector<16x64xf32>
    %662 = arith.addf %642, %661 : vector<16x64xf32>
    %c42 = arith.constant 42 : index
    %c0_489 = arith.constant 0 : index
    %663 = vector.load %arg30[%c42, %c0_489] : memref<80x128xf32, #tpu.memory_space<vmem>>, vector<16x64xf32>
    %c19 = arith.constant 19 : index
    %c0_490 = arith.constant 0 : index
    %664 = vector.load %arg22[%c19, %c0_490] : memref<29x64xf32, #tpu.memory_space<vmem>>, vector<1x64xf32>
    %665 = vector.broadcast %664 : vector<1x64xf32> to vector<16x64xf32>
    %666 = arith.mulf %663, %665 : vector<16x64xf32>
    %667 = arith.addf %647, %666 : vector<16x64xf32>
    %c44 = arith.constant 44 : index
    %c0_491 = arith.constant 0 : index
    %668 = vector.load %arg30[%c44, %c0_491] : memref<80x128xf32, #tpu.memory_space<vmem>>, vector<16x64xf32>
    %c20_492 = arith.constant 20 : index
    %c0_493 = arith.constant 0 : index
    %669 = vector.load %arg22[%c20_492, %c0_493] : memref<29x64xf32, #tpu.memory_space<vmem>>, vector<1x64xf32>
    %670 = vector.broadcast %669 : vector<1x64xf32> to vector<16x64xf32>
    %671 = arith.mulf %668, %670 : vector<16x64xf32>
    %672 = arith.addf %652, %671 : vector<16x64xf32>
    %c46 = arith.constant 46 : index
    %c0_494 = arith.constant 0 : index
    %673 = vector.load %arg30[%c46, %c0_494] : memref<80x128xf32, #tpu.memory_space<vmem>>, vector<16x64xf32>
    %c21 = arith.constant 21 : index
    %c0_495 = arith.constant 0 : index
    %674 = vector.load %arg22[%c21, %c0_495] : memref<29x64xf32, #tpu.memory_space<vmem>>, vector<1x64xf32>
    %675 = vector.broadcast %674 : vector<1x64xf32> to vector<16x64xf32>
    %676 = arith.mulf %673, %675 : vector<16x64xf32>
    %677 = arith.addf %657, %676 : vector<16x64xf32>
    %c48_496 = arith.constant 48 : index
    %c0_497 = arith.constant 0 : index
    %678 = vector.load %arg30[%c48_496, %c0_497] : memref<80x128xf32, #tpu.memory_space<vmem>>, vector<16x64xf32>
    %c22_498 = arith.constant 22 : index
    %c0_499 = arith.constant 0 : index
    %679 = vector.load %arg22[%c22_498, %c0_499] : memref<29x64xf32, #tpu.memory_space<vmem>>, vector<1x64xf32>
    %680 = vector.broadcast %679 : vector<1x64xf32> to vector<16x64xf32>
    %681 = arith.mulf %678, %680 : vector<16x64xf32>
    %682 = arith.addf %662, %681 : vector<16x64xf32>
    %c50 = arith.constant 50 : index
    %c0_500 = arith.constant 0 : index
    %683 = vector.load %arg30[%c50, %c0_500] : memref<80x128xf32, #tpu.memory_space<vmem>>, vector<16x64xf32>
    %c23 = arith.constant 23 : index
    %c0_501 = arith.constant 0 : index
    %684 = vector.load %arg22[%c23, %c0_501] : memref<29x64xf32, #tpu.memory_space<vmem>>, vector<1x64xf32>
    %685 = vector.broadcast %684 : vector<1x64xf32> to vector<16x64xf32>
    %686 = arith.mulf %683, %685 : vector<16x64xf32>
    %687 = arith.addf %667, %686 : vector<16x64xf32>
    %c52 = arith.constant 52 : index
    %c0_502 = arith.constant 0 : index
    %688 = vector.load %arg30[%c52, %c0_502] : memref<80x128xf32, #tpu.memory_space<vmem>>, vector<16x64xf32>
    %c24_503 = arith.constant 24 : index
    %c0_504 = arith.constant 0 : index
    %689 = vector.load %arg22[%c24_503, %c0_504] : memref<29x64xf32, #tpu.memory_space<vmem>>, vector<1x64xf32>
    %690 = vector.broadcast %689 : vector<1x64xf32> to vector<16x64xf32>
    %691 = arith.mulf %688, %690 : vector<16x64xf32>
    %692 = arith.addf %672, %691 : vector<16x64xf32>
    %c54 = arith.constant 54 : index
    %c0_505 = arith.constant 0 : index
    %693 = vector.load %arg30[%c54, %c0_505] : memref<80x128xf32, #tpu.memory_space<vmem>>, vector<16x64xf32>
    %c25_506 = arith.constant 25 : index
    %c0_507 = arith.constant 0 : index
    %694 = vector.load %arg22[%c25_506, %c0_507] : memref<29x64xf32, #tpu.memory_space<vmem>>, vector<1x64xf32>
    %695 = vector.broadcast %694 : vector<1x64xf32> to vector<16x64xf32>
    %696 = arith.mulf %693, %695 : vector<16x64xf32>
    %697 = arith.addf %677, %696 : vector<16x64xf32>
    %c56 = arith.constant 56 : index
    %c0_508 = arith.constant 0 : index
    %698 = vector.load %arg30[%c56, %c0_508] : memref<80x128xf32, #tpu.memory_space<vmem>>, vector<16x64xf32>
    %c26_509 = arith.constant 26 : index
    %c0_510 = arith.constant 0 : index
    %699 = vector.load %arg22[%c26_509, %c0_510] : memref<29x64xf32, #tpu.memory_space<vmem>>, vector<1x64xf32>
    %700 = vector.broadcast %699 : vector<1x64xf32> to vector<16x64xf32>
    %701 = arith.mulf %698, %700 : vector<16x64xf32>
    %702 = arith.addf %682, %701 : vector<16x64xf32>
    %c58 = arith.constant 58 : index
    %c0_511 = arith.constant 0 : index
    %703 = vector.load %arg30[%c58, %c0_511] : memref<80x128xf32, #tpu.memory_space<vmem>>, vector<16x64xf32>
    %c27_512 = arith.constant 27 : index
    %c0_513 = arith.constant 0 : index
    %704 = vector.load %arg22[%c27_512, %c0_513] : memref<29x64xf32, #tpu.memory_space<vmem>>, vector<1x64xf32>
    %705 = vector.broadcast %704 : vector<1x64xf32> to vector<16x64xf32>
    %706 = arith.mulf %703, %705 : vector<16x64xf32>
    %707 = arith.addf %687, %706 : vector<16x64xf32>
    %c60 = arith.constant 60 : index
    %c0_514 = arith.constant 0 : index
    %708 = vector.load %arg30[%c60, %c0_514] : memref<80x128xf32, #tpu.memory_space<vmem>>, vector<16x64xf32>
    %c28_515 = arith.constant 28 : index
    %c0_516 = arith.constant 0 : index
    %709 = vector.load %arg22[%c28_515, %c0_516] : memref<29x64xf32, #tpu.memory_space<vmem>>, vector<1x64xf32>
    %710 = vector.broadcast %709 : vector<1x64xf32> to vector<16x64xf32>
    %711 = arith.mulf %708, %710 : vector<16x64xf32>
    %712 = arith.addf %692, %711 : vector<16x64xf32>
    %713 = arith.addf %712, %697 : vector<16x64xf32>
    %714 = arith.addf %702, %707 : vector<16x64xf32>
    %715 = arith.addf %713, %714 : vector<16x64xf32>
    %716 = arith.truncf %715 : vector<16x64xf32> to vector<16x64xbf16>
    %c0_517 = arith.constant 0 : index
    %c0_518 = arith.constant 0 : index
    %717 = vector.load %arg23[%c0_517, %c0_518] : memref<64x128xbf16, #tpu.memory_space<vmem>>, vector<64x128xbf16>
    %cst_519 = arith.constant dense<0.000000e+00> : vector<16x128xf32>
    %718 = tpu.matmul %716, %717, %cst_519 {dimension_numbers = #tpu.dot_dimension_numbers<[1], [0], [0], [1], [0, 0, 1, 1], [], []>} : vector<16x64xbf16>, vector<64x128xbf16>, vector<16x128xf32> -> vector<16x128xf32>
    %c0_520 = arith.constant 0 : index
    %c0_521 = arith.constant 0 : index
    %719 = vector.load %arg24[%c0_520, %c0_521] : memref<1x128xf32, #tpu.memory_space<vmem>>, vector<1x128xf32>
    %720 = vector.broadcast %719 : vector<1x128xf32> to vector<16x128xf32>
    %721 = arith.addf %718, %720 : vector<16x128xf32>
    %cst_522 = arith.constant 0.000000e+00 : f32
    %722 = vector.broadcast %cst_522 : f32 to vector<16x128xf32>
    %723 = arith.maximumf %721, %722 : vector<16x128xf32>
    %724 = arith.truncf %723 : vector<16x128xf32> to vector<16x128xbf16>
    %c0_523 = arith.constant 0 : index
    %c0_524 = arith.constant 0 : index
    %725 = vector.load %arg25[%c0_523, %c0_524] : memref<128x128xbf16, #tpu.memory_space<vmem>>, vector<128x128xbf16>
    %cst_525 = arith.constant dense<0.000000e+00> : vector<16x128xf32>
    %726 = tpu.matmul %724, %725, %cst_525 {dimension_numbers = #tpu.dot_dimension_numbers<[1], [0], [0], [1], [0, 0, 1, 1], [], []>} : vector<16x128xbf16>, vector<128x128xbf16>, vector<16x128xf32> -> vector<16x128xf32>
    %c0_526 = arith.constant 0 : index
    %c0_527 = arith.constant 0 : index
    %727 = vector.load %arg26[%c0_526, %c0_527] : memref<1x128xf32, #tpu.memory_space<vmem>>, vector<1x128xf32>
    %728 = vector.broadcast %727 : vector<1x128xf32> to vector<16x128xf32>
    %729 = arith.addf %726, %728 : vector<16x128xf32>
    %cst_528 = arith.constant 0.000000e+00 : f32
    %730 = vector.broadcast %cst_528 : f32 to vector<16x128xf32>
    %731 = arith.maximumf %729, %730 : vector<16x128xf32>
    %cst_529 = arith.constant dense<0.000000e+00> : vector<128xf32>
    %732 = vector.multi_reduction <add>, %731, %cst_529 [0] : vector<16x128xf32> to vector<128xf32>
    %733 = vector.shape_cast %732 : vector<128xf32> to vector<1x128xf32>
    %cst_530 = arith.constant 1.600000e+01 : f32
    %734 = vector.broadcast %cst_530 : f32 to vector<1x128xf32>
    %735 = arith.divf %733, %734 : vector<1x128xf32>
    %736 = arith.truncf %735 : vector<1x128xf32> to vector<1x128xbf16>
    %c0_531 = arith.constant 0 : index
    %c0_532 = arith.constant 0 : index
    %737 = vector.load %arg27[%c0_531, %c0_532] : memref<128x10xbf16, #tpu.memory_space<vmem>>, vector<128x10xbf16>
    %cst_533 = arith.constant dense<0.000000e+00> : vector<1x10xf32>
    %738 = tpu.matmul %736, %737, %cst_533 {dimension_numbers = #tpu.dot_dimension_numbers<[1], [0], [0], [1], [0, 0, 1, 1], [], []>} : vector<1x128xbf16>, vector<128x10xbf16>, vector<1x10xf32> -> vector<1x10xf32>
    %c0_534 = arith.constant 0 : index
    %c0_535 = arith.constant 0 : index
    %739 = vector.load %arg28[%c0_534, %c0_535] : memref<1x10xf32, #tpu.memory_space<vmem>>, vector<1x10xf32>
    %740 = arith.addf %738, %739 : vector<1x10xf32>
    %c0_536 = arith.constant 0 : index
    %c0_537 = arith.constant 0 : index
    %c0_538 = arith.constant 0 : index
    %741 = vector.load %arg29[%c0_536, %c0_537, %c0_538] : memref<1x1x10xf32, #tpu.memory_space<vmem>>, vector<1x1x10xf32>
    %742 = vector.shape_cast %741 : vector<1x1x10xf32> to vector<1x10xf32>
    %743 = vector.shape_cast %740 : vector<1x10xf32> to vector<1x1x10xf32>
    tpu.vector_store %arg29[%c0_536, %c0_537, %c0_538], %743 {strides = array<i32>} : memref<1x1x10xf32, #tpu.memory_space<vmem>>, vector<1x1x10xf32>,
    return
  }
  func.func @transform_0(%arg0: i32) -> (i32, i32, i32) {
    %c0_i32 = arith.constant 0 : i32
    %c0_i32_0 = arith.constant 0 : i32
    %c0_i32_1 = arith.constant 0 : i32
    return %arg0, %c0_i32, %c0_i32_0 : i32, i32, i32
  }
  func.func @transform_1(%arg0: i32) -> (i32, i32) {
    %c0_i32 = arith.constant 0 : i32
    %c0_i32_0 = arith.constant 0 : i32
    %c0_i32_1 = arith.constant 0 : i32
    return %c0_i32, %c0_i32_0 : i32, i32
  }
  func.func @transform_2(%arg0: i32) -> (i32, i32) {
    %c0_i32 = arith.constant 0 : i32
    %c0_i32_0 = arith.constant 0 : i32
    %c0_i32_1 = arith.constant 0 : i32
    return %c0_i32, %c0_i32_0 : i32, i32
  }
  func.func @transform_3(%arg0: i32) -> (i32, i32) {
    %c0_i32 = arith.constant 0 : i32
    %c0_i32_0 = arith.constant 0 : i32
    %c0_i32_1 = arith.constant 0 : i32
    return %c0_i32, %c0_i32_0 : i32, i32
  }
  func.func @transform_4(%arg0: i32) -> (i32, i32) {
    %c0_i32 = arith.constant 0 : i32
    %c0_i32_0 = arith.constant 0 : i32
    %c0_i32_1 = arith.constant 0 : i32
    return %c0_i32, %c0_i32_0 : i32, i32
  }
  func.func @transform_5(%arg0: i32) -> (i32, i32) {
    %c0_i32 = arith.constant 0 : i32
    %c0_i32_0 = arith.constant 0 : i32
    %c0_i32_1 = arith.constant 0 : i32
    return %c0_i32, %c0_i32_0 : i32, i32
  }
  func.func @transform_6(%arg0: i32) -> (i32, i32) {
    %c0_i32 = arith.constant 0 : i32
    %c0_i32_0 = arith.constant 0 : i32
    %c0_i32_1 = arith.constant 0 : i32
    return %c0_i32, %c0_i32_0 : i32, i32
  }
  func.func @transform_7(%arg0: i32) -> (i32, i32) {
    %c0_i32 = arith.constant 0 : i32
    %c0_i32_0 = arith.constant 0 : i32
    %c0_i32_1 = arith.constant 0 : i32
    return %c0_i32, %c0_i32_0 : i32, i32
  }
  func.func @transform_8(%arg0: i32) -> (i32, i32) {
    %c0_i32 = arith.constant 0 : i32
    %c0_i32_0 = arith.constant 0 : i32
    %c0_i32_1 = arith.constant 0 : i32
    return %c0_i32, %c0_i32_0 : i32, i32
  }
  func.func @transform_9(%arg0: i32) -> (i32, i32) {
    %c0_i32 = arith.constant 0 : i32
    %c0_i32_0 = arith.constant 0 : i32
    %c0_i32_1 = arith.constant 0 : i32
    return %c0_i32, %c0_i32_0 : i32, i32
  }
  func.func @transform_10(%arg0: i32) -> (i32, i32) {
    %c0_i32 = arith.constant 0 : i32
    %c0_i32_0 = arith.constant 0 : i32
    %c0_i32_1 = arith.constant 0 : i32
    return %c0_i32, %c0_i32_0 : i32, i32
  }
  func.func @transform_11(%arg0: i32) -> (i32, i32) {
    %c0_i32 = arith.constant 0 : i32
    %c0_i32_0 = arith.constant 0 : i32
    %c0_i32_1 = arith.constant 0 : i32
    return %c0_i32, %c0_i32_0 : i32, i32
  }
  func.func @transform_12(%arg0: i32) -> (i32, i32) {
    %c0_i32 = arith.constant 0 : i32
    %c0_i32_0 = arith.constant 0 : i32
    %c0_i32_1 = arith.constant 0 : i32
    return %c0_i32, %c0_i32_0 : i32, i32
  }
  func.func @transform_13(%arg0: i32) -> (i32, i32) {
    %c0_i32 = arith.constant 0 : i32
    %c0_i32_0 = arith.constant 0 : i32
    %c0_i32_1 = arith.constant 0 : i32
    return %c0_i32, %c0_i32_0 : i32, i32
  }
  func.func @transform_14(%arg0: i32) -> (i32, i32) {
    %c0_i32 = arith.constant 0 : i32
    %c0_i32_0 = arith.constant 0 : i32
    %c0_i32_1 = arith.constant 0 : i32
    return %c0_i32, %c0_i32_0 : i32, i32
  }
  func.func @transform_15(%arg0: i32) -> (i32, i32) {
    %c0_i32 = arith.constant 0 : i32
    %c0_i32_0 = arith.constant 0 : i32
    %c0_i32_1 = arith.constant 0 : i32
    return %c0_i32, %c0_i32_0 : i32, i32
  }
  func.func @transform_16(%arg0: i32) -> (i32, i32) {
    %c0_i32 = arith.constant 0 : i32
    %c0_i32_0 = arith.constant 0 : i32
    %c0_i32_1 = arith.constant 0 : i32
    return %c0_i32, %c0_i32_0 : i32, i32
  }
  func.func @transform_17(%arg0: i32) -> (i32, i32) {
    %c0_i32 = arith.constant 0 : i32
    %c0_i32_0 = arith.constant 0 : i32
    %c0_i32_1 = arith.constant 0 : i32
    return %c0_i32, %c0_i32_0 : i32, i32
  }
  func.func @transform_18(%arg0: i32) -> (i32, i32) {
    %c0_i32 = arith.constant 0 : i32
    %c0_i32_0 = arith.constant 0 : i32
    %c0_i32_1 = arith.constant 0 : i32
    return %c0_i32, %c0_i32_0 : i32, i32
  }
  func.func @transform_19(%arg0: i32) -> (i32, i32) {
    %c0_i32 = arith.constant 0 : i32
    %c0_i32_0 = arith.constant 0 : i32
    %c0_i32_1 = arith.constant 0 : i32
    return %c0_i32, %c0_i32_0 : i32, i32
  }
  func.func @transform_20(%arg0: i32) -> (i32, i32) {
    %c0_i32 = arith.constant 0 : i32
    %c0_i32_0 = arith.constant 0 : i32
    %c0_i32_1 = arith.constant 0 : i32
    return %c0_i32, %c0_i32_0 : i32, i32
  }
  func.func @transform_21(%arg0: i32) -> (i32, i32) {
    %c0_i32 = arith.constant 0 : i32
    %c0_i32_0 = arith.constant 0 : i32
    %c0_i32_1 = arith.constant 0 : i32
    return %c0_i32, %c0_i32_0 : i32, i32
  }
  func.func @transform_22(%arg0: i32) -> (i32, i32) {
    %c0_i32 = arith.constant 0 : i32
    %c0_i32_0 = arith.constant 0 : i32
    %c0_i32_1 = arith.constant 0 : i32
    return %c0_i32, %c0_i32_0 : i32, i32
  }
  func.func @transform_23(%arg0: i32) -> (i32, i32) {
    %c0_i32 = arith.constant 0 : i32
    %c0_i32_0 = arith.constant 0 : i32
    %c0_i32_1 = arith.constant 0 : i32
    return %c0_i32, %c0_i32_0 : i32, i32
  }
  func.func @transform_24(%arg0: i32) -> (i32, i32) {
    %c0_i32 = arith.constant 0 : i32
    %c0_i32_0 = arith.constant 0 : i32
    %c0_i32_1 = arith.constant 0 : i32
    return %c0_i32, %c0_i32_0 : i32, i32
  }
  func.func @transform_25(%arg0: i32) -> (i32, i32) {
    %c0_i32 = arith.constant 0 : i32
    %c0_i32_0 = arith.constant 0 : i32
    %c0_i32_1 = arith.constant 0 : i32
    return %c0_i32, %c0_i32_0 : i32, i32
  }
  func.func @transform_26(%arg0: i32) -> (i32, i32) {
    %c0_i32 = arith.constant 0 : i32
    %c0_i32_0 = arith.constant 0 : i32
    %c0_i32_1 = arith.constant 0 : i32
    return %c0_i32, %c0_i32_0 : i32, i32
  }
  func.func @transform_27(%arg0: i32) -> (i32, i32) {
    %c0_i32 = arith.constant 0 : i32
    %c0_i32_0 = arith.constant 0 : i32
    %c0_i32_1 = arith.constant 0 : i32
    return %c0_i32, %c0_i32_0 : i32, i32
  }
  func.func @transform_28(%arg0: i32) -> (i32, i32, i32) {
    %c0_i32 = arith.constant 0 : i32
    %c0_i32_0 = arith.constant 0 : i32
    %c0_i32_1 = arith.constant 0 : i32
    return %arg0, %c0_i32, %c0_i32_0 : i32, i32, i32
  }
}

</mosaic_0001>

<bundles_post_ra>
// kernel: matchboxnet_forward.1
= control target key start
LH: loop header
LB: loop body
LE: loop exit
PB: predicated region body
PF: predicated region fallthrough
CT: control target
= control target key end

     0   :  { %s5103_s0 = inlined_call_operand.vmem [shape: f32[2,16,176], index: 0, kind: input, shape index: {}]   ;;  %s5104_s1 = inlined_call_operand.vmem [shape: bf16[176,128], index: 1, kind: input, shape index: {}]   ;;  %s5105_s2 = inlined_call_operand.vmem [shape: f32[1,128], index: 2, kind: input, shape index: {}]   ;;  %s5106_s3 = inlined_call_operand.vmem [shape: f32[13,128], index: 3, kind: input, shape index: {}]   ;;  %s5107_s4 = inlined_call_operand.vmem [shape: bf16[128,64], index: 4, kind: input, shape index: {}]   ;;  %s5108_s5 = inlined_call_operand.vmem [shape: f32[1,64], index: 5, kind: input, shape index: {}]   ;;  %s5109_s6 = inlined_call_operand.vmem [shape: f32[13,64], index: 6, kind: input, shape index: {}]   ;;  %s5110_s7 = inlined_call_operand.vmem [shape: bf16[192,64], index: 7, kind: input, shape index: {}]   ;;  %s5111_s8 = inlined_call_operand.vmem [shape: f32[1,64], index: 8, kind: input, shape index: {}]   ;;  %s5112_s9 = inlined_call_operand.vmem [shape: f32[15,64], index: 9, kind: input, shape index: {}]   ;;  %s5113_s10 = inlined_call_operand.vmem [shape: bf16[64,64], index: 10, kind: input, shape index: {}]   ;;  %s5114_s11 = inlined_call_operand.vmem [shape: f32[1,64], index: 11, kind: input, shape index: {}]   ;;  %s5115_s12 = inlined_call_operand.vmem [shape: f32[15,64], index: 12, kind: input, shape index: {}]   ;;  %s5116_s13 = inlined_call_operand.vmem [shape: bf16[128,64], index: 13, kind: input, shape index: {}]   ;;  %s5117_s14 = inlined_call_operand.vmem [shape: f32[1,64], index: 14, kind: input, shape index: {}]   ;;  %s5118_s15 = inlined_call_operand.vmem [shape: f32[17,64], index: 15, kind: input, shape index: {}]   ;;  %s5119_s16 = inlined_call_operand.vmem [shape: bf16[64,64], index: 16, kind: input, shape index: {}]   ;;  %s5120_s17 = inlined_call_operand.vmem [shape: f32[1,64], index: 17, kind: input, shape index: {}]   ;;  %s5121_s18 = inlined_call_operand.vmem [shape: f32[17,64], index: 18, kind: input, shape index: {}]   ;;  %s5122_s19 = inlined_call_operand.vmem [shape: bf16[128,64], index: 19, kind: input, shape index: {}]   ;;  %s5123_s20 = inlined_call_operand.vmem [shape: f32[1,64], index: 20, kind: input, shape index: {}]   ;;  %s5124_s21 = inlined_call_operand.vmem [shape: f32[29,64], index: 21, kind: input, shape index: {}]   ;;  %s5125_s22 = inlined_call_operand.vmem [shape: bf16[64,128], index: 22, kind: input, shape index: {}]   ;;  %s5126_s23 = inlined_call_operand.vmem [shape: f32[1,128], index: 23, kind: input, shape index: {}]   ;;  %s5127_s24 = inlined_call_operand.vmem [shape: bf16[128,128], index: 24, kind: input, shape index: {}]   ;;  %s5128_s25 = inlined_call_operand.vmem [shape: f32[1,128], index: 25, kind: input, shape index: {}]   ;;  %s5129_s26 = inlined_call_operand.vmem [shape: bf16[128,10], index: 26, kind: input, shape index: {}]   ;;  %s5130_s27 = inlined_call_operand.vmem [shape: f32[1,10], index: 27, kind: input, shape index: {}]   ;;  %s5131_s28 = inlined_call_operand.hbm [shape: f32[2,1,10], index: 28, kind: output, shape index: {}]  }
   0x1   :  { %5158 = sst [smem:[#allocation13_spill]] %s5103_s0 }
   0x2   :  { %5159 = sst [smem:[#allocation14_spill]] %s5104_s1 }
   0x3   :  { %5160 = sst [smem:[#allocation15_spill]] %s5105_s2 }
   0x4   :  { %5161 = sst [smem:[#allocation16_spill]] %s5106_s3 }
   0x5   :  { %5162 = sst [smem:[#allocation17_spill]] %s5107_s4 }
   0x6   :  { %5163 = sst [smem:[#allocation18_spill]] %s5108_s5 }
   0x7   :  { %5164 = sst [smem:[#allocation19_spill]] %s5109_s6 }
   0x8   :  { %5165 = sst [smem:[#allocation20_spill]] %s5110_s7 }
   0x9   :  { %5166 = sst [smem:[#allocation21_spill]] %s5111_s8 }
   0xa   :  { %5167 = sst [smem:[#allocation22_spill]] %s5112_s9 }
   0xb   :  { %5168 = sst [smem:[#allocation23_spill]] %s5113_s10 }
   0xc   :  { %5169 = sst [smem:[#allocation24_spill]] %s5114_s11 }
   0xd   :  { %5170 = sst [smem:[#allocation25_spill]] %s5115_s12 }
   0xe   :  { %5171 = sst [smem:[#allocation26_spill]] %s5131_s28 }
   0xf   :  { %33 = vsyncpa [#allocation4], 0 }
  0x10   :  { %35 = vsyncpa [#allocation4 + $0x1], 0  ;;  %s4146_s8 = smov 0   ;;  %s4148_s5 = smov 0  }
  0x11   :  { %s4150_s9 = smov 0   ;;  %s4152_s30 = smov 0  }
  0x12 LB: > { %5172 = sst [smem:[#allocation6_spill]] %s3982_s8  ;;  %s4167_s3 = sadd.s32 4294967295, %s3994_s30   ;;  %s3994_s30 = sphi %s4152_s30, %s5203_s30   ;;  %s3990_s9 = sphi %s4150_s9, %s5205_s9   ;;  %s3986_s5 = sphi %s4148_s5, %s5207_s5   ;;  %s3982_s8 = sphi %s4146_s8, %s5206_s8  }
  0x13   : > { %5173 = sst [smem:[#allocation7_spill]] %s3990_s9  ;;  %s3383_s6 = sadd.s32 4294967294, %s3994_s30  }
  0x14   : > { %5174 = sst [smem:[#allocation8_spill]] %s3994_s30  ;;  %s4171_s10 = sadd.s32 1, %s3994_s30  }
  0x15   : > { %5175 = sst [smem:[#allocation9_spill]] %s4171_s10  ;;  %s641_s0 = sadd.s32 1, %s3990_s9 }
  0x16   : > { %s638_s11 = ssub.s32 %s3994_s30, %s4171_s10  ;;  %p651_p0 = scmp.ne.s32.totalorder %s3990_s9, %s3986_s5 }
  0x17   : > { %p639_p1 = scmp.eq.s32.totalorder %s638_s11, 0  ;;  %p652_p2 = scmp.eq.s32.totalorder %s4167_s3, 1 }
  0x18   : > { %p657_p3 = scmp.ne.s32.totalorder %s3986_s5, %s3982_s8  ;;  %p658_p4 = scmp.eq.s32.totalorder %s3383_s6, 1 }
  0x19   : > { %s4182_s29 = scalar_select %p639_p1, %s3990_s9, %s641_s0  }
  0x1a   : > { %p4184_p5 = por %p652_p2, %p651_p0  ;;  %p4188_p6 = por %p658_p4, %p657_p3 }
  0x1b   : > { %5176 = sst [smem:[#allocation10_spill]] %s4182_s29  ;;  %p3386_p7 = scmp.ge.s32.totalorder %s3994_s30, 1 }
  0x1c   : > { %s5177_s2 = scalar_select %p4184_p5, 1, 0 }
  0x1d   : > { %s5179_s7 = scalar_select %p4188_p6, 1, 0 }
  0x1e   : > { %5178 = sst [smem:[#allocation11_spill]] %s5177_s2  ;;  %p765_p8 = scmp.lt.s32.totalorder %s3994_s30, 3 }
  0x1f   : > { %5180 = sst [smem:[#allocation12_spill]] %s5179_s7 }
  0x20   : > { %p766_p9 = pnand %p3386_p7, %p765_p8 }
  0x21   : > { %s5181_s4 = sld [smem:[#allocation14_spill]] (!%p766_p9)  ;;  %v3996_v1 = vmov (!%p766_p9), 0   ;;  %p838_p10 = scmp.lt.s32.totalorder (!%p766_p9), %s4167_s3, 1  ;;  %v3997_v3 = vmov (!%p766_p9), 0.0   ;;  %vm953_vm0 = vcmask (!%p766_p9), 392192   ;;  %vm3998_vm1 = vmmov (!%p766_p9), 0  }
  0x22   : > { %769 = sbr.rel (%p766_p9) target bundleno = 2498 (0x9c2), region = 132  ;;  %957 = vmatprep.subr.bf16.mxu0 (!%p766_p9), %v3996_v1  ;;  %3661 = vmatprep.subr.bf16.mxu1 (!%p766_p9), %v3997_v3  ;;  %844 = vst [vmem:[#allocation2] sm:$0xff] (!%p766_p9), %v3997_v3  ;;  %845 = vst [vmem:[#allocation2 + $0x8] sm:$0xff] (!%p766_p9), %v3997_v3  ;;  %s5183_s0 = sld [smem:[#allocation17_spill]] (!%p766_p9)  ;;  %vm1261_vm2 = vcmask (!%p766_p9), 523264   ;;  %vm3313_vm3 = vcmask (!%p766_p9), 73728  }
  0x23   : > { %846 = vst [vmem:[#allocation2 + $0x10] sm:$0xff] (!%p766_p9), %v3997_v3  ;;  %847 = vst [vmem:[#allocation2 + $0x18] sm:$0xff] (!%p766_p9), %v3997_v3  ;;  %3677 = vmatprep.mubr.msk.bf16.mxu1 (!%p766_p9), %vm3998_vm1, %v3997_v3  ;;  %s5184_s6 = sld [smem:[#allocation15_spill]] (!%p766_p9)  ;;  %s5189_s8 = sld [smem:[#allocation18_spill]] (!%p766_p9) }
  0x24   : > { %848 = vst [vmem:[#allocation2 + $0x30] sm:$0xff] (!%p766_p9), %v3997_v3  ;;  %849 = vst [vmem:[#allocation2 + $0x38] sm:$0xff] (!%p766_p9), %v3997_v3  ;;  %s5191_s1 = sld [smem:[#allocation23_spill]] (!%p766_p9)  ;;  %s5192_s2 = sld [smem:[#allocation21_spill]] (!%p766_p9) }
  0x25   : > { %850 = vst [vmem:[#allocation2 + $0x40] sm:$0xff] (!%p766_p9), %v3997_v3  ;;  %851 = vst [vmem:[#allocation2 + $0x48] sm:$0xff] (!%p766_p9), %v3997_v3  ;;  %s5195_s12 = sld [smem:[#allocation24_spill]] (!%p766_p9)  ;;  %s5196_s7 = sld [smem:[#allocation25_spill]] (!%p766_p9) }
  0x26   : > { %s4000_s10 = smov (!%p766_p9), [#allocation3]  }
  0x27   : > { %v3855_v0 = vld [vmem:[%s5181_s4] sm:$0xff] (!%p766_p9)   ;;  %v3856_v2 = vld [vmem:[%s5181_s4 + $0x8] sm:$0xff] (!%p766_p9)   ;;  %v3857_v4 = vld [vmem:[%s5181_s4 + $0x10] sm:$0xff] (!%p766_p9)  }
  0x28   : > { %958 = vmatpush1.bf16.msra.mxu0 (!%p766_p9), %v3855_v0  ;;  %v3858_v5 = vld [vmem:[%s5181_s4 + $0x18] sm:$0xff] (!%p766_p9)   ;;  %v3859_v9 = vld [vmem:[%s5181_s4 + $0x20] sm:$0xff] (!%p766_p9)   ;;  %v3860_v11 = vld [vmem:[%s5181_s4 + $0x28] sm:$0xff] (!%p766_p9)  }
  0x29   : > { %959 = vmatprep.subr.bf16.mxu0 %v3996_v1  ;;  %s839_s11 = scalar_select %p838_p10, %s4167_s3, 1  ;;  %v3866_v10 = vld [vmem:[%s5183_s0] sm:$0xff]   ;;  %v3861_v12 = vld [vmem:[%s5181_s4 + $0x30] sm:$0xff]   ;;  %v3862_v13 = vld [vmem:[%s5181_s4 + $0x38] sm:$0xff]  }
  0x2a   : > { %3662 = vmatpush3.bf16.msra.mxu1 %v3866_v10  ;;  %v3863_v14 = vld [vmem:[%s5181_s4 + $0x40] sm:$0xff]   ;;  %v3864_v15 = vld [vmem:[%s5181_s4 + $0x48] sm:$0xff]   ;;  %v3865_v16 = vld [vmem:[%s5181_s4 + $0x50] sm:$0xff]   ;;  %s5190_s4 = sld [smem:[#allocation19_spill]] }
  0x2b   : > { %s3600_s29 = sshll.u32 %s839_s11, 5  ;;  %s5182_s11 = sld [smem:[#allocation13_spill]]  ;;  %3663 = vmatprep.subr.bf16.mxu1 %v3997_v3  ;;  %v3867_v20 = vld [vmem:[%s5183_s0 + $0x8] sm:$0xff]   ;;  %v3868_v21 = vld [vmem:[%s5183_s0 + $0x10] sm:$0xff]   ;;  %v3869_v22 = vld [vmem:[%s5183_s0 + $0x18] sm:$0xff]  }
  0x2c   : > { %960 = vmatpush1.bf16.msra.mxu0 %v3856_v2  ;;  %v3870_v23 = vld [vmem:[%s5183_s0 + $0x20] sm:$0xff]   ;;  %v3871_v24 = vld [vmem:[%s5183_s0 + $0x28] sm:$0xff]   ;;  %v3872_v25 = vld [vmem:[%s5183_s0 + $0x30] sm:$0xff]  }
  0x2d   : > { %961 = vmatprep.subr.bf16.mxu0 %v3996_v1  ;;  %v3873_v26 = vld [vmem:[%s5183_s0 + $0x38] sm:$0xff]   ;;  %v3389_v27 = vld [vmem:[%s5184_s6] ss:$0 sm:$0xff]  ;;  %s836_s6 = sand.u32 1, %s3986_s5  }
  0x2e   : > { %3664 = vmatpush3.bf16.msra.mxu1 %v3867_v20 }
  0x2f   : > { %3665 = vmatprep.subr.bf16.mxu1 %v3997_v3 }
  0x30   : > { %962 = vmatpush1.bf16.msra.mxu0 %v3857_v4 }
  0x31   : > { %s4220_s9 = scalar_lea.vmem %s5182_s11, %s3600_s29  ;;  %963 = vmatprep.subr.bf16.mxu0 %v3996_v1  ;;  %s5149_s29 = smov 64  }
  0x32   : > { %v853_v6 = vld [vmem:[%s4220_s9 + $0x8] sm:$0xff]  ;;  %v855_v7 = vld [vmem:[%s4220_s9 + $0x18] sm:$0xff]  ;;  %v852_v17 = vld [vmem:[%s4220_s9] sm:$0xff]  ;;  %3666 = vmatpush3.bf16.msra.mxu1 %v3868_v21 }
  0x33   : > { %v857_v8 = vpack.c.bf16 %v855_v7, %v853_v6  ;;  %v854_v18 = vld [vmem:[%s4220_s9 + $0x10] sm:$0xff]  ;;  %3667 = vmatprep.subr.bf16.mxu1 %v3997_v3  ;;  %s5185_s9 = sld [smem:[#allocation16_spill]] }
  0x34   : > { %964 = vmatpush1.bf16.msra.mxu0 %v3858_v5  ;;  %v856_v19 = vpack.c.bf16 %v854_v18, %v852_v17 }
  0x35   : > { %3401 = vmatprep.mubr.msk.bf16.mxu0 %vm953_vm0, %v857_v8  ;;  %965 = vmatprep.subr.bf16.mxu0 %v3996_v1 }
  0x36   : > { %3668 = vmatpush3.bf16.msra.mxu1 %v3869_v22 }
  0x37   : > { %3669 = vmatprep.subr.bf16.mxu1 %v3997_v3 }
  0x38   : > { %966 = vmatpush1.bf16.msra.mxu0 %v3859_v9 }
  0x39   : > { %967 = vmatprep.subr.bf16.mxu0 %v3996_v1  ;;  %s5186_s11 = smov %s5185_s9  ;;  %v3408_v37 = vld [vmem:[%s5185_s9 + $0x6] ss:$0 sm:$0xff]  ;;  %s5187_s9 = sld [smem:[#allocation20_spill]] }
  0x3a   : > { %3670 = vmatpush3.bf16.msra.mxu1 %v3870_v23  ;;  %v3402_v38 = vld [vmem:[%s5186_s11] ss:$0 sm:$0xff]  ;;  %v3403_v39 = vld [vmem:[%s5186_s11 + $0x1] ss:$0 sm:$0xff]  ;;  %v3404_v40 = vld [vmem:[%s5186_s11 + $0x2] ss:$0 sm:$0xff] }
  0x3b   : > { %3671 = vmatprep.subr.bf16.mxu1 %v3997_v3  ;;  %v3405_v41 = vld [vmem:[%s5186_s11 + $0x3] ss:$0 sm:$0xff]  ;;  %v3406_v42 = vld [vmem:[%s5186_s11 + $0x4] ss:$0 sm:$0xff]  ;;  %v3407_v43 = vld [vmem:[%s5186_s11 + $0x5] ss:$0 sm:$0xff] }
  0x3c   : > { %968 = vmatpush1.bf16.msra.mxu0 %v3860_v11  ;;  %v3409_v47 = vld [vmem:[%s5186_s11 + $0x7] ss:$0 sm:$0xff]  ;;  %v3410_v54 = vld [vmem:[%s5186_s11 + $0x8] ss:$0 sm:$0xff]  ;;  %v3411_v62 = vld [vmem:[%s5186_s11 + $0x9] ss:$0 sm:$0xff] }
  0x3d   : > { %969 = vmatprep.subr.bf16.mxu0 %v3996_v1  ;;  %v3412_v20 = vld [vmem:[%s5186_s11 + $0xa] ss:$0 sm:$0xff] }
  0x3e   : > { %3672 = vmatpush3.bf16.msra.mxu1 %v3871_v24 }
  0x3f   : > { %3673 = vmatprep.subr.bf16.mxu1 %v3997_v3  ;;  %s5188_s28 = smov %s5187_s9 }
  0x40   : > { %970 = vmatpush1.bf16.msra.mxu0 %v3861_v12 }
  0x41   : > { %971 = vmatprep.subr.bf16.mxu0 %v3996_v1 }
  0x42   : > { %3674 = vmatpush3.bf16.msra.mxu1 %v3872_v25 }
  0x43   : > { %3675 = vmatprep.subr.bf16.mxu1 %v3997_v3 }
  0x44   : > { %972 = vmatpush1.bf16.msra.mxu0 %v3862_v13 }
  0x45   : > { %973 = vmatprep.subr.bf16.mxu0 %v3996_v1 }
  0x46   : > { %3676 = vmatpush3.bf16.msra.mxu1 %v3873_v26  ;;  %v3413_v26 = vld [vmem:[%s5186_s11 + $0xb] ss:$0 sm:$0xff] }
  0x47   : > { %1526 = vmatprep.subr.bf16.mxu1 %v3996_v1 }
  0x48   : > { %974 = vmatpush1.bf16.msra.mxu0 %v3863_v14 }
  0x49   : > { %975 = vmatprep.subr.bf16.mxu0 %v3996_v1 }
  0x4c   : > { %976 = vmatpush1.bf16.msra.mxu0 %v3864_v15 }
  0x4d   : > { %977 = vmatprep.subr.bf16.mxu0 %v3996_v1 }
  0x50   : > { %978 = vmatpush1.bf16.msra.mxu0 %v3865_v16 }
  0x51   : > { %3681 = vmatprep.subr.bf16.mxu0 %v3997_v3 }
  0x53   : > { %990 = vmatmul.mubr.bf16.vlgmr.msra.gmra.mrb[0].mxu0 %v856_v19 }
  0x54   : > { %3689 = vmatprep.mubr.msk.bf16.mxu0 %vm3998_vm1, %v3997_v3 }
 0x126   : > { %v991_v28 = vpop.f32.mrb[0].mxu0 }
 0x127   : > { %v992_v29 = vadd.f32 %v3389_v27, %v991_v28  ;;  %v993_v30 = vpop.f32.mrb[1].mxu0 }
 0x128   : > { %v994_v31 = vpop.f32.mrb[2].mxu0 }
 0x129   : > { %v998_v32 = vmax.f32 %v992_v29, 0.0  ;;  %v995_v33 = vadd.f32 %v3389_v27, %v994_v31  ;;  %v996_v34 = vpop.f32.mrb[3].mxu0 }
 0x12b   : > { %1000 = vst [vmem:[#allocation2 + $0x20] sm:$0xff] %v998_v32  ;;  %v999_v35 = vmax.f32 %v995_v33, 0.0  ;;  %v1075_v60 = vmul.f32 %v3408_v37, %v998_v32  ;;  %v3414_v33 = vld [vmem:[%s5186_s11 + $0xc] ss:$0 sm:$0xff]  ;;  %s5194_s11 = sld [smem:[#allocation22_spill]] }
 0x12d   : > { %1001 = vst [vmem:[#allocation2 + $0x28] sm:$0xff] %v999_v35  ;;  %v3840_v36 = vpack.i.bf16 %v999_v35, %v998_v32  ;;  %v1076_v61 = vmul.f32 %v3408_v37, %v999_v35 }
 0x12f   : > { %3841 = vrot.lane.b32.xlu0 %v3840_v36, %s5149_s29  ;;  %s5193_s29 = smov 64  }
 0x132   : > { %v1002_v44 = vld [vmem:[#allocation2 + $0x1a] sm:$0xff] }
 0x133   : > { %v1013_v45 = vld [vmem:[#allocation2 + $0x1b] sm:$0xff]  ;;  %v1009_v48 = vmul.f32 %v3402_v38, %v1002_v44 }
 0x134   : > { %v1024_v46 = vld [vmem:[#allocation2 + $0x1c] sm:$0xff]  ;;  %v1020_v49 = vmul.f32 %v3403_v39, %v1013_v45  ;;  %v1025_v57 = vld [vmem:[#allocation2 + $0x24] sm:$0xff]  ;;  %v1110_v19 = vld [vmem:[#allocation2 + $0x2c] sm:$0xff] }
 0x135   : > { %v1031_v50 = vmul.f32 %v3404_v40, %v1024_v46  ;;  %v1035_v51 = vld [vmem:[#allocation2 + $0x1d] sm:$0xff]  ;;  %v1036_v63 = vld [vmem:[#allocation2 + $0x25] sm:$0xff]  ;;  %v1032_v6 = vmul.f32 %v3404_v40, %v1025_v57  ;;  %v1120_v25 = vld [vmem:[#allocation2 + $0x2d] sm:$0xff]  ;;  %v1116_v36 = vmul.f32 %v3412_v20, %v1025_v57  ;;  %v1117_v37 = vmul.f32 %v3412_v20, %v1110_v19 }
 0x136   : > { %v1046_v52 = vld [vmem:[#allocation2 + $0x1e] sm:$0xff]  ;;  %v1047_v0 = vld [vmem:[#allocation2 + $0x26] sm:$0xff]  ;;  %v1042_v7 = vmul.f32 %v3405_v41, %v1035_v51  ;;  %v1043_v9 = vmul.f32 %v3405_v41, %v1036_v63  ;;  %v1130_v32 = vld [vmem:[#allocation2 + $0x2e] sm:$0xff] }
 0x137   : > { %v1057_v53 = vld [vmem:[#allocation2 + $0x1f] sm:$0xff]  ;;  %v1053_v58 = vmul.f32 %v3406_v42, %v1046_v52  ;;  %v1058_v2 = vld [vmem:[#allocation2 + $0x27] sm:$0xff]  ;;  %v1054_v10 = vmul.f32 %v3406_v42, %v1047_v0  ;;  %v1077_v16 = vadd.f32 %v1075_v60, %v1031_v50  ;;  %v1078_v22 = vadd.f32 %v1076_v61, %v1032_v6  ;;  %v3876_v60 = vld [vmem:[%s5188_s28 + $0x10] sm:$0xff]  }
 0x138   : > { %v1003_v55 = vld [vmem:[#allocation2 + $0x22] sm:$0xff]  ;;  %v1064_v59 = vmul.f32 %v3407_v43, %v1057_v53  ;;  %v1065_v12 = vmul.f32 %v3407_v43, %v1058_v2  ;;  %v1090_v14 = vld [vmem:[#allocation2 + $0x2a] sm:$0xff]  ;;  %v1136_v42 = vmul.f32 %v3414_v33, %v1047_v0  ;;  %v1137_v43 = vmul.f32 %v3414_v33, %v1130_v32  ;;  %v3877_v61 = vld [vmem:[%s5188_s28 + $0x18] sm:$0xff]  }
 0x139   : > { %v1014_v56 = vld [vmem:[#allocation2 + $0x23] sm:$0xff]  ;;  %v1010_v4 = vmul.f32 %v3402_v38, %v1003_v55  ;;  %v1055_v11 = vadd.f32 %v1053_v58, %v1009_v48  ;;  %v1096_v23 = vmul.f32 %v3410_v54, %v1003_v55  ;;  %v1097_v24 = vmul.f32 %v3410_v54, %v1090_v14  ;;  %v1100_v30 = vld [vmem:[#allocation2 + $0x2b] sm:$0xff] }
 0x13a   : > { %v1021_v5 = vmul.f32 %v3403_v39, %v1014_v56  ;;  %v1079_v8 = vld [vmem:[#allocation2 + $0x21] sm:$0xff]  ;;  %v1080_v13 = vld [vmem:[#allocation2 + $0x29] sm:$0xff]  ;;  %v1066_v15 = vadd.f32 %v1064_v59, %v1020_v49  ;;  %v1106_v31 = vmul.f32 %v3411_v62, %v1014_v56  ;;  %v1126_v38 = vmul.f32 %v3413_v26, %v1036_v63 }
 0x13b   : > { %v1086_v17 = vmul.f32 %v3409_v47, %v1079_v8  ;;  %v1087_v18 = vmul.f32 %v3409_v47, %v1080_v13  ;;  %v1056_v21 = vadd.f32 %v1054_v10, %v1010_v4  ;;  %v1098_v34 = vadd.f32 %v1096_v23, %v1055_v11  ;;  %v3874_v57 = vld [vmem:[%s5187_s9] sm:$0xff]   ;;  %v3875_v59 = vld [vmem:[%s5188_s28 + $0x8] sm:$0xff]   ;;  %v3880_v0 = vld [vmem:[%s5188_s28 + $0x30] sm:$0xff]   ;;  %s3597_s9 = sshll.u32 %s4167_s3, 4  ;;  %s3316_s3 = scalar_lea.sflag [#allocation4], %s836_s6 }
 0x13c   : > { %v1067_v27 = vadd.f32 %v1065_v12, %v1021_v5  ;;  %v1127_v39 = vmul.f32 %v3413_v26, %v1120_v25  ;;  %v1107_v40 = vmul.f32 %v3411_v62, %v1100_v30  ;;  %v1119_v41 = vadd.f32 %v1117_v37, %v1078_v22  ;;  %v3878_v62 = vld [vmem:[%s5188_s28 + $0x20] sm:$0xff]   ;;  %v3879_v63 = vld [vmem:[%s5188_s28 + $0x28] sm:$0xff]   ;;  %v3884_v10 = vld [vmem:[%s5188_s28 + $0x50] sm:$0xff]  }
 0x13d   : > { %v1088_v28 = vadd.f32 %v1086_v17, %v1042_v7  ;;  %v1089_v29 = vadd.f32 %v1087_v18, %v1043_v9  ;;  %v1099_v35 = vadd.f32 %v1097_v24, %v1056_v21  ;;  %v1118_v44 = vadd.f32 %v1116_v36, %v1077_v16  ;;  %v3881_v7 = vld [vmem:[%s5188_s28 + $0x38] sm:$0xff]   ;;  %v3882_v8 = vld [vmem:[%s5188_s28 + $0x40] sm:$0xff]   ;;  %v3883_v9 = vld [vmem:[%s5188_s28 + $0x48] sm:$0xff]  }
 0x13e   : > { %v1108_v47 = vadd.f32 %v1106_v31, %v1066_v15  ;;  %v1109_v48 = vadd.f32 %v1107_v40, %v1067_v27  ;;  %v1138_v49 = vadd.f32 %v1136_v42, %v1098_v34  ;;  %v3885_v11 = vld [vmem:[%s5188_s28 + $0x58] sm:$0xff]   ;;  %v3415_v12 = vld [vmem:[%s5189_s8] ss:$0 sm:$0xff]  ;;  %v3425_v21 = vld [vmem:[%s5190_s4 + $0x1] ss:$0 sm:$0xff]  ;;  %s837_s28 = scalar_lea.vmem [#allocation3], %s836_s6 }
 0x13f   : > { %v1128_v45 = vadd.f32 %v1126_v38, %v1088_v28  ;;  %v1129_v46 = vadd.f32 %v1127_v39, %v1089_v29  ;;  %v1139_v50 = vadd.f32 %v1137_v43, %v1099_v35  ;;  %v3426_v22 = vld [vmem:[%s5190_s4 + $0x2] ss:$0 sm:$0xff]  ;;  %v3428_v23 = vld [vmem:[%s5190_s4 + $0x4] ss:$0 sm:$0xff]  ;;  %v3429_v24 = vld [vmem:[%s5190_s4 + $0x5] ss:$0 sm:$0xff] }
 0x140   : > { %v1140_v52 = vadd.f32 %v1138_v49, %v1108_v47  ;;  %v3432_v25 = vld [vmem:[%s5190_s4 + $0x8] ss:$0 sm:$0xff]  ;;  %v3427_v29 = vld [vmem:[%s5190_s4 + $0x3] ss:$0 sm:$0xff]  ;;  %v3430_v30 = vld [vmem:[%s5190_s4 + $0x6] ss:$0 sm:$0xff] }
 0x141   : > { %v1142_v51 = vadd.f32 %v1128_v45, %v1118_v44  ;;  %v1141_v53 = vadd.f32 %v1139_v50, %v1109_v48  ;;  %v1143_v54 = vadd.f32 %v1129_v46, %v1119_v41  ;;  %v3431_v31 = vld [vmem:[%s5190_s4 + $0x7] ss:$0 sm:$0xff]  ;;  %v3433_v50 = vld [vmem:[%s5190_s4 + $0x9] ss:$0 sm:$0xff]  ;;  %s5198_s8 = sld [smem:[#allocation26_spill]] }
 0x143   : > { %v1144_v55 = vadd.f32 %v1142_v51, %v1140_v52  ;;  %v1145_v56 = vadd.f32 %v1143_v54, %v1141_v53 }
 0x145   : > { %v1146_v58 = vpack.c.bf16 %v1145_v56, %v1144_v55 }
 0x147   : > { %3678 = vmatmul.mubr.bf16.vlgmr.msra.gmra.mrb[0].mxu1 %v1146_v58  ;;  %s5061_s30 = scalar_lea.hbm %s5198_s8, %s3597_s9 }
 0x148   : > { %1527 = vmatpush1.bf16.msra.mxu1 %v3874_v57 }
 0x149   : > { %1528 = vmatprep.subr.bf16.mxu1 %v3996_v1 }
 0x14c   : > { %1529 = vmatpush1.bf16.msra.mxu1 %v3875_v59 }
 0x14d   : > { %1530 = vmatprep.subr.bf16.mxu1 %v3996_v1 }
 0x150   : > { %1531 = vmatpush1.bf16.msra.mxu1 %v3876_v60 }
 0x151   : > { %1532 = vmatprep.subr.bf16.mxu1 %v3996_v1 }
 0x154   : > { %1533 = vmatpush1.bf16.msra.mxu1 %v3877_v61 }
 0x155   : > { %1534 = vmatprep.subr.bf16.mxu1 %v3996_v1 }
 0x158   : > { %1535 = vmatpush1.bf16.msra.mxu1 %v3878_v62 }
 0x159   : > { %1536 = vmatprep.subr.bf16.mxu1 %v3996_v1 }
 0x15c   : > { %1537 = vmatpush1.bf16.msra.mxu1 %v3879_v63 }
 0x15d   : > { %1538 = vmatprep.subr.bf16.mxu1 %v3996_v1 }
 0x160   : > { %1539 = vmatpush1.bf16.msra.mxu1 %v3880_v0  ;;  %v3434_v0 = vld [vmem:[%s5190_s4 + $0xa] ss:$0 sm:$0xff] }
 0x161   : > { %1540 = vmatprep.subr.bf16.mxu1 %v3996_v1 }
 0x164   : > { %1541 = vmatpush1.bf16.msra.mxu1 %v3881_v7 }
 0x165   : > { %1542 = vmatprep.subr.bf16.mxu1 %v3996_v1 }
 0x168   : > { %1543 = vmatpush1.bf16.msra.mxu1 %v3882_v8 }
 0x169   : > { %1544 = vmatprep.subr.bf16.mxu1 %v3996_v1 }
 0x16c   : > { %1545 = vmatpush1.bf16.msra.mxu1 %v3883_v9 }
 0x16d   : > { %1546 = vmatprep.subr.bf16.mxu1 %v3996_v1 }
 0x170   : > { %1547 = vmatpush1.bf16.msra.mxu1 %v3884_v10 }
 0x171   : > { %1548 = vmatprep.subr.bf16.mxu1 %v3996_v1  ;;  %v3424_v1 = vld [vmem:[%s5190_s4] ss:$0 sm:$0xff] }
 0x174   : > { %1549 = vmatpush1.bf16.msra.mxu1 %v3885_v11 }
 0x175   : > { %3713 = vmatprep.subr.bf16.mxu1 %v3997_v3 }
 0x1a1   : > { %v4364_v2 = vpop.permute.xlu0 %3841 }
 0x1a2   : > { %v3844_v4 = vunpack.i.h.bf16 %v4364_v2  ;;  %v3843_v5 = vunpack.i.l.bf16 %v4364_v2  ;;  %v3888_v2 = vld [vmem:[%s5191_s1 + $0x10] sm:$0xff]  }
 0x1a4   : > { %v1419_v6 = vpack.c.bf16 %v3844_v4, %v3843_v5 }
 0x1a6   : > { %3450 = vmatprep.mubr.msk.bf16.mxu1 %vm1261_vm2, %v1419_v6 }
 0x21a   : > { %v1252_v13 = vpop.f32.mrb[0].mxu1 }
 0x21b   : > { %v1253_v14 = vadd.f32 %v3415_v12, %v1252_v13  ;;  %v3679_v15 = vpop.f32.mrb[1].mxu1 }
 0x21c   : > { %v1255_v16 = vpop.f32.mrb[2].mxu1 }
 0x21d   : > { %v1259_v17 = vmax.f32 %v1253_v14, 0.0  ;;  %v1256_v18 = vadd.f32 %v3415_v12, %v1255_v16  ;;  %v3680_v19 = vpop.f32.mrb[3].mxu1  ;;  %v3435_v12 = vld [vmem:[%s5190_s4 + $0xb] ss:$0 sm:$0xff] }
 0x21e   : > { %v3436_v19 = vld [vmem:[%s5190_s4 + $0xc] ss:$0 sm:$0xff]  ;;  %s3328_s4 = sshll.u32 %s837_s28, 4  ;;  %s5063_s4 = int_to_ptr.vmem [resolvable:$true] %s3328_s4 }
 0x21f   : > { %1262 = vst.msk [vmem:[#allocation2 + $0x20] sm:$0xff] %vm1261_vm2, %v1259_v17  ;;  %v1260_v20 = vmax.f32 %v1256_v18, 0.0 }
 0x221   : > { %1263 = vst.msk [vmem:[#allocation2 + $0x28] sm:$0xff] %vm1261_vm2, %v1260_v20 }
 0x226   : > { %v1264_v26 = vld [vmem:[#allocation2 + $0x1a] sm:$0xff] }
 0x227   : > { %v1275_v27 = vld [vmem:[#allocation2 + $0x1b] sm:$0xff]  ;;  %v1271_v32 = vmul.f32 %v3424_v1, %v1264_v26 }
 0x228   : > { %v1286_v28 = vld [vmem:[#allocation2 + $0x1c] sm:$0xff]  ;;  %v1282_v38 = vmul.f32 %v3425_v21, %v1275_v27  ;;  %v1287_v39 = vld [vmem:[#allocation2 + $0x24] sm:$0xff]  ;;  %v1372_v10 = vld [vmem:[#allocation2 + $0x2c] sm:$0xff] }
 0x229   : > { %v1297_v33 = vld [vmem:[#allocation2 + $0x1d] sm:$0xff]  ;;  %v1293_v40 = vmul.f32 %v3426_v22, %v1286_v28  ;;  %v1294_v45 = vmul.f32 %v3426_v22, %v1287_v39  ;;  %v1298_v46 = vld [vmem:[#allocation2 + $0x25] sm:$0xff]  ;;  %v1382_v11 = vld [vmem:[#allocation2 + $0x2d] sm:$0xff] }
 0x22a   : > { %v1308_v34 = vld [vmem:[#allocation2 + $0x1e] sm:$0xff]  ;;  %v1309_v47 = vld [vmem:[#allocation2 + $0x26] sm:$0xff]  ;;  %v1305_v51 = vmul.f32 %v3427_v29, %v1298_v46  ;;  %v1304_v58 = vmul.f32 %v3427_v29, %v1297_v33  ;;  %v1392_v18 = vld [vmem:[#allocation2 + $0x2e] sm:$0xff]  ;;  %v1389_v26 = vmul.f32 %v3435_v12, %v1382_v11 }
 0x22b   : > { %v1319_v35 = vld [vmem:[#allocation2 + $0x1f] sm:$0xff]  ;;  %v1315_v41 = vmul.f32 %v3428_v23, %v1308_v34  ;;  %v1320_v48 = vld [vmem:[#allocation2 + $0x27] sm:$0xff]  ;;  %v1316_v52 = vmul.f32 %v3428_v23, %v1309_v47  ;;  %v1378_v23 = vmul.f32 %v3434_v0, %v1287_v39  ;;  %v1398_v28 = vmul.f32 %v3436_v19, %v1309_v47 }
 0x22c   : > { %v1265_v36 = vld [vmem:[#allocation2 + $0x22] sm:$0xff]  ;;  %v1326_v42 = vmul.f32 %v3429_v24, %v1319_v35  ;;  %v1327_v54 = vmul.f32 %v3429_v24, %v1320_v48  ;;  %v1352_v63 = vld [vmem:[#allocation2 + $0x2a] sm:$0xff]  ;;  %v1379_v24 = vmul.f32 %v3434_v0, %v1372_v10  ;;  %v1399_v29 = vmul.f32 %v3436_v19, %v1392_v18 }
 0x22d   : > { %v1276_v37 = vld [vmem:[#allocation2 + $0x23] sm:$0xff]  ;;  %v1272_v43 = vmul.f32 %v3424_v1, %v1265_v36  ;;  %v1358_v49 = vmul.f32 %v3432_v25, %v1265_v36  ;;  %v1317_v53 = vadd.f32 %v1315_v41, %v1271_v32  ;;  %v1359_v9 = vmul.f32 %v3432_v25, %v1352_v63  ;;  %v1362_v17 = vld [vmem:[#allocation2 + $0x2b] sm:$0xff] }
 0x22e   : > { %v1283_v44 = vmul.f32 %v3425_v21, %v1276_v37  ;;  %v1330_v55 = vld [vmem:[#allocation2 + $0x20] sm:$0xff]  ;;  %v1331_v56 = vld [vmem:[#allocation2 + $0x28] sm:$0xff]  ;;  %v1328_v7 = vadd.f32 %v1326_v42, %v1282_v38  ;;  %v1368_v22 = vmul.f32 %v3433_v50, %v1276_v37  ;;  %v1388_v25 = vmul.f32 %v3435_v12, %v1298_v46 }
 0x22f   : > { %v1341_v57 = vld [vmem:[#allocation2 + $0x21] sm:$0xff]  ;;  %v1337_v59 = vmul.f32 %v3430_v30, %v1330_v55  ;;  %v1338_v60 = vmul.f32 %v3430_v30, %v1331_v56  ;;  %v1342_v61 = vld [vmem:[#allocation2 + $0x29] sm:$0xff]  ;;  %v1318_v6 = vadd.f32 %v1316_v52, %v1272_v43  ;;  %v1360_v1 = vadd.f32 %v1358_v49, %v1317_v53 }
 0x230   : > { %v1348_v62 = vmul.f32 %v3431_v31, %v1341_v57  ;;  %v1349_v8 = vmul.f32 %v3431_v31, %v1342_v61  ;;  %v1329_v13 = vadd.f32 %v1327_v54, %v1283_v44  ;;  %v1369_v27 = vmul.f32 %v3433_v50, %v1362_v17  ;;  %v3886_v47 = vld [vmem:[%s5191_s1] sm:$0xff]   ;;  %v3887_v48 = vld [vmem:[%s5191_s1 + $0x8] sm:$0xff]  }
 0x231   : > { %v1339_v14 = vadd.f32 %v1337_v59, %v1293_v40  ;;  %v1340_v15 = vadd.f32 %v1338_v60, %v1294_v45  ;;  %v1361_v21 = vadd.f32 %v1359_v9, %v1318_v6  ;;  %v1370_v34 = vadd.f32 %v1368_v22, %v1328_v7  ;;  %3682 = vmatpush3.bf16.msra.mxu0 %v3886_v47  ;;  %v3453_v59 = vld [vmem:[%s5194_s11 + $0x2] ss:$0 sm:$0xff]  ;;  %v3455_v60 = vld [vmem:[%s5194_s11 + $0x4] ss:$0 sm:$0xff]  ;;  %v3456_v61 = vld [vmem:[%s5194_s11 + $0x5] ss:$0 sm:$0xff] }
 0x232   : > { %v1350_v16 = vadd.f32 %v1348_v62, %v1304_v58  ;;  %v1351_v20 = vadd.f32 %v1349_v8, %v1305_v51  ;;  %v1371_v35 = vadd.f32 %v1369_v27, %v1329_v13  ;;  %v1400_v36 = vadd.f32 %v1398_v28, %v1360_v1  ;;  %3683 = vmatprep.subr.bf16.mxu0 %v3997_v3  ;;  %v3452_v58 = vld [vmem:[%s5194_s11 + $0x1] ss:$0 sm:$0xff]  ;;  %v3459_v62 = vld [vmem:[%s5194_s11 + $0x8] ss:$0 sm:$0xff]  ;;  %v3454_v7 = vld [vmem:[%s5194_s11 + $0x3] ss:$0 sm:$0xff] }
 0x233   : > { %v1380_v30 = vadd.f32 %v1378_v23, %v1339_v14  ;;  %v1381_v31 = vadd.f32 %v1379_v24, %v1340_v15  ;;  %v1401_v38 = vadd.f32 %v1399_v29, %v1361_v21  ;;  %v3457_v8 = vld [vmem:[%s5194_s11 + $0x6] ss:$0 sm:$0xff]  ;;  %v3458_v9 = vld [vmem:[%s5194_s11 + $0x7] ss:$0 sm:$0xff] }
 0x234   : > { %v1390_v32 = vadd.f32 %v1388_v25, %v1350_v16  ;;  %v1391_v33 = vadd.f32 %v1389_v26, %v1351_v20  ;;  %v1402_v41 = vadd.f32 %v1400_v36, %v1370_v34  ;;  %v3460_v26 = vld [vmem:[%s5194_s11 + $0x9] ss:$0 sm:$0xff] }
 0x235   : > { %v1403_v42 = vadd.f32 %v1401_v38, %v1371_v35  ;;  %3684 = vmatpush3.bf16.msra.mxu0 %v3887_v48 }
 0x236   : > { %v1404_v40 = vadd.f32 %v1390_v32, %v1380_v30  ;;  %v1405_v43 = vadd.f32 %v1391_v33, %v1381_v31  ;;  %3685 = vmatprep.subr.bf16.mxu0 %v3997_v3 }
 0x238   : > { %v1406_v37 = vadd.f32 %v1404_v40, %v1402_v41  ;;  %v1407_v39 = vadd.f32 %v1405_v43, %v1403_v42 }
 0x239   : > { %3686 = vmatpush3.bf16.msra.mxu0 %v3888_v2 }
 0x23a   : > { %v1416_v44 = vsel %vm1261_vm2, %v1406_v37, %v3843_v5  ;;  %v1417_v45 = vsel %vm1261_vm2, %v1407_v39, %v3844_v4  ;;  %v3889_v4 = vld [vmem:[%s5191_s1 + $0x18] sm:$0xff]   ;;  %3687 = vmatprep.subr.bf16.mxu0 %v3997_v3  ;;  %v3437_v5 = vld [vmem:[%s5192_s2] ss:$0 sm:$0xff]  ;;  %s5199_s2 = smov %s5198_s8 }
 0x23b   : > { %v1418_v46 = vpack.c.bf16 %v1417_v45, %v1416_v44 }
 0x23d   : > { %1559 = vmatmul.mubr.bf16.vlgmr.msra.gmra.mrb[4].mxu1 %v1418_v46  ;;  %3688 = vmatpush3.bf16.msra.mxu0 %v3889_v4  ;;  %v3461_v46 = vld [vmem:[%s5194_s11 + $0xa] ss:$0 sm:$0xff] }
 0x23e   : > { %3721 = vmatprep.mubr.msk.bf16.mxu1 %vm3998_vm1, %v3997_v3  ;;  %3693 = vmatprep.subr.bf16.mxu0 %v3997_v3  ;;  %v3451_v3 = vld [vmem:[%s5194_s11] ss:$0 sm:$0xff] }
 0x310   : > { %v1560_v49 = vpop.f32.mrb[4].mxu1 }
 0x311   : > { %v1561_v50 = vadd.f32 %v3437_v5, %v1560_v49  ;;  %v1562_v51 = vpop.f32.mrb[5].mxu1  ;;  %v3463_v49 = vld [vmem:[%s5194_s11 + $0xc] ss:$0 sm:$0xff] }
 0x312   : > { %v1563_v52 = vpop.f32.mrb[6].mxu1 }
 0x313   : > { %v1567_v53 = vmax.f32 %v1561_v50, 0.0  ;;  %v1564_v54 = vadd.f32 %v3437_v5, %v1563_v52  ;;  %v1565_v55 = vpop.f32.mrb[7].mxu1 }
 0x315   : > { %1569 = vst.msk [vmem:[#allocation2 + $0x20] sm:$0xff] %vm1261_vm2, %v1567_v53  ;;  %v1568_v56 = vmax.f32 %v1564_v54, 0.0  ;;  %v3462_v54 = vld [vmem:[%s5194_s11 + $0xb] ss:$0 sm:$0xff] }
 0x317   : > { %v3845_v57 = vpack.i.bf16 %v1568_v56, %v1567_v53  ;;  %1570 = vst.msk [vmem:[#allocation2 + $0x28] sm:$0xff] %vm1261_vm2, %v1568_v56 }
 0x319   : > { %3846 = vrot.lane.b32.xlu0 %v3845_v57, %s5193_s29 }
 0x31c   : > { %v1571_v63 = vld [vmem:[#allocation2 + $0x19] sm:$0xff] }
 0x31d   : > { %v1582_v0 = vld [vmem:[#allocation2 + $0x1a] sm:$0xff]  ;;  %v1578_v10 = vmul.f32 %v3451_v3, %v1571_v63 }
 0x31e   : > { %v1593_v6 = vld [vmem:[#allocation2 + $0x1b] sm:$0xff]  ;;  %v1589_v16 = vmul.f32 %v3452_v58, %v1582_v0  ;;  %v1594_v17 = vld [vmem:[#allocation2 + $0x23] sm:$0xff]  ;;  %v1679_v45 = vld [vmem:[#allocation2 + $0x2b] sm:$0xff] }
 0x31f   : > { %v1604_v11 = vld [vmem:[#allocation2 + $0x1c] sm:$0xff]  ;;  %v1600_v21 = vmul.f32 %v3453_v59, %v1593_v6  ;;  %v1601_v22 = vmul.f32 %v3453_v59, %v1594_v17  ;;  %v1605_v23 = vld [vmem:[#allocation2 + $0x24] sm:$0xff]  ;;  %v1699_v5 = vld [vmem:[#allocation2 + $0x2d] sm:$0xff]  ;;  %v1685_v56 = vmul.f32 %v3461_v46, %v1594_v17  ;;  %v1686_v57 = vmul.f32 %v3461_v46, %v1679_v45 }
 0x320   : > { %v1615_v12 = vld [vmem:[#allocation2 + $0x1d] sm:$0xff]  ;;  %v1616_v24 = vld [vmem:[#allocation2 + $0x25] sm:$0xff]  ;;  %v1611_v34 = vmul.f32 %v3454_v7, %v1604_v11  ;;  %v1612_v47 = vmul.f32 %v3454_v7, %v1605_v23  ;;  %v1706_v63 = vmul.f32 %v3463_v49, %v1699_v5  ;;  %v1719_v0 = vld [vmem:[#allocation2 + $0x2f] sm:$0xff] }
 0x321   : > { %v1626_v13 = vld [vmem:[#allocation2 + $0x1e] sm:$0xff]  ;;  %v1622_v18 = vmul.f32 %v3455_v60, %v1615_v12  ;;  %v1627_v25 = vld [vmem:[#allocation2 + $0x26] sm:$0xff]  ;;  %v1623_v27 = vmul.f32 %v3455_v60, %v1616_v24  ;;  %v3465_v6 = vld [vmem:[%s5194_s11 + $0xe] ss:$0 sm:$0xff] }
 0x322   : > { %v1572_v14 = vld [vmem:[#allocation2 + $0x21] sm:$0xff]  ;;  %v1633_v19 = vmul.f32 %v3456_v61, %v1626_v13  ;;  %v1634_v29 = vmul.f32 %v3456_v61, %v1627_v25  ;;  %v1659_v41 = vld [vmem:[#allocation2 + $0x29] sm:$0xff]  ;;  %v1726_v17 = vmul.f32 %v3465_v6, %v1719_v0 }
 0x323   : > { %v1583_v15 = vld [vmem:[#allocation2 + $0x22] sm:$0xff]  ;;  %v1579_v20 = vmul.f32 %v3451_v3, %v1572_v14  ;;  %v1624_v28 = vadd.f32 %v1622_v18, %v1578_v10  ;;  %v1665_v33 = vmul.f32 %v3459_v62, %v1572_v14  ;;  %v1669_v42 = vld [vmem:[#allocation2 + $0x2a] sm:$0xff]  ;;  %v1666_v44 = vmul.f32 %v3459_v62, %v1659_v41  ;;  %v3466_v41 = vld [vmem:[%s5195_s12] ss:$0 sm:$0xff]  ;;  %s3932_s12 = scalar_lea.vmem %s5063_s4, 16 }
 0x324   : > { %v1590_v1 = vmul.f32 %v3452_v58, %v1583_v15  ;;  %v1637_v30 = vld [vmem:[#allocation2 + $0x1f] sm:$0xff]  ;;  %v1638_v31 = vld [vmem:[#allocation2 + $0x27] sm:$0xff]  ;;  %v1635_v37 = vadd.f32 %v1633_v19, %v1589_v16  ;;  %v1675_v52 = vmul.f32 %v3460_v26, %v1583_v15  ;;  %v1676_v53 = vmul.f32 %v3460_v26, %v1669_v42  ;;  %p3933_p11 = scmp.ne.s32.totalorder %s5063_s4, %s3932_s12 }
 0x325   : > { %v1648_v32 = vld [vmem:[#allocation2 + $0x20] sm:$0xff]  ;;  %v1644_v35 = vmul.f32 %v3457_v8, %v1637_v30  ;;  %v1645_v36 = vmul.f32 %v3457_v8, %v1638_v31  ;;  %v1649_v38 = vld [vmem:[#allocation2 + $0x28] sm:$0xff]  ;;  %v1625_v43 = vadd.f32 %v1623_v27, %v1579_v20  ;;  %v1667_v50 = vadd.f32 %v1665_v33, %v1624_v28  ;;  %v3892_v33 = vld [vmem:[%s5116_s13 + $0x10] sm:$0xff]  }
 0x326   : > { %v1655_v40 = vmul.f32 %v3458_v9, %v1648_v32  ;;  %v1636_v39 = vadd.f32 %v1634_v29, %v1590_v1  ;;  %v1656_v4 = vmul.f32 %v3458_v9, %v1649_v38  ;;  %v1709_v3 = vld [vmem:[#allocation2 + $0x2e] sm:$0xff]  ;;  %v3464_v58 = vld [vmem:[%s5194_s11 + $0xd] ss:$0 sm:$0xff]  ;;  %v1677_v59 = vadd.f32 %v1675_v52, %v1635_v37  ;;  %v3476_v5 = vld [vmem:[%s5196_s7 + $0x4] ss:$0 sm:$0xff]  ;;  %p3934_p12 = pnand %p3933_p11, %p4184_p5 }
 0x327   : > { %v1646_v48 = vadd.f32 %v1644_v35, %v1600_v21  ;;  %v1647_v2 = vadd.f32 %v1645_v36, %v1601_v22  ;;  %v1668_v51 = vadd.f32 %v1666_v44, %v1625_v43  ;;  %v1689_v61 = vld [vmem:[#allocation2 + $0x2c] sm:$0xff]  ;;  %v1705_v62 = vmul.f32 %v3463_v49, %v1616_v24  ;;  %v3894_v35 = vld [vmem:[%s5116_s13 + $0x20] sm:$0xff]  }
 0x328   : > { %v1657_v55 = vadd.f32 %v1655_v40, %v1611_v34  ;;  %v1678_v60 = vadd.f32 %v1676_v53, %v1636_v39  ;;  %v1658_v7 = vadd.f32 %v1656_v4, %v1612_v47  ;;  %v1695_v10 = vmul.f32 %v3462_v54, %v1605_v23  ;;  %v3890_v23 = vld [vmem:[%s5116_s13] sm:$0xff]   ;;  %v3891_v32 = vld [vmem:[%s5116_s13 + $0x8] sm:$0xff]   ;;  %v3893_v34 = vld [vmem:[%s5116_s13 + $0x18] sm:$0xff]   ;;  %p3935_p13 = pneg %p3934_p12 }
 0x329   : > { %v1687_v8 = vadd.f32 %v1685_v56, %v1646_v48  ;;  %v1688_v9 = vadd.f32 %v1686_v57, %v1647_v2  ;;  %v1707_v11 = vadd.f32 %v1705_v62, %v1667_v50  ;;  %v1708_v12 = vadd.f32 %v1706_v63, %v1668_v51  ;;  %v3895_v36 = vld [vmem:[%s5116_s13 + $0x28] sm:$0xff]   ;;  %v3896_v38 = vld [vmem:[%s5116_s13 + $0x30] sm:$0xff]   ;;  %v3897_v40 = vld [vmem:[%s5116_s13 + $0x38] sm:$0xff]  }
 0x32a   : > { %v1715_v13 = vmul.f32 %v3464_v58, %v1627_v25  ;;  %v1716_v14 = vmul.f32 %v3464_v58, %v1709_v3  ;;  %v1696_v15 = vmul.f32 %v3462_v54, %v1689_v61  ;;  %v1725_v16 = vmul.f32 %v3465_v6, %v1638_v31  ;;  %v4518_v31 = vld [vmem:[#allocation2] sm:$0xff]  ;;  %v3480_v50 = vld [vmem:[%s5196_s7 + $0x8] ss:$0 sm:$0xff] }
 0x32b   : > { %v1697_v20 = vadd.f32 %v1695_v10, %v1657_v55  ;;  %v1728_v22 = vadd.f32 %v1726_v17, %v1688_v9  ;;  %v3472_v48 = vld [vmem:[%s5196_s7] ss:$0 sm:$0xff]  ;;  %v3473_v2 = vld [vmem:[%s5196_s7 + $0x1] ss:$0 sm:$0xff]  ;;  %v3474_v4 = vld [vmem:[%s5196_s7 + $0x2] ss:$0 sm:$0xff] }
 0x32c   : > { %v1717_v18 = vadd.f32 %v1715_v13, %v1677_v59  ;;  %v1718_v19 = vadd.f32 %v1716_v14, %v1678_v60  ;;  %v1698_v1 = vadd.f32 %v1696_v15, %v1658_v7  ;;  %v1727_v21 = vadd.f32 %v1725_v16, %v1687_v8  ;;  %v3477_v49 = vld [vmem:[%s5196_s7 + $0x5] ss:$0 sm:$0xff]  ;;  %v3475_v54 = vld [vmem:[%s5196_s7 + $0x3] ss:$0 sm:$0xff]  ;;  %v3478_v55 = vld [vmem:[%s5196_s7 + $0x6] ss:$0 sm:$0xff] }
 0x32d   : > { %v3479_v56 = vld [vmem:[%s5196_s7 + $0x7] ss:$0 sm:$0xff]  ;;  %v3481_v14 = vld [vmem:[%s5196_s7 + $0x9] ss:$0 sm:$0xff] }
 0x32e   : > { %v1729_v24 = vadd.f32 %v1717_v18, %v1707_v11  ;;  %v1730_v26 = vadd.f32 %v1718_v19, %v1708_v12  ;;  %v1731_v27 = vadd.f32 %v1727_v21, %v1697_v20  ;;  %v1732_v28 = vadd.f32 %v1728_v22, %v1698_v1 }
 0x330   : > { %v1733_v29 = vadd.f32 %v1731_v27, %v1729_v24  ;;  %v1734_v30 = vadd.f32 %v1732_v28, %v1730_v26 }
 0x332   : > { %v1735_v25 = vpack.c.bf16 %v1734_v30, %v1733_v29 }
 0x334   : > { %3690 = vmatmul.mubr.msk.bf16.vlgmr.msra.gmra.mrb[4].mxu0 %vm1261_vm2, %v1735_v25 }
 0x335   : > { %3694 = vmatpush3.bf16.msra.mxu0 %v3890_v23  ;;  %3709 = vmatprep.mubr.msk.bf16.mxu0 %vm3998_vm1, %v4518_v31 }
 0x336   : > { %3695 = vmatprep.subr.bf16.mxu0 %v4518_v31 }
 0x339   : > { %3696 = vmatpush3.bf16.msra.mxu0 %v3891_v32 }
 0x33a   : > { %3697 = vmatprep.subr.bf16.mxu0 %v4518_v31 }
 0x33d   : > { %3698 = vmatpush3.bf16.msra.mxu0 %v3892_v33 }
 0x33e   : > { %3699 = vmatprep.subr.bf16.mxu0 %v4518_v31 }
 0x341   : > { %3700 = vmatpush3.bf16.msra.mxu0 %v3893_v34  ;;  %v3482_v34 = vld [vmem:[%s5196_s7 + $0xa] ss:$0 sm:$0xff] }
 0x342   : > { %3701 = vmatprep.subr.bf16.mxu0 %v4518_v31 }
 0x345   : > { %3702 = vmatpush3.bf16.msra.mxu0 %v3894_v35 }
 0x346   : > { %3703 = vmatprep.subr.bf16.mxu0 %v4518_v31 }
 0x349   : > { %3704 = vmatpush3.bf16.msra.mxu0 %v3895_v36 }
 0x34a   : > { %3705 = vmatprep.subr.bf16.mxu0 %v4518_v31 }
 0x34d   : > { %3706 = vmatpush3.bf16.msra.mxu0 %v3896_v38 }
 0x34e   : > { %3707 = vmatprep.subr.bf16.mxu0 %v4518_v31 }
 0x351   : > { %3708 = vmatpush3.bf16.msra.mxu0 %v3897_v40 }
 0x352   : > { %3725 = vmatprep.subr.bf16.mxu0 %v4518_v31 }
 0x407   : > { %v1812_v42 = vpop.f32.mrb[4].mxu0 }
 0x408   : > { %v1813_v43 = vadd.f32 %v3466_v41, %v1812_v42  ;;  %v3691_v37 = vpop.f32.mrb[5].mxu0  ;;  %v3484_v42 = vld [vmem:[%s5196_s7 + $0xc] ss:$0 sm:$0xff] }
 0x409   : > { %v1815_v39 = vpop.f32.mrb[6].mxu0 }
 0x40a   : > { %v1819_v44 = vmax.f32 %v1813_v43, 0.0  ;;  %v1816_v45 = vadd.f32 %v3466_v41, %v1815_v39  ;;  %v3692_v46 = vpop.f32.mrb[7].mxu0 }
 0x40c   : > { %1821 = vst.msk [vmem:[#allocation2 + $0x20] sm:$0xff] %vm1261_vm2, %v1819_v44  ;;  %v1820_v47 = vmax.f32 %v1816_v45, 0.0  ;;  %v3483_v45 = vld [vmem:[%s5196_s7 + $0xb] ss:$0 sm:$0xff] }
 0x40e   : > { %1822 = vst.msk [vmem:[#allocation2 + $0x28] sm:$0xff] %vm1261_vm2, %v1820_v47 }
 0x413   : > { %v1823_v51 = vld [vmem:[#allocation2 + $0x19] sm:$0xff] }
 0x414   : > { %v1834_v52 = vld [vmem:[#allocation2 + $0x1a] sm:$0xff]  ;;  %v1830_v57 = vmul.f32 %v3472_v48, %v1823_v51 }
 0x415   : > { %v1845_v53 = vld [vmem:[#allocation2 + $0x1b] sm:$0xff]  ;;  %v1841_v62 = vmul.f32 %v3473_v2, %v1834_v52  ;;  %v1846_v63 = vld [vmem:[#allocation2 + $0x23] sm:$0xff]  ;;  %v1931_v33 = vld [vmem:[#allocation2 + $0x2b] sm:$0xff] }
 0x416   : > { %v1856_v3 = vld [vmem:[#allocation2 + $0x1c] sm:$0xff]  ;;  %v1852_v9 = vmul.f32 %v3474_v4, %v1845_v53  ;;  %v1853_v10 = vmul.f32 %v3474_v4, %v1846_v63  ;;  %v1857_v11 = vld [vmem:[#allocation2 + $0x24] sm:$0xff]  ;;  %v1951_v41 = vld [vmem:[#allocation2 + $0x2d] sm:$0xff]  ;;  %v1937_v47 = vmul.f32 %v3482_v34, %v1846_v63 }
 0x417   : > { %v1867_v58 = vld [vmem:[#allocation2 + $0x1d] sm:$0xff]  ;;  %v1868_v12 = vld [vmem:[#allocation2 + $0x25] sm:$0xff]  ;;  %v1863_v21 = vmul.f32 %v3475_v54, %v1856_v3  ;;  %v1864_v35 = vmul.f32 %v3475_v54, %v1857_v11  ;;  %v3485_v4 = vld [vmem:[%s5196_s7 + $0xd] ss:$0 sm:$0xff]  ;;  %v1958_v52 = vmul.f32 %v3484_v42, %v1951_v41  ;;  %v1947_v3 = vmul.f32 %v3483_v45, %v1857_v11 }
 0x418   : > { %v1878_v59 = vld [vmem:[#allocation2 + $0x1e] sm:$0xff]  ;;  %v1874_v0 = vmul.f32 %v3476_v5, %v1867_v58  ;;  %v1879_v13 = vld [vmem:[#allocation2 + $0x26] sm:$0xff]  ;;  %v1875_v15 = vmul.f32 %v3476_v5, %v1868_v12  ;;  %v1957_v51 = vmul.f32 %v3484_v42, %v1868_v12  ;;  %v1971_v53 = vld [vmem:[#allocation2 + $0x2f] sm:$0xff] }
 0x419   : > { %v1824_v60 = vld [vmem:[#allocation2 + $0x21] sm:$0xff]  ;;  %v1885_v6 = vmul.f32 %v3477_v49, %v1878_v59  ;;  %v1886_v17 = vmul.f32 %v3477_v49, %v1879_v13  ;;  %v1911_v28 = vld [vmem:[#allocation2 + $0x29] sm:$0xff] }
 0x41a   : > { %v1835_v61 = vld [vmem:[#allocation2 + $0x22] sm:$0xff]  ;;  %v1831_v7 = vmul.f32 %v3472_v48, %v1824_v60  ;;  %v1876_v16 = vadd.f32 %v1874_v0, %v1830_v57  ;;  %v1917_v1 = vmul.f32 %v3480_v50, %v1824_v60  ;;  %v1921_v29 = vld [vmem:[#allocation2 + $0x2a] sm:$0xff]  ;;  %v1918_v32 = vmul.f32 %v3480_v50, %v1911_v28  ;;  %v3901_v28 = vld [vmem:[%s5119_s16 + $0x18] sm:$0xff]  }
 0x41b   : > { %v1842_v8 = vmul.f32 %v3473_v2, %v1835_v61  ;;  %v1889_v18 = vld [vmem:[#allocation2 + $0x1f] sm:$0xff]  ;;  %v1890_v19 = vld [vmem:[#allocation2 + $0x27] sm:$0xff]  ;;  %v1887_v23 = vadd.f32 %v1885_v6, %v1841_v62  ;;  %v1927_v39 = vmul.f32 %v3481_v14, %v1835_v61  ;;  %v1928_v44 = vmul.f32 %v3481_v14, %v1921_v29  ;;  %v3847_v14 = vpop.permute.xlu0 %3846 }
 0x41c   : > { %v1900_v20 = vld [vmem:[#allocation2 + $0x20] sm:$0xff]  ;;  %v1896_v22 = vmul.f32 %v3478_v55, %v1889_v18  ;;  %v1897_v24 = vmul.f32 %v3478_v55, %v1890_v19  ;;  %v1901_v26 = vld [vmem:[#allocation2 + $0x28] sm:$0xff]  ;;  %v1877_v30 = vadd.f32 %v1875_v15, %v1831_v7  ;;  %v1919_v43 = vadd.f32 %v1917_v1, %v1876_v16 }
 0x41d   : > { %v1907_v27 = vmul.f32 %v3479_v56, %v1900_v20  ;;  %v1888_v25 = vadd.f32 %v1886_v17, %v1842_v8  ;;  %v1908_v40 = vmul.f32 %v3479_v56, %v1901_v26  ;;  %v1938_v48 = vmul.f32 %v3482_v34, %v1931_v33  ;;  %v1961_v2 = vld [vmem:[#allocation2 + $0x2e] sm:$0xff]  ;;  %v3487_v29 = vld [vmem:[%s5117_s14] ss:$0 sm:$0xff]  ;;  %v3497_v41 = vld [vmem:[%s5118_s15 + $0x1] ss:$0 sm:$0xff] }
 0x41e   : > { %v1898_v36 = vadd.f32 %v1896_v22, %v1852_v9  ;;  %v1899_v38 = vadd.f32 %v1897_v24, %v1853_v10  ;;  %v1920_v37 = vadd.f32 %v1918_v32, %v1877_v30  ;;  %v1929_v5 = vadd.f32 %v1927_v39, %v1887_v23  ;;  %v1941_v50 = vld [vmem:[#allocation2 + $0x2c] sm:$0xff]  ;;  %v3898_v24 = vld [vmem:[%s5119_s16] sm:$0xff]  }
 0x41f   : > { %v1909_v46 = vadd.f32 %v1907_v27, %v1863_v21  ;;  %v1930_v49 = vadd.f32 %v1928_v44, %v1888_v25  ;;  %v3486_v54 = vld [vmem:[%s5196_s7 + $0xe] ss:$0 sm:$0xff]  ;;  %v1910_v55 = vadd.f32 %v1908_v40, %v1864_v35  ;;  %v1959_v58 = vadd.f32 %v1957_v51, %v1919_v43  ;;  %3714 = vmatpush3.bf16.msra.mxu1 %v3898_v24  ;;  %v3900_v27 = vld [vmem:[%s5119_s16 + $0x10] sm:$0xff]   ;;  %v3496_v40 = vld [vmem:[%s5118_s15] ss:$0 sm:$0xff] }
 0x420   : > { %v1939_v56 = vadd.f32 %v1937_v47, %v1898_v36  ;;  %v1940_v57 = vadd.f32 %v1938_v48, %v1899_v38  ;;  %v1960_v59 = vadd.f32 %v1958_v52, %v1920_v37  ;;  %v1967_v60 = vmul.f32 %v3485_v4, %v1879_v13  ;;  %v3899_v26 = vld [vmem:[%s5119_s16 + $0x8] sm:$0xff]   ;;  %3715 = vmatprep.subr.bf16.mxu1 %v4518_v31  ;;  %v3498_v42 = vld [vmem:[%s5118_s15 + $0x2] ss:$0 sm:$0xff]  ;;  %v3499_v43 = vld [vmem:[%s5118_s15 + $0x3] ss:$0 sm:$0xff] }
 0x421   : > { %v1968_v61 = vmul.f32 %v3485_v4, %v1961_v2  ;;  %v1948_v62 = vmul.f32 %v3483_v45, %v1941_v50  ;;  %v1977_v63 = vmul.f32 %v3486_v54, %v1890_v19  ;;  %v1978_v0 = vmul.f32 %v3486_v54, %v1971_v53  ;;  %v3500_v37 = vld [vmem:[%s5118_s15 + $0x4] ss:$0 sm:$0xff]  ;;  %v3501_v39 = vld [vmem:[%s5118_s15 + $0x5] ss:$0 sm:$0xff]  ;;  %v3504_v44 = vld [vmem:[%s5118_s15 + $0x8] ss:$0 sm:$0xff] }
 0x422   : > { %v1969_v6 = vadd.f32 %v1967_v60, %v1929_v5  ;;  %v1949_v8 = vadd.f32 %v1947_v3, %v1909_v46  ;;  %v3849_v20 = vunpack.i.h.bf16 %v3847_v14  ;;  %v3848_v11 = vunpack.i.l.bf16 %v3847_v14  ;;  %v3505_v45 = vld [vmem:[%s5118_s15 + $0x9] ss:$0 sm:$0xff]  ;;  %v3502_v4 = vld [vmem:[%s5118_s15 + $0x6] ss:$0 sm:$0xff]  ;;  %v3503_v5 = vld [vmem:[%s5118_s15 + $0x7] ss:$0 sm:$0xff] }
 0x423   : > { %v1970_v7 = vadd.f32 %v1968_v61, %v1930_v49  ;;  %v1950_v9 = vadd.f32 %v1948_v62, %v1910_v55  ;;  %v1979_v10 = vadd.f32 %v1977_v63, %v1939_v56  ;;  %v1980_v12 = vadd.f32 %v1978_v0, %v1940_v57  ;;  %3716 = vmatpush3.bf16.msra.mxu1 %v3899_v26 }
 0x424   : > { %v1981_v15 = vadd.f32 %v1969_v6, %v1959_v58  ;;  %3717 = vmatprep.subr.bf16.mxu1 %v4518_v31  ;;  %v2121_v47 = vmul.f32 %v4518_v31, %v3496_v40 }
 0x425   : > { %v1982_v16 = vadd.f32 %v1970_v7, %v1960_v59  ;;  %v1983_v17 = vadd.f32 %v1979_v10, %v1949_v8  ;;  %v1984_v18 = vadd.f32 %v1980_v12, %v1950_v9  ;;  %v3506_v9 = vld [vmem:[%s5118_s15 + $0xa] ss:$0 sm:$0xff] }
 0x427   : > { %v1985_v1 = vadd.f32 %v1983_v17, %v1981_v15  ;;  %v1986_v21 = vadd.f32 %v1984_v18, %v1982_v16  ;;  %3718 = vmatpush3.bf16.msra.mxu1 %v3900_v27 }
 0x428   : > { %3719 = vmatprep.subr.bf16.mxu1 %v4518_v31 }
 0x429   : > { %v1995_v13 = vsel %vm1261_vm2, %v1985_v1, %v3848_v11  ;;  %v1996_v19 = vsel %vm1261_vm2, %v1986_v21, %v3849_v20 }
 0x42a   : > { %v1997_v22 = vpack.c.bf16 %v1996_v19, %v1995_v13 }
 0x42b   : > { %3720 = vmatpush3.bf16.msra.mxu1 %v3901_v28 }
 0x42c   : > { %3710 = vmatmul.mubr.bf16.vlgmr.msra.gmra.mrb[8].mxu0 %v1997_v22  ;;  %3745 = vmatprep.subr.bf16.mxu1 %v4518_v31  ;;  %v3507_v22 = vld [vmem:[%s5118_s15 + $0xb] ss:$0 sm:$0xff] }
 0x42d   : > { %3741 = vmatprep.mubr.msk.bf16.mxu0 %vm3998_vm1, %v4518_v31 }
 0x4ff   : > { %v2103_v30 = vpop.f32.mrb[8].mxu0 }
 0x500   : > { %v2104_v23 = vadd.f32 %v3487_v29, %v2103_v30  ;;  %v3711_v25 = vpop.f32.mrb[9].mxu0 }
 0x501   : > { %v2106_v32 = vpop.f32.mrb[10].mxu0 }
 0x502   : > { %v2110_v33 = vmax.f32 %v2104_v23, 0.0  ;;  %v2107_v34 = vadd.f32 %v3487_v29, %v2106_v32  ;;  %v3712_v35 = vpop.f32.mrb[11].mxu0  ;;  %v3508_v23 = vld [vmem:[%s5118_s15 + $0xc] ss:$0 sm:$0xff] }
 0x504   : > { %2112 = vst.msk [vmem:[#allocation2 + $0x20] sm:$0xff] %vm1261_vm2, %v2110_v33  ;;  %v2111_v36 = vmax.f32 %v2107_v34, 0.0 }
 0x506   : > { %2113 = vst.msk [vmem:[#allocation2 + $0x28] sm:$0xff] %vm1261_vm2, %v2111_v36  ;;  %v3850_v38 = vpack.i.bf16 %v2111_v36, %v2110_v33  ;;  %v3512_v36 = vld [vmem:[%s5118_s15 + $0x10] ss:$0 sm:$0xff] }
 0x508   : > { %3851 = vrot.lane.b32.xlu1 %v3850_v38, %s5193_s29  ;;  %s3936_s29 = sshll.u32 %s4000_s10, 4  ;;  %s3937_s29 = int_to_ptr.vmem [resolvable:$false] %s3936_s29 }
 0x509   : > { %s3938_s11 = scalar_lea.vmem %s3937_s29, 32  ;;  %p3939_p0 = scmp.lt.s32.totalorder %s5063_s4, %s3937_s29 }
 0x50a   : > { %p3940_p1 = scmp.lt.s32.totalorder %s3938_s11, %s3932_s12 }
 0x50b   : > { %v2115_v46 = vld [vmem:[#allocation2 + $0x20] sm:$0xff] }
 0x50c   : > { %v2125_v48 = vld [vmem:[#allocation2 + $0x19] sm:$0xff]  ;;  %v2122_v49 = vmul.f32 %v3496_v40, %v2115_v46  ;;  %v2208_v60 = vmul.f32 %v3504_v44, %v2115_v46  ;;  %p3941_p2 = por %p3940_p1, %p3939_p0 }
 0x50d   : > { %v2136_v2 = vld [vmem:[#allocation2 + $0x1a] sm:$0xff]  ;;  %v2132_v50 = vmul.f32 %v3497_v41, %v2125_v48  ;;  %v2137_v56 = vld [vmem:[#allocation2 + $0x22] sm:$0xff]  ;;  %v2222_v29 = vld [vmem:[#allocation2 + $0x2a] sm:$0xff] }
 0x50e   : > { %v2143_v51 = vmul.f32 %v3498_v42, %v2136_v2  ;;  %v2147_v52 = vld [vmem:[#allocation2 + $0x1b] sm:$0xff]  ;;  %v2148_v57 = vld [vmem:[#allocation2 + $0x23] sm:$0xff]  ;;  %v2144_v62 = vmul.f32 %v3498_v42, %v2137_v56  ;;  %v2232_v30 = vld [vmem:[#allocation2 + $0x2b] sm:$0xff]  ;;  %v2289_v42 = vmul.f32 %v4518_v31, %v3512_v36  ;;  %p3942_p3 = pnand %p3941_p2, %p3935_p13 }
 0x50f   : > { %v2158_v53 = vld [vmem:[#allocation2 + $0x1c] sm:$0xff]  ;;  %v2154_v3 = vmul.f32 %v3499_v43, %v2147_v52  ;;  %v2155_v63 = vmul.f32 %v3499_v43, %v2148_v57  ;;  %v2159_v0 = vld [vmem:[#allocation2 + $0x24] sm:$0xff]  ;;  %v2242_v35 = vld [vmem:[#allocation2 + $0x2c] sm:$0xff]  ;;  %v2229_v43 = vmul.f32 %v3506_v9, %v2222_v29 }
 0x510   : > { %v2169_v54 = vld [vmem:[#allocation2 + $0x1d] sm:$0xff]  ;;  %v2165_v58 = vmul.f32 %v3500_v37, %v2158_v53  ;;  %v2170_v6 = vld [vmem:[#allocation2 + $0x25] sm:$0xff]  ;;  %v2166_v10 = vmul.f32 %v3500_v37, %v2159_v0  ;;  %v2238_v37 = vmul.f32 %v3507_v22, %v2148_v57  ;;  %v2252_v46 = vld [vmem:[#allocation2 + $0x2d] sm:$0xff] }
 0x511   : > { %v2126_v55 = vld [vmem:[#allocation2 + $0x21] sm:$0xff]  ;;  %v2176_v59 = vmul.f32 %v3501_v39, %v2169_v54  ;;  %v2177_v14 = vmul.f32 %v3501_v39, %v2170_v6  ;;  %v2212_v19 = vld [vmem:[#allocation2 + $0x29] sm:$0xff]  ;;  %v2239_v39 = vmul.f32 %v3507_v22, %v2232_v30 }
 0x512   : > { %v2133_v61 = vmul.f32 %v3497_v41, %v2126_v55  ;;  %v2180_v7 = vld [vmem:[#allocation2 + $0x1e] sm:$0xff]  ;;  %v2218_v8 = vmul.f32 %v3505_v45, %v2126_v55  ;;  %v2167_v12 = vadd.f32 %v2165_v58, %v2121_v47  ;;  %v2181_v16 = vld [vmem:[#allocation2 + $0x26] sm:$0xff]  ;;  %v2168_v24 = vadd.f32 %v2166_v10, %v2122_v49  ;;  %v3510_v48 = vld [vmem:[%s5118_s15 + $0xe] ss:$0 sm:$0xff] }
 0x513   : > { %v2178_v15 = vadd.f32 %v2176_v59, %v2132_v50  ;;  %v2191_v17 = vld [vmem:[#allocation2 + $0x1f] sm:$0xff]  ;;  %v2192_v18 = vld [vmem:[#allocation2 + $0x27] sm:$0xff]  ;;  %v2187_v20 = vmul.f32 %v3502_v4, %v2180_v7  ;;  %v2188_v11 = vmul.f32 %v3502_v4, %v2181_v16  ;;  %v2219_v40 = vmul.f32 %v3505_v45, %v2212_v19  ;;  %v2272_v50 = vld [vmem:[#allocation2 + $0x2f] sm:$0xff] }
 0x514   : > { %v2198_v1 = vmul.f32 %v3503_v5, %v2191_v17  ;;  %v2199_v21 = vmul.f32 %v3503_v5, %v2192_v18  ;;  %v2202_v13 = vld [vmem:[#allocation2 + $0x28] sm:$0xff]  ;;  %v2179_v26 = vadd.f32 %v2177_v14, %v2133_v61  ;;  %v2210_v28 = vadd.f32 %v2208_v60, %v2167_v12  ;;  %v3905_v19 = vld [vmem:[%s5122_s19 + $0x18] sm:$0xff]   ;;  %v3906_v22 = vld [vmem:[%s5122_s19 + $0x20] sm:$0xff]  }
 0x515   : > { %v2209_v27 = vmul.f32 %v3504_v44, %v2202_v13  ;;  %v2189_v25 = vadd.f32 %v2187_v20, %v2143_v51  ;;  %v2190_v32 = vadd.f32 %v2188_v11, %v2144_v62  ;;  %v2228_v41 = vmul.f32 %v3506_v9, %v2137_v56  ;;  %v3509_v47 = vld [vmem:[%s5118_s15 + $0xd] ss:$0 sm:$0xff]  ;;  %v2262_v49 = vld [vmem:[#allocation2 + $0x2e] sm:$0xff] }
 0x516   : > { %v2200_v33 = vadd.f32 %v2198_v1, %v2154_v3  ;;  %v2201_v34 = vadd.f32 %v2199_v21, %v2155_v63  ;;  %v2248_v44 = vmul.f32 %v3508_v23, %v2159_v0  ;;  %v2220_v2 = vadd.f32 %v2218_v8, %v2178_v15  ;;  %v3511_v51 = vld [vmem:[%s5118_s15 + $0xf] ss:$0 sm:$0xff] }
 0x517   : > { %v2211_v38 = vadd.f32 %v2209_v27, %v2168_v24  ;;  %v2221_v4 = vadd.f32 %v2219_v40, %v2179_v26  ;;  %v2230_v5 = vadd.f32 %v2228_v41, %v2189_v25  ;;  %v2249_v45 = vmul.f32 %v3508_v23, %v2242_v35  ;;  %v3907_v24 = vld [vmem:[%s5122_s19 + $0x28] sm:$0xff]   ;;  %v3908_v26 = vld [vmem:[%s5122_s19 + $0x30] sm:$0xff]   ;;  %v3909_v27 = vld [vmem:[%s5122_s19 + $0x38] sm:$0xff]  }
 0x518   : > { %v2231_v52 = vadd.f32 %v2229_v43, %v2190_v32  ;;  %v2240_v53 = vadd.f32 %v2238_v37, %v2200_v33  ;;  %v2241_v54 = vadd.f32 %v2239_v39, %v2201_v34  ;;  %v2250_v55 = vadd.f32 %v2248_v44, %v2210_v28  ;;  %v3513_v28 = vld [vmem:[%s5120_s17] ss:$0 sm:$0xff]  ;;  %v3521_v40 = vld [vmem:[%s5121_s18 + $0x2] ss:$0 sm:$0xff]  ;;  %v3522_v41 = vld [vmem:[%s5121_s18 + $0x3] ss:$0 sm:$0xff] }
 0x519   : > { %v2251_v56 = vadd.f32 %v2249_v45, %v2211_v38  ;;  %v2258_v57 = vmul.f32 %v3509_v47, %v2170_v6  ;;  %v2259_v3 = vmul.f32 %v3509_v47, %v2252_v46  ;;  %v2268_v58 = vmul.f32 %v3510_v48, %v2181_v16  ;;  %v3902_v16 = vld [vmem:[%s5122_s19] sm:$0xff]   ;;  %v3527_v37 = vld [vmem:[%s5121_s18 + $0x8] ss:$0 sm:$0xff]  ;;  %v3528_v39 = vld [vmem:[%s5121_s18 + $0x9] ss:$0 sm:$0xff] }
 0x51a   : > { %v2269_v59 = vmul.f32 %v3510_v48, %v2262_v49  ;;  %v2278_v60 = vmul.f32 %v3511_v51, %v2192_v18  ;;  %v2279_v61 = vmul.f32 %v3511_v51, %v2272_v50  ;;  %v2288_v62 = vmul.f32 %v3512_v36, %v2202_v13  ;;  %3726 = vmatpush3.bf16.msra.mxu0 %v3902_v16  ;;  %v3903_v18 = vld [vmem:[%s5122_s19 + $0x8] sm:$0xff]   ;;  %v3904_v13 = vld [vmem:[%s5122_s19 + $0x10] sm:$0xff]   ;;  %v3519_v36 = vld [vmem:[%s5121_s18] ss:$0 sm:$0xff] }
 0x51b   : > { %v2260_v63 = vadd.f32 %v2258_v57, %v2220_v2  ;;  %v2261_v0 = vadd.f32 %v2259_v3, %v2221_v4  ;;  %v2270_v7 = vadd.f32 %v2268_v58, %v2230_v5  ;;  %v2291_v8 = vadd.f32 %v2289_v42, %v2251_v56  ;;  %3727 = vmatprep.subr.bf16.mxu0 %v4518_v31  ;;  %v3520_v38 = vld [vmem:[%s5121_s18 + $0x1] ss:$0 sm:$0xff]  ;;  %v3523_v42 = vld [vmem:[%s5121_s18 + $0x4] ss:$0 sm:$0xff]  ;;  %v3524_v43 = vld [vmem:[%s5121_s18 + $0x5] ss:$0 sm:$0xff] }
 0x51c   : > { %v2271_v9 = vadd.f32 %v2269_v59, %v2231_v52  ;;  %v2280_v10 = vadd.f32 %v2278_v60, %v2240_v53  ;;  %v2281_v12 = vadd.f32 %v2279_v61, %v2241_v54  ;;  %v2290_v14 = vadd.f32 %v2288_v62, %v2250_v55  ;;  %v3525_v2 = vld [vmem:[%s5121_s18 + $0x6] ss:$0 sm:$0xff]  ;;  %v3526_v4 = vld [vmem:[%s5121_s18 + $0x7] ss:$0 sm:$0xff] }
 0x51d   : > { %v2293_v15 = vadd.f32 %v2291_v8, %v2261_v0  ;;  %v2393_v46 = vmul.f32 %v4518_v31, %v3519_v36  ;;  %v3529_v8 = vld [vmem:[%s5121_s18 + $0xa] ss:$0 sm:$0xff] }
 0x51e   : > { %v2292_v17 = vadd.f32 %v2290_v14, %v2260_v63  ;;  %v2294_v20 = vadd.f32 %v2280_v10, %v2270_v7  ;;  %v2295_v11 = vadd.f32 %v2281_v12, %v2271_v9  ;;  %3728 = vmatpush3.bf16.msra.mxu0 %v3903_v18 }
 0x51f   : > { %3729 = vmatprep.subr.bf16.mxu0 %v4518_v31 }
 0x520   : > { %v2296_v1 = vadd.f32 %v2294_v20, %v2292_v17  ;;  %v2297_v6 = vadd.f32 %v2295_v11, %v2293_v15 }
 0x522   : > { %v2298_v21 = vpack.c.bf16 %v2297_v6, %v2296_v1  ;;  %3730 = vmatpush3.bf16.msra.mxu0 %v3904_v13  ;;  %v3530_v13 = vld [vmem:[%s5121_s18 + $0xb] ss:$0 sm:$0xff] }
 0x523   : > { %3731 = vmatprep.subr.bf16.mxu0 %v4518_v31 }
 0x524   : > { %3722 = vmatmul.mubr.msk.bf16.vlgmr.msra.gmra.mrb[8].mxu1 %vm1261_vm2, %v2298_v21 }
 0x525   : > { %3753 = vmatprep.mubr.msk.bf16.mxu1 %vm3998_vm1, %v4518_v31 }
 0x526   : > { %3732 = vmatpush3.bf16.msra.mxu0 %v3905_v19 }
 0x527   : > { %3733 = vmatprep.subr.bf16.mxu0 %v4518_v31 }
 0x52a   : > { %3734 = vmatpush3.bf16.msra.mxu0 %v3906_v22 }
 0x52b   : > { %3735 = vmatprep.subr.bf16.mxu0 %v4518_v31 }
 0x52e   : > { %3736 = vmatpush3.bf16.msra.mxu0 %v3907_v24 }
 0x52f   : > { %3737 = vmatprep.subr.bf16.mxu0 %v4518_v31 }
 0x532   : > { %3738 = vmatpush3.bf16.msra.mxu0 %v3908_v26 }
 0x533   : > { %3739 = vmatprep.subr.bf16.mxu0 %v4518_v31 }
 0x536   : > { %3740 = vmatpush3.bf16.msra.mxu0 %v3909_v27 }
 0x537   : > { %3777 = vmatprep.subr.bf16.mxu0 %v4518_v31 }
 0x5f7   : > { %v2375_v29 = vpop.f32.mrb[8].mxu1 }
 0x5f8   : > { %v2376_v30 = vadd.f32 %v3513_v28, %v2375_v29  ;;  %v3723_v23 = vpop.f32.mrb[9].mxu1  ;;  %v3531_v29 = vld [vmem:[%s5121_s18 + $0xc] ss:$0 sm:$0xff] }
 0x5f9   : > { %v2378_v25 = vpop.f32.mrb[10].mxu1 }
 0x5fa   : > { %v2382_v32 = vmax.f32 %v2376_v30, 0.0  ;;  %v2379_v33 = vadd.f32 %v3513_v28, %v2378_v25  ;;  %v3724_v34 = vpop.f32.mrb[11].mxu1 }
 0x5fb   : > { %v3535_v34 = vld [vmem:[%s5121_s18 + $0x10] ss:$0 sm:$0xff] }
 0x5fc   : > { %2384 = vst.msk [vmem:[#allocation2 + $0x20] sm:$0xff] %vm1261_vm2, %v2382_v32  ;;  %v2383_v35 = vmax.f32 %v2379_v33, 0.0 }
 0x5fe   : > { %2385 = vst.msk [vmem:[#allocation2 + $0x28] sm:$0xff] %vm1261_vm2, %v2383_v35 }
 0x603   : > { %v2387_v44 = vld [vmem:[#allocation2 + $0x20] sm:$0xff] }
 0x604   : > { %v2397_v47 = vld [vmem:[#allocation2 + $0x19] sm:$0xff]  ;;  %v2394_v5 = vmul.f32 %v3519_v36, %v2387_v44  ;;  %v2480_v58 = vmul.f32 %v3527_v37, %v2387_v44 }
 0x605   : > { %v2408_v48 = vld [vmem:[#allocation2 + $0x1a] sm:$0xff]  ;;  %v2404_v45 = vmul.f32 %v3520_v38, %v2397_v47  ;;  %v2409_v54 = vld [vmem:[#allocation2 + $0x22] sm:$0xff]  ;;  %v2494_v27 = vld [vmem:[#allocation2 + $0x2a] sm:$0xff] }
 0x606   : > { %v2415_v49 = vmul.f32 %v3521_v40, %v2408_v48  ;;  %v2419_v50 = vld [vmem:[#allocation2 + $0x1b] sm:$0xff]  ;;  %v2420_v55 = vld [vmem:[#allocation2 + $0x23] sm:$0xff]  ;;  %v2416_v60 = vmul.f32 %v3521_v40, %v2409_v54  ;;  %v2504_v28 = vld [vmem:[#allocation2 + $0x2b] sm:$0xff]  ;;  %v2561_v40 = vmul.f32 %v4518_v31, %v3535_v34 }
 0x607   : > { %v2430_v51 = vld [vmem:[#allocation2 + $0x1c] sm:$0xff]  ;;  %v2426_v56 = vmul.f32 %v3522_v41, %v2419_v50  ;;  %v2427_v61 = vmul.f32 %v3522_v41, %v2420_v55  ;;  %v2431_v62 = vld [vmem:[#allocation2 + $0x24] sm:$0xff]  ;;  %v2514_v33 = vld [vmem:[#allocation2 + $0x2c] sm:$0xff]  ;;  %v2501_v41 = vmul.f32 %v3529_v8, %v2494_v27 }
 0x608   : > { %v2441_v52 = vld [vmem:[#allocation2 + $0x1d] sm:$0xff]  ;;  %v2437_v57 = vmul.f32 %v3523_v42, %v2430_v51  ;;  %v2442_v63 = vld [vmem:[#allocation2 + $0x25] sm:$0xff]  ;;  %v2438_v9 = vmul.f32 %v3523_v42, %v2431_v62  ;;  %v2510_v42 = vmul.f32 %v3530_v13, %v2420_v55  ;;  %v2524_v44 = vld [vmem:[#allocation2 + $0x2d] sm:$0xff] }
 0x609   : > { %v2398_v53 = vld [vmem:[#allocation2 + $0x21] sm:$0xff]  ;;  %v2448_v3 = vmul.f32 %v3524_v43, %v2441_v52  ;;  %v2449_v12 = vmul.f32 %v3524_v43, %v2442_v63  ;;  %v2484_v18 = vld [vmem:[#allocation2 + $0x29] sm:$0xff]  ;;  %v2511_v43 = vmul.f32 %v3530_v13, %v2504_v28 }
 0x60a   : > { %v2405_v59 = vmul.f32 %v3520_v38, %v2398_v53  ;;  %v2452_v0 = vld [vmem:[#allocation2 + $0x1e] sm:$0xff]  ;;  %v2490_v7 = vmul.f32 %v3528_v39, %v2398_v53  ;;  %v2439_v10 = vadd.f32 %v2437_v57, %v2393_v46  ;;  %v2453_v15 = vld [vmem:[#allocation2 + $0x26] sm:$0xff]  ;;  %v2440_v19 = vadd.f32 %v2438_v9, %v2394_v5  ;;  %v3533_v47 = vld [vmem:[%s5121_s18 + $0xe] ss:$0 sm:$0xff] }
 0x60b   : > { %v2450_v14 = vadd.f32 %v2448_v3, %v2404_v45  ;;  %v2463_v17 = vld [vmem:[#allocation2 + $0x1f] sm:$0xff]  ;;  %v2464_v20 = vld [vmem:[#allocation2 + $0x27] sm:$0xff]  ;;  %v2459_v11 = vmul.f32 %v3525_v2, %v2452_v0  ;;  %v2460_v1 = vmul.f32 %v3525_v2, %v2453_v15  ;;  %v2491_v36 = vmul.f32 %v3528_v39, %v2484_v18  ;;  %v2544_v45 = vld [vmem:[#allocation2 + $0x2f] sm:$0xff] }
 0x60c   : > { %v2470_v6 = vmul.f32 %v3526_v4, %v2463_v17  ;;  %v2471_v21 = vmul.f32 %v3526_v4, %v2464_v20  ;;  %v2474_v16 = vld [vmem:[#allocation2 + $0x28] sm:$0xff]  ;;  %v2451_v22 = vadd.f32 %v2449_v12, %v2405_v59  ;;  %v2482_v26 = vadd.f32 %v2480_v58, %v2439_v10 }
 0x60d   : > { %v2481_v24 = vmul.f32 %v3527_v37, %v2474_v16  ;;  %v2461_v30 = vadd.f32 %v2459_v11, %v2415_v49  ;;  %v2462_v23 = vadd.f32 %v2460_v1, %v2416_v60  ;;  %v2500_v38 = vmul.f32 %v3529_v8, %v2409_v54  ;;  %v3532_v46 = vld [vmem:[%s5121_s18 + $0xd] ss:$0 sm:$0xff]  ;;  %v2534_v5 = vld [vmem:[#allocation2 + $0x2e] sm:$0xff]  ;;  %v2697_v27 = vld [vmem:[#allocation2 + $0x4] sm:$0xff] }
 0x60e   : > { %v2472_v25 = vadd.f32 %v2470_v6, %v2426_v56  ;;  %v2473_v32 = vadd.f32 %v2471_v21, %v2427_v61  ;;  %v2520_v37 = vmul.f32 %v3531_v29, %v2431_v62  ;;  %v2492_v48 = vadd.f32 %v2490_v7, %v2450_v14  ;;  %v3534_v49 = vld [vmem:[%s5121_s18 + $0xf] ss:$0 sm:$0xff]  ;;  %v3852_v14 = vpop.permute.xlu1 %3851 }
 0x60f   : > { %v2483_v35 = vadd.f32 %v2481_v24, %v2440_v19  ;;  %v2493_v2 = vadd.f32 %v2491_v36, %v2451_v22  ;;  %v2502_v4 = vadd.f32 %v2500_v38, %v2461_v30  ;;  %v2521_v39 = vmul.f32 %v3531_v29, %v2514_v33  ;;  %v3910_v19 = vld [vmem:[%s5125_s22] sm:$0xff]   ;;  %v3911_v22 = vld [vmem:[%s5125_s22 + $0x8] sm:$0xff]   ;;  %v3912_v24 = vld [vmem:[%s5125_s22 + $0x10] sm:$0xff]  }
 0x610   : > { %v2503_v50 = vadd.f32 %v2501_v41, %v2462_v23  ;;  %v2512_v51 = vadd.f32 %v2510_v42, %v2472_v25  ;;  %v2513_v52 = vadd.f32 %v2511_v43, %v2473_v32  ;;  %v2522_v53 = vadd.f32 %v2520_v37, %v2482_v26  ;;  %3746 = vmatpush3.bf16.msra.mxu1 %v3910_v19  ;;  %v3913_v26 = vld [vmem:[%s5125_s22 + $0x18] sm:$0xff]   ;;  %v2698_v28 = vld [vmem:[#allocation2 + $0xc] sm:$0xff]  ;;  %v3545_v29 = vld [vmem:[%s5124_s21] ss:$0 sm:$0xff] }
 0x611   : > { %v2523_v54 = vadd.f32 %v2521_v39, %v2483_v35  ;;  %v2530_v55 = vmul.f32 %v3532_v46, %v2442_v63  ;;  %v2531_v56 = vmul.f32 %v3532_v46, %v2524_v44  ;;  %v2540_v57 = vmul.f32 %v3533_v47, %v2453_v15  ;;  %3747 = vmatprep.subr.bf16.mxu1 %v4518_v31  ;;  %v2708_v30 = vld [vmem:[#allocation2 + $0x6] sm:$0xff]  ;;  %v2709_v23 = vld [vmem:[#allocation2 + $0xe] sm:$0xff]  ;;  %v3546_v25 = vld [vmem:[%s5124_s21 + $0x1] ss:$0 sm:$0xff] }
 0x612   : > { %v2541_v3 = vmul.f32 %v3533_v47, %v2534_v5  ;;  %v2550_v58 = vmul.f32 %v3534_v49, %v2464_v20  ;;  %v2551_v59 = vmul.f32 %v3534_v49, %v2544_v45  ;;  %v2560_v60 = vmul.f32 %v3535_v34, %v2474_v16  ;;  %v3549_v32 = vld [vmem:[%s5124_s21 + $0x4] ss:$0 sm:$0xff]  ;;  %v3550_v33 = vld [vmem:[%s5124_s21 + $0x5] ss:$0 sm:$0xff]  ;;  %v3536_v34 = vld [vmem:[%s5123_s20] ss:$0 sm:$0xff] }
 0x613   : > { %v2532_v61 = vadd.f32 %v2530_v55, %v2492_v48  ;;  %v2533_v62 = vadd.f32 %v2531_v56, %v2493_v2  ;;  %v2542_v0 = vadd.f32 %v2540_v57, %v2502_v4  ;;  %v2563_v7 = vadd.f32 %v2561_v40, %v2523_v54  ;;  %v3547_v35 = vld [vmem:[%s5124_s21 + $0x2] ss:$0 sm:$0xff]  ;;  %v3551_v36 = vld [vmem:[%s5124_s21 + $0x6] ss:$0 sm:$0xff]  ;;  %v2730_v38 = vld [vmem:[#allocation2 + $0xa] sm:$0xff] }
 0x614   : > { %v2543_v8 = vadd.f32 %v2541_v3, %v2503_v50  ;;  %v2552_v9 = vadd.f32 %v2550_v58, %v2512_v51  ;;  %v2553_v10 = vadd.f32 %v2551_v59, %v2513_v52  ;;  %v2562_v12 = vadd.f32 %v2560_v60, %v2522_v53  ;;  %3748 = vmatpush3.bf16.msra.mxu1 %v3911_v22  ;;  %v2731_v40 = vld [vmem:[#allocation2 + $0x12] sm:$0xff]  ;;  %v3548_v41 = vld [vmem:[%s5124_s21 + $0x3] ss:$0 sm:$0xff]  ;;  %v4820_v48 = vld [vmem:[%s5124_s21 + $0x7] ss:$0 sm:$0xff] }
 0x615   : > { %v2565_v17 = vadd.f32 %v2563_v7, %v2533_v62  ;;  %v3854_v63 = vunpack.i.h.bf16 %v3852_v14  ;;  %v3853_v21 = vunpack.i.l.bf16 %v3852_v14  ;;  %3749 = vmatprep.subr.bf16.mxu1 %v4518_v31  ;;  %v2704_v42 = vmul.f32 %v3545_v29, %v2697_v27  ;;  %v2741_v37 = vld [vmem:[#allocation2 + $0x14] sm:$0xff]  ;;  %v4827_v5 = vld [vmem:[%s5124_s21 + $0x8] ss:$0 sm:$0xff]  ;;  %v4832_v52 = vld [vmem:[%s5124_s21 + $0x9] ss:$0 sm:$0xff] }
 0x616   : > { %v2564_v11 = vadd.f32 %v2562_v12, %v2532_v61  ;;  %v2566_v1 = vadd.f32 %v2552_v9, %v2542_v0  ;;  %v2567_v6 = vadd.f32 %v2553_v10, %v2543_v8  ;;  %v2715_v43 = vmul.f32 %v3546_v25, %v2708_v30  ;;  %v2751_v46 = vld [vmem:[#allocation2 + $0x16] sm:$0xff]  ;;  %v4837_v53 = vld [vmem:[%s5124_s21 + $0xa] ss:$0 sm:$0xff]  ;;  %v2951_v30 = vld [vmem:[#allocation2 + $0x3e] sm:$0xff] }
 0x617   : > { %v2747_v44 = vmul.f32 %v3549_v32, %v2698_v28  ;;  %v2757_v47 = vmul.f32 %v3550_v33, %v2709_v23  ;;  %v2726_v4 = vmul.f32 %v4518_v31, %v3547_v35  ;;  %v2767_v39 = vmul.f32 %v4518_v31, %v3551_v36  ;;  %v2891_v12 = vld [vmem:[#allocation2 + $0x32] sm:$0xff]  ;;  %v2941_v19 = vld [vmem:[#allocation2 + $0x3c] sm:$0xff]  ;;  %v3572_v36 = vld [vmem:[%s5124_s21 + $0x1b] ss:$0 sm:$0xff] }
 0x618   : > { %v2568_v15 = vadd.f32 %v2566_v1, %v2564_v11  ;;  %v2569_v18 = vadd.f32 %v2567_v6, %v2565_v17  ;;  %3750 = vmatpush3.bf16.msra.mxu1 %v3912_v24  ;;  %v2705_v50 = vmul.f32 %v3545_v29, %v2698_v28  ;;  %v2716_v51 = vmul.f32 %v3546_v25, %v2709_v23  ;;  %v2901_v14 = vld [vmem:[#allocation2 + $0x34] sm:$0xff]  ;;  %v4853_v11 = vld [vmem:[%s5124_s21 + $0x12] ss:$0 sm:$0xff]  ;;  %v4858_v1 = vld [vmem:[%s5124_s21 + $0x13] ss:$0 sm:$0xff] }
 0x619   : > { %3751 = vmatprep.subr.bf16.mxu1 %v4518_v31  ;;  %v2737_v55 = vmul.f32 %v3548_v41, %v2730_v38  ;;  %v2748_v56 = vmul.f32 %v3549_v32, %v2741_v37  ;;  %v2758_v57 = vmul.f32 %v3550_v33, %v2751_v46  ;;  %v2777_v3 = vmul.f32 %v4820_v48, %v2731_v40  ;;  %v3567_v17 = vld [vmem:[%s5124_s21 + $0x16] ss:$0 sm:$0xff]  ;;  %v4863_v6 = vld [vmem:[%s5124_s21 + $0x14] ss:$0 sm:$0xff]  ;;  %v3569_v22 = vld [vmem:[%s5124_s21 + $0x18] ss:$0 sm:$0xff] }
 0x61a   : > { %v2578_v20 = vsel %vm1261_vm2, %v2568_v15, %v3853_v21  ;;  %v2579_v16 = vsel %vm1261_vm2, %v2569_v18, %v3854_v63  ;;  %v2749_v61 = vadd.f32 %v2747_v44, %v2704_v42  ;;  %v2759_v62 = vadd.f32 %v2757_v47, %v2715_v43  ;;  %v2911_v63 = vld [vmem:[#allocation2 + $0x36] sm:$0xff]  ;;  %v2971_v25 = vld [vmem:[#allocation2 + $0x42] sm:$0xff]  ;;  %v3557_v44 = vld [vmem:[%s5124_s21 + $0xc] ss:$0 sm:$0xff] }
 0x61b   : > { %v2580_v13 = vpack.c.bf16 %v2579_v16, %v2578_v20  ;;  %v4840_v0 = vadd.f32 %v2767_v39, %v2726_v4  ;;  %v2787_v7 = vmul.f32 %v4827_v5, %v2741_v37  ;;  %v2797_v8 = vmul.f32 %v4832_v52, %v2751_v46  ;;  %v2931_v21 = vld [vmem:[#allocation2 + $0x3a] sm:$0xff]  ;;  %v3568_v15 = vld [vmem:[%s5124_s21 + $0x17] ss:$0 sm:$0xff]  ;;  %v3570_v24 = vld [vmem:[%s5124_s21 + $0x19] ss:$0 sm:$0xff] }
 0x61c   : > { %3752 = vmatpush3.bf16.msra.mxu1 %v3913_v26  ;;  %v2807_v9 = vmul.f32 %v4518_v31, %v4837_v53  ;;  %v2738_v18 = vmul.f32 %v3548_v41, %v2731_v40  ;;  %v2750_v20 = vadd.f32 %v2748_v56, %v2705_v50  ;;  %v2760_v16 = vadd.f32 %v2758_v57, %v2716_v51  ;;  %v3571_v23 = vld [vmem:[%s5124_s21 + $0x1a] ss:$0 sm:$0xff]  ;;  %v2981_v38 = vld [vmem:[#allocation2 + $0x44] sm:$0xff]  ;;  %v3573_v40 = vld [vmem:[%s5124_s21 + $0x1c] ss:$0 sm:$0xff] }
 0x61d   : > { %3742 = vmatmul.mubr.bf16.vlgmr.msra.gmra.mrb[12].mxu0 %v2580_v13  ;;  %3757 = vmatprep.subr.bf16.mxu1 %v4518_v31  ;;  %v4872_v13 = vld [vmem:[%s5124_s21 + $0x15] ss:$0 sm:$0xff]  ;;  %v2779_v26 = vadd.f32 %v2777_v3, %v2737_v55  ;;  %v2789_v27 = vadd.f32 %v2787_v7, %v2749_v61  ;;  %v2799_v28 = vadd.f32 %v2797_v8, %v2759_v62  ;;  %v3556_v41 = vld [vmem:[%s5124_s21 + $0xb] ss:$0 sm:$0xff]  ;;  %v3558_v46 = vld [vmem:[%s5124_s21 + $0xd] ss:$0 sm:$0xff] }
 0x61e   : > { %3793 = vmatprep.mubr.msk.bf16.mxu0 %vm3998_vm1, %v4518_v31  ;;  %v4881_v29 = vadd.f32 %v2807_v9, %v4840_v0  ;;  %v4888_v32 = vmul.f32 %v4518_v31, %v4853_v11  ;;  %v4891_v33 = vmul.f32 %v4858_v1, %v2891_v12  ;;  %v4897_v35 = vmul.f32 %v4518_v31, %v3567_v17  ;;  %v3559_v47 = vld [vmem:[%s5124_s21 + $0xe] ss:$0 sm:$0xff] }
 0x61f   : > { %v4909_v42 = vmul.f32 %v4872_v13, %v2911_v63  ;;  %v4911_v43 = vmul.f32 %v3568_v15, %v2891_v12  ;;  %v4913_v31 = vmul.f32 %v3568_v15, %v2931_v21  ;;  %v4915_v37 = vmul.f32 %v3569_v22, %v2901_v14 }
 0x620   : > { %v4928_v4 = vmul.f32 %v3570_v24, %v2911_v63  ;;  %v4930_v39 = vmul.f32 %v3570_v24, %v2951_v30  ;;  %v4937_v55 = vmul.f32 %v3572_v36, %v2931_v21  ;;  %v4939_v56 = vmul.f32 %v3572_v36, %v2971_v25  ;;  %v3561_v25 = vld [vmem:[%s5124_s21 + $0x10] ss:$0 sm:$0xff] }
 0x621   : > { %v4941_v57 = vmul.f32 %v3573_v40, %v2941_v19  ;;  %v4943_v3 = vmul.f32 %v3573_v40, %v2981_v38  ;;  %v3562_v40 = vld [vmem:[%s5124_s21 + $0x11] ss:$0 sm:$0xff] }
 0x6f0   : > { %v2686_v2 = vpop.f32.mrb[12].mxu0 }
 0x6f1   : > { %v2687_v45 = vadd.f32 %v3536_v34, %v2686_v2  ;;  %v3743_v49 = vpop.f32.mrb[13].mxu0  ;;  %v4926_v2 = vmul.f32 %v3569_v22, %v2941_v19 }
 0x6f2   : > { %v2689_v54 = vpop.f32.mrb[14].mxu0 }
 0x6f3   : > { %v2693_v58 = vmax.f32 %v2687_v45, 0.0  ;;  %v2690_v59 = vadd.f32 %v3536_v34, %v2689_v54  ;;  %v3744_v60 = vpop.f32.mrb[15].mxu0  ;;  %v4894_v34 = vmul.f32 %v4863_v6, %v2901_v14  ;;  %v4932_v45 = vld [vmem:[#allocation2] sm:$0xff] }
 0x6f4   : > { %v4935_v49 = vmul.f32 %v4932_v45, %v3571_v23 }
 0x6f5   : > { %2695 = vst.msk [vmem:[#allocation2 + $0x20] sm:$0xff] %vm1261_vm2, %v2693_v58  ;;  %v2694_v10 = vmax.f32 %v2690_v59, 0.0 }
 0x6f7   : > { %2696 = vst.msk [vmem:[#allocation2 + $0x28] sm:$0xff] %vm1261_vm2, %v2694_v10 }
 0x6fc   : > { %v2771_v50 = vld [vmem:[#allocation2 + $0x1a] sm:$0xff] }
 0x6fd   : > { %v2781_v51 = vld [vmem:[#allocation2 + $0x1c] sm:$0xff]  ;;  %v2778_v58 = vmul.f32 %v4820_v48, %v2771_v50  ;;  %v2817_v62 = vmul.f32 %v3556_v41, %v2771_v50 }
 0x6fe   : > { %v2791_v54 = vld [vmem:[#allocation2 + $0x1e] sm:$0xff]  ;;  %v2788_v59 = vmul.f32 %v4827_v5, %v2781_v51  ;;  %v2827_v10 = vmul.f32 %v3557_v44, %v2781_v51  ;;  %v2831_v12 = vld [vmem:[#allocation2 + $0x26] sm:$0xff]  ;;  %v3560_v5 = vld [vmem:[%s5124_s21 + $0xf] ss:$0 sm:$0xff] }
 0x6ff   : > { %v2798_v60 = vmul.f32 %v4832_v52, %v2791_v54  ;;  %v2801_v61 = vld [vmem:[#allocation2 + $0x20] sm:$0xff]  ;;  %v2837_v14 = vmul.f32 %v3558_v46, %v2791_v54  ;;  %v2780_v63 = vadd.f32 %v2778_v58, %v2738_v18  ;;  %v2841_v22 = vld [vmem:[#allocation2 + $0x28] sm:$0xff]  ;;  %v2819_v24 = vadd.f32 %v2817_v62, %v2779_v26 }
 0x700   : > { %v2808_v7 = vmul.f32 %v4837_v53, %v2801_v61  ;;  %v2811_v8 = vld [vmem:[#allocation2 + $0x22] sm:$0xff]  ;;  %v2847_v17 = vmul.f32 %v3559_v47, %v2801_v61  ;;  %v2790_v21 = vadd.f32 %v2788_v59, %v2750_v20  ;;  %v2851_v48 = vld [vmem:[#allocation2 + $0x2a] sm:$0xff]  ;;  %v2829_v30 = vadd.f32 %v2827_v10, %v2789_v27 }
 0x701   : > { %v2821_v9 = vld [vmem:[#allocation2 + $0x24] sm:$0xff]  ;;  %v2800_v15 = vadd.f32 %v2798_v60, %v2760_v16  ;;  %v2818_v19 = vmul.f32 %v3556_v41, %v2811_v8  ;;  %v2861_v23 = vld [vmem:[#allocation2 + $0x2c] sm:$0xff]  ;;  %v2838_v20 = vmul.f32 %v3558_v46, %v2831_v12  ;;  %v2839_v16 = vadd.f32 %v2837_v14, %v2799_v28 }
 0x702   : > { %v2810_v52 = vadd.f32 %v2808_v7, %v4840_v0  ;;  %v2828_v53 = vmul.f32 %v3557_v44, %v2821_v9  ;;  %v2848_v36 = vmul.f32 %v3559_v47, %v2841_v22  ;;  %v2871_v38 = vld [vmem:[#allocation2 + $0x2e] sm:$0xff]  ;;  %v2849_v0 = vadd.f32 %v2847_v17, %v4881_v29 }
 0x703   : > { %v2820_v18 = vadd.f32 %v2818_v19, %v2780_v63  ;;  %v2857_v26 = vmul.f32 %v3560_v5, %v2811_v8  ;;  %v2858_v44 = vmul.f32 %v3560_v5, %v2851_v48  ;;  %v2840_v27 = vadd.f32 %v2838_v20, %v2800_v15  ;;  %v3923_v20 = vld [vmem:[%s5129_s26 + $0x8] sm:$0xff]  }
 0x704   : > { %v2830_v41 = vadd.f32 %v2828_v53, %v2790_v21  ;;  %v2850_v50 = vadd.f32 %v2848_v36, %v2810_v52  ;;  %v2867_v51 = vmul.f32 %v3561_v25, %v2821_v9  ;;  %v2868_v54 = vmul.f32 %v3561_v25, %v2861_v23  ;;  %v3921_v25 = vld [vmem:[%s5127_s24 + $0x38] sm:$0xff]  }
 0x705   : > { %v2859_v58 = vadd.f32 %v2857_v26, %v2819_v24  ;;  %v2860_v59 = vadd.f32 %v2858_v44, %v2820_v18  ;;  %v2877_v60 = vmul.f32 %v3562_v40, %v2831_v12  ;;  %v2878_v46 = vmul.f32 %v3562_v40, %v2871_v38  ;;  %v3922_v18 = vld [vmem:[%s5129_s26] sm:$0xff]  }
 0x706   : > { %v2869_v28 = vadd.f32 %v2867_v51, %v2829_v30  ;;  %v2870_v47 = vadd.f32 %v2868_v54, %v2830_v41  ;;  %v2887_v61 = vmul.f32 %v4853_v11, %v2841_v22  ;;  %v2890_v62 = vadd.f32 %v4888_v32, %v2850_v50  ;;  %3778 = vmatpush3.bf16.msra.mxu0 %v3922_v18  ;;  %v3924_v51 = vld [vmem:[%s5129_s26 + $0x10] sm:$0xff]   ;;  %v3925_v54 = vld [vmem:[%s5129_s26 + $0x18] sm:$0xff]  }
 0x707   : > { %v2879_v7 = vadd.f32 %v2877_v60, %v2839_v16  ;;  %v2880_v10 = vadd.f32 %v2878_v46, %v2840_v27  ;;  %v2897_v29 = vmul.f32 %v4858_v1, %v2851_v48  ;;  %v2900_v8 = vadd.f32 %v4891_v33, %v2860_v59  ;;  %3779 = vmatprep.subr.bf16.mxu0 %v4932_v45  ;;  %v3574_v16 = vld [vmem:[%s5126_s23] ss:$0 sm:$0xff]  ;;  %v3927_v59 = vld [vmem:[%s5129_s26 + $0x28] sm:$0xff]   ;;  %v3928_v60 = vld [vmem:[%s5129_s26 + $0x30] sm:$0xff]  }
 0x708   : > { %v2889_v14 = vadd.f32 %v2887_v61, %v2849_v0  ;;  %v2907_v9 = vmul.f32 %v4863_v6, %v2861_v23  ;;  %v2910_v17 = vadd.f32 %v4894_v34, %v2870_v47  ;;  %v2917_v12 = vmul.f32 %v4872_v13, %v2871_v38  ;;  %v3920_v23 = vld [vmem:[%s5127_s24 + $0x30] sm:$0xff]   ;;  %v3929_v46 = vld [vmem:[%s5129_s26 + $0x38] sm:$0xff]  }
 0x709   : > { %v2899_v63 = vadd.f32 %v2897_v29, %v2859_v58  ;;  %v2920_v21 = vadd.f32 %v4909_v42, %v2880_v10  ;;  %v2930_v11 = vadd.f32 %v4897_v35, %v2890_v62  ;;  %v2940_v32 = vadd.f32 %v4913_v31, %v2900_v8  ;;  %v3926_v58 = vld [vmem:[%s5129_s26 + $0x20] sm:$0xff]  }
 0x70a   : > { %v2909_v15 = vadd.f32 %v2907_v9, %v2869_v28  ;;  %v2919_v19 = vadd.f32 %v2917_v12, %v2879_v7  ;;  %v2929_v1 = vadd.f32 %v4897_v35, %v2889_v14  ;;  %v2950_v33 = vadd.f32 %v4926_v2, %v2910_v17  ;;  %3780 = vmatpush3.bf16.msra.mxu0 %v3923_v20  ;;  %v3580_v28 = vld [vmem:[%s5128_s25] ss:$0 sm:$0xff] }
 0x70b   : > { %v2939_v22 = vadd.f32 %v4911_v43, %v2899_v63  ;;  %v2970_v6 = vadd.f32 %v4935_v49, %v2930_v11  ;;  %v2980_v34 = vadd.f32 %v4939_v56, %v2940_v32  ;;  %v2960_v42 = vadd.f32 %v4930_v39, %v2920_v21  ;;  %3781 = vmatprep.subr.bf16.mxu0 %v4932_v45 }
 0x70c   : > { %v2949_v13 = vadd.f32 %v4915_v37, %v2909_v15  ;;  %v2990_v48 = vadd.f32 %v4943_v3, %v2950_v33  ;;  %v2969_v31 = vadd.f32 %v4935_v49, %v2929_v1  ;;  %v2959_v35 = vadd.f32 %v4928_v4, %v2919_v19  ;;  %v3914_v37 = vld [vmem:[%s5127_s24] sm:$0xff]   ;;  %v3915_v49 = vld [vmem:[%s5127_s24 + $0x8] sm:$0xff]   ;;  %v3916_v4 = vld [vmem:[%s5127_s24 + $0x10] sm:$0xff]  }
 0x70d   : > { %v2979_v5 = vadd.f32 %v4937_v55, %v2939_v22  ;;  %v2994_v52 = vadd.f32 %v2980_v34, %v2970_v6  ;;  %v3917_v55 = vld [vmem:[%s5127_s24 + $0x18] sm:$0xff]   ;;  %v3919_v3 = vld [vmem:[%s5127_s24 + $0x28] sm:$0xff]   ;;  %v3224_v19 = vld [vmem:[%s5130_s27] sm:$0x1] }
 0x70e   : > { %v2989_v2 = vadd.f32 %v4941_v57, %v2949_v13  ;;  %v2992_v43 = vadd.f32 %v2990_v48, %v2960_v42  ;;  %v3918_v57 = vld [vmem:[%s5127_s24 + $0x20] sm:$0xff]   ;;  %3782 = vmatpush3.bf16.msra.mxu0 %v3924_v51 }
 0x70f   : > { %v2993_v24 = vadd.f32 %v2979_v5, %v2969_v31  ;;  %3783 = vmatprep.subr.bf16.mxu0 %v4932_v45 }
 0x710   : > { %v2991_v53 = vadd.f32 %v2989_v2, %v2959_v35  ;;  %v2996_v30 = vadd.f32 %v2994_v52, %v2992_v43 }
 0x712   : > { %v2995_v56 = vadd.f32 %v2993_v24, %v2991_v53  ;;  %3784 = vmatpush3.bf16.msra.mxu0 %v3925_v54 }
 0x713   : > { %3785 = vmatprep.subr.bf16.mxu0 %v4932_v45 }
 0x714   : > { %v2997_v39 = vpack.c.bf16 %v2996_v30, %v2995_v56 }
 0x716   : > { %3754 = vmatmul.mubr.msk.bf16.vlgmr.msra.gmra.mrb[12].mxu1 %vm1261_vm2, %v2997_v39  ;;  %3786 = vmatpush3.bf16.msra.mxu0 %v3926_v58 }
 0x717   : > { %3758 = vmatpush3.bf16.msra.mxu1 %v3914_v37  ;;  %3773 = vmatprep.mubr.msk.bf16.mxu1 %vm3998_vm1, %v4932_v45 }
 0x718   : > { %3759 = vmatprep.subr.bf16.mxu1 %v4932_v45  ;;  %3787 = vmatprep.subr.bf16.mxu0 %v4932_v45 }
 0x71a   : > { %3788 = vmatpush3.bf16.msra.mxu0 %v3927_v59 }
 0x71b   : > { %3760 = vmatpush3.bf16.msra.mxu1 %v3915_v49  ;;  %3789 = vmatprep.subr.bf16.mxu0 %v4932_v45 }
 0x71c   : > { %3761 = vmatprep.subr.bf16.mxu1 %v4932_v45 }
 0x71e   : > { %3790 = vmatpush3.bf16.msra.mxu0 %v3928_v60 }
 0x71f   : > { %3762 = vmatpush3.bf16.msra.mxu1 %v3916_v4  ;;  %3791 = vmatprep.subr.bf16.mxu0 %v4932_v45 }
 0x720   : > { %3763 = vmatprep.subr.bf16.mxu1 %v4932_v45 }
 0x722   : > { %3792 = vmatpush3.bf16.msra.mxu0 %v3929_v46 }
 0x723   : > { %3764 = vmatpush3.bf16.msra.mxu1 %v3917_v55 }
 0x724   : > { %3765 = vmatprep.subr.bf16.mxu1 %v4932_v45 }
 0x727   : > { %3766 = vmatpush3.bf16.msra.mxu1 %v3918_v57 }
 0x728   : > { %3767 = vmatprep.subr.bf16.mxu1 %v4932_v45 }
 0x72b   : > { %3768 = vmatpush3.bf16.msra.mxu1 %v3919_v3 }
 0x72c   : > { %3769 = vmatprep.subr.bf16.mxu1 %v4932_v45 }
 0x72f   : > { %3770 = vmatpush3.bf16.msra.mxu1 %v3920_v23 }
 0x730   : > { %3771 = vmatprep.subr.bf16.mxu1 %v4932_v45 }
 0x733   : > { %3772 = vmatpush3.bf16.msra.mxu1 %v3921_v25 }
 0x7e9   : > { %v3074_v36 = vpop.f32.mrb[12].mxu1 }
 0x7ea   : > { %v3075_v38 = vadd.f32 %v3574_v16, %v3074_v36  ;;  %v3755_v40 = vpop.f32.mrb[13].mxu1 }
 0x7eb   : > { %v3077_v41 = vpop.f32.mrb[14].mxu1 }
 0x7ec   : > { %v3078_v0 = vadd.f32 %v3574_v16, %v3077_v41  ;;  %v3756_v26 = vpop.f32.mrb[15].mxu1  ;;  %v3081_v44 = vmax.f32 %v3075_v38, 0.0 }
 0x7ee   : > { %v3082_v27 = vmax.f32 %v3078_v0, 0.0 }
 0x7f0   : > { %v3083_v50 = vpack.c.bf16 %v3082_v27, %v3081_v44 }
 0x7f2   : > { %3774 = vmatmul.mubr.bf16.vlgmr.msra.gmra.mrb[16].mxu1 %v3083_v50 }
 0x8c5   : > { %v3189_v47 = vpop.f32.mrb[16].mxu1 }
 0x8c6   : > { %v3190_v61 = vadd.f32 %v3580_v28, %v3189_v47  ;;  %v3775_v62 = vpop.f32.mrb[17].mxu1 }
 0x8c7   : > { %v3192_v7 = vpop.f32.mrb[18].mxu1 }
 0x8c8   : > { %v3193_v10 = vadd.f32 %v3580_v28, %v3192_v7  ;;  %v3776_v29 = vpop.f32.mrb[19].mxu1  ;;  %v3196_v8 = vmax.f32 %v3190_v61, 0.0 }
 0x8ca   : > { %v3197_v14 = vmax.f32 %v3193_v10, 0.0 }
 0x8cc   : > { %v3198_v9 = vadd.f32 %v3197_v14, %v3196_v8 }
 0x8ce   : > { %v3199_v17 = vrot.slane %v3198_v9, 4 }
 0x8d0   : > { %v3200_v12 = vadd.f32 %v3199_v17, %v3198_v9 }
 0x8d2   : > { %v3201_v63 = vrot.slane %v3200_v12, 2 }
 0x8d4   : > { %v3202_v45 = vadd.f32 %v3201_v63, %v3200_v12 }
 0x8d6   : > { %v3203_v21 = vrot.slane %v3202_v45, 1 }
 0x8d8   : > { %v3204_v11 = vadd.f32 %v3203_v21, %v3202_v45 }
 0x8da   : > { %v3206_v32 = vmul.f32 0.0625, %v3204_v11 }
 0x8dc   : > { %v3207_v15 = vpack.c.bf16 %v3206_v32, %v3206_v32 }
 0x8de   : > { %3794 = vmatmul.mubr.bf16.vlgmr.msra.gmra.mrb[16].mxu0 %v3207_v15 }
 0x9b1   : > { %v3307_v1 = vpop.f32.mrb[16].mxu0 }
 0x9b2   : > { %v3308_v33 = vadd.f32 %v3307_v1, %v3224_v19  ;;  %v3795_v22 = vpop.f32.mrb[17].mxu0 }
 0x9b3   : > { %v3310_v6 = vpop.f32.mrb[18].mxu0 }
 0x9b4   : > { %v3796_v34 = vpop.f32.mrb[19].mxu0  ;;  %3314 = vst.msk [vmem:[%s837_s28] sm:$0x1] %vm3313_vm3, %v3308_v33 }
 0x9b5   : > { %3945 = shalt.err (!%p3942_p3)
}
 0x9b6   : > { %s3946_s6 = scalar_lea.hbm %s5061_s30, 16  ;;  %s3950_s1 = scalar_lea.hbm %s5199_s2, 32 }
 0x9b7   : > { %p3947_p4 = scmp.ne.s32.totalorder %s5061_s30, %s3946_s6  ;;  %p3951_p9 = scmp.lt.u32.totalorder %s5061_s30, %s5199_s2 }
 0x9b8   : > { %p3952_p10 = scmp.lt.u32.totalorder %s3950_s1, %s3946_s6  ;;  %p3954_p12 = scmp.lt.u32.totalorder %s3946_s6, %s5061_s30 }
 0x9b9   : > { %p3948_p7 = pnand %p3947_p4, %p4184_p5 }
 0x9ba   : > { %p3953_p11 = por %p3952_p10, %p3951_p9 }
 0x9bb   : > { %p3949_p8 = pneg %p3948_p7 }
 0x9bc   : > { %p3955_p13 = por %p3954_p12, %p3953_p11 }
 0x9be   : > { %p3956_p0 = pnand %p3955_p13, %p3949_p8 }
 0x9c0   : > { %3959 = shalt.err (!%p3956_p0)
}
 0x9c1   : > { %3797 = dma.vmem_to_hbm [thread:$0]  (%p4184_p5), %s5063_s4, 16, %s5061_s30, %s3316_s3  }
 0x9c2 PF: > { %s5200_s12 = sld [smem:[#allocation8_spill]]  ;;  %s5201_s29 = sld [smem:[#allocation6_spill]] }
 0x9c8   : > { %p3803_p1 = scmp.ge.s32.totalorder %s5200_s12, 2  ;;  %s3340_s9 = sand.u32 1, %s5201_s29  }
 0x9c9   : > { %s3341_s28 = scalar_lea.sflag [#allocation4], %s3340_s9 }
 0x9ca   : > { %p3800_p2 = pnand %p3803_p1, %p4188_p6 }
 0x9cc   : > { %3977 = dma.done.wait (!%p3800_p2), %s3341_s28, 16  }
 0x9cd   : > { %3979 = vsyncadd (!%p3800_p2), %s3341_s28, 4294967280  ;;  %s5203_s30 = sld [smem:[#allocation9_spill]]  ;;  %s5204_s6 = sld [smem:[#allocation7_spill]] }
 0x9ce   : > { %s5205_s9 = sld [smem:[#allocation10_spill]]  ;;  %s5206_s8 = smov %s3986_s5 }
 0x9d3   : > { %p38_p3 = scmp.ge.s32.totalorder %s5203_s30, 4   ;;  %s5207_s5 = smov %s5204_s6 }
 0x9d5   :  { %40 = sbr.rel (!%p38_p3) target bundleno = 18 (0x12), region = 167 }
 0x9dc   :  { %3345 = vsyncpa [#allocation4], 1 }
 0x9dd   :  { %3347 = vsyncpa [#allocation4 + $0x1], 1 }

</bundles_post_ra>
